<compile_context>
chip_gen: v7x
topology: tpu7x:2x2x1
jax: 0.10.0
libtpu: 0.0.40
codegen_flags: <defaults>
</compile_context>

<pallas_src>
import functools
import math

import numpy as np

import jax
import jax.numpy as jnp
from jax import lax
from jax.experimental import pallas as pl
from jax.experimental.pallas import tpu as pltpu

BN_EPS = 1e-5


def _rotate_lanes(x, k):
    """out[..., p] = x[..., (p + k) % L] for a static shift k (lane rotation)."""
    if k == 0:
        return x
    return jnp.concatenate([x[..., k:], x[..., :k]], axis=-1)


# ----------------------------------------------------------------------------
# Fused Pallas kernel (stride = 1)
# ----------------------------------------------------------------------------
def _block_kernel(x_ref, wdw_ref, mask_ref, g1_ref, b1_ref, wpw_ref, g2_ref, b2_ref,
                  o_ref, *, shifts, inv_m):
    """Fused depthwise3x3(pad=1, stride=1) -> BN1 -> ReLU -> pointwise1x1 -> BN2 -> ReLU.

    x_ref   : (N, Cin, H*W)   NCHW input, spatial dims flattened (lane-dense), f32
    wdw_ref : (9, Cin, 1)     depthwise taps (tap = dh*3 + dw), f32
    mask_ref: (9, 1, H*W)     per-tap validity masks emulating zero padding, f32
    g1/b1   : (1, Cin, 1)     BN1 affine, f32
    wpw_ref : (Cout, Cin)     pointwise weights, f32
    g2/b2   : (Cout, 1)       BN2 affine, f32
    o_ref   : (Cout, N*H*W)   lane-dense channel-major output, f32
    """
    x = x_ref[...]                     # load once, reuse for all 9 taps
    n = x.shape[0]
    wdw = wdw_ref[...]
    msk = mask_ref[...]

    # ---- depthwise 3x3: 9 masked, lane-rotated multiply-accumulates (VPU/XLU) ----
    acc = jnp.zeros(x.shape, jnp.float32)
    for tap in range(9):
        xs = _rotate_lanes(x, shifts[tap])
        acc = acc + (xs * msk[tap][None]) * wdw[tap][None]

    # ---- BN1: single-pass batch stats, folded affine, ReLU (all f32) ----
    s1 = jnp.sum(jnp.sum(acc, axis=2, keepdims=True), axis=0, keepdims=True)       # (1,Cin,1)
    sq1 = jnp.sum(jnp.sum(acc * acc, axis=2, keepdims=True), axis=0, keepdims=True)
    mu1 = s1 * inv_m
    var1 = jnp.maximum(sq1 * inv_m - mu1 * mu1, 0.0)
    scale1 = g1_ref[...] * lax.rsqrt(var1 + BN_EPS)
    shift1 = b1_ref[...] - mu1 * scale1
    hid = jnp.maximum(acc * scale1 + shift1, 0.0)                                   # (N,Cin,HW)

    # ---- channel-major lane-dense hidden (Cin, M) feeding the MXU ----
    h2 = jnp.concatenate([hid[i] for i in range(n)], axis=-1)                       # (Cin, M)

    # ---- pointwise 1x1 conv on the MXU, f32 ----
    y = lax.dot_general(wpw_ref[...], h2,
                        dimension_numbers=(((1,), (0,)), ((), ())),
                        preferred_element_type=jnp.float32)                         # (Cout, M)

    # ---- BN2: single-pass batch stats, folded affine, ReLU; lane-dense store ----
    s2 = jnp.sum(y, axis=1, keepdims=True)
    sq2 = jnp.sum(y * y, axis=1, keepdims=True)
    mu2 = s2 * inv_m
    var2 = jnp.maximum(sq2 * inv_m - mu2 * mu2, 0.0)
    scale2 = g2_ref[...] * lax.rsqrt(var2 + BN_EPS)
    shift2 = b2_ref[...] - mu2 * scale2
    o_ref[...] = jnp.maximum(y * scale2 + shift2, 0.0)


# ----------------------------------------------------------------------------
# Wrapper
# ----------------------------------------------------------------------------
def block_forward(params, x_nchw, *, stride=1):
    """Forward of the PyTorch `Block`. x is NCHW f32; returns NCHW f32."""
    if stride != 1:
        # TODO(synk): Pallas path specializes the module's default stride=1; XLA fallback.
        return block_reference(params, x_nchw, stride=stride)

    n, cin, h, w = x_nchw.shape
    ho, wo = h, w                      # 3x3, pad=1, stride=1
    hw = h * w
    m = n * hw
    cout = params["w_pw"].shape[0]

    # NCHW read directly; only a free reshape (no transpose / pad HBM pass).
    x3 = x_nchw.reshape(n, cin, hw).astype(jnp.float32)

    w_dw = params["w_dw"].reshape(9, cin, 1).astype(jnp.float32)    # (3,3,Cin) -> (9,Cin,1)
    g1 = params["g1"].reshape(1, cin, 1).astype(jnp.float32)
    b1 = params["b1"].reshape(1, cin, 1).astype(jnp.float32)
    w_pw = params["w_pw"].reshape(cout, cin).astype(jnp.float32)    # f32 MXU path
    g2 = params["g2"].reshape(cout, 1).astype(jnp.float32)
    b2 = params["b2"].reshape(cout, 1).astype(jnp.float32)

    # Static per-tap lane shifts + boundary masks (emulate padding=1 with zeros).
    shifts = []
    masks_np = np.zeros((9, 1, hw), np.float32)
    for dh in range(3):
        for dw in range(3):
            tap = dh * 3 + dw
            shifts.append(((dh - 1) * w + (dw - 1)) % hw)
            valid = np.zeros((h, w), np.float32)
            i0, i1 = max(0, 1 - dh), min(h, h + 1 - dh)
            j0, j1 = max(0, 1 - dw), min(w, w + 1 - dw)
            valid[i0:i1, j0:j1] = 1.0
            masks_np[tap, 0] = valid.reshape(hw)
    masks = jnp.asarray(masks_np)
    shifts = tuple(shifts)

    def full(shape):
        return pl.BlockSpec(shape, lambda i, _nd=len(shape): (0,) * _nd)

    kernel = functools.partial(_block_kernel, shifts=shifts, inv_m=1.0 / float(m))
    flops = 33 * m * cin + 2 * m * cin * cout + 6 * m * cout
    bytes_accessed = 4 * (x3.size + w_dw.size + masks.size + g1.size + b1.size
                          + w_pw.size + g2.size + b2.size + cout * m)

    out_t = pl.pallas_call(
        kernel,
        out_shape=jax.ShapeDtypeStruct((cout, m), jnp.float32),
        grid=(1,),
        in_specs=[
            full(x3.shape), full(w_dw.shape), full(masks.shape),
            full(g1.shape), full(b1.shape),
            full(w_pw.shape), full(g2.shape), full(b2.shape),
        ],
        out_specs=full((cout, m)),
        compiler_params=pltpu.CompilerParams(dimension_semantics=("arbitrary",)),
        cost_estimate=pl.CostEstimate(flops=int(flops),
                                      transcendentals=int(cin + cout),
                                      bytes_accessed=int(bytes_accessed)),
    )(x3, w_dw, masks, g1, b1, w_pw, g2, b2)

    # (Cout, N*Ho*Wo) -> (N, Cout, Ho, Wo)
    return jnp.transpose(out_t.reshape(cout, n, ho, wo), (1, 0, 2, 3))


# ----------------------------------------------------------------------------
# Pure-JAX reference (correctness check + stride!=1 fallback)
# ----------------------------------------------------------------------------
def block_reference(params, x_nchw, *, stride=1):
    cin = x_nchw.shape[1]
    w_dw_oihw = jnp.transpose(params["w_dw"], (2, 0, 1))[:, None, :, :]   # (Cin,1,3,3)
    w_pw_oihw = params["w_pw"][:, :, None, None]                           # (Cout,Cin,1,1)

    def bn_relu(y, g, b):
        mu = jnp.mean(y, axis=(0, 2, 3), keepdims=True)
        var = jnp.mean(jnp.square(y - mu), axis=(0, 2, 3), keepdims=True)
        y = (y - mu) * lax.rsqrt(var + BN_EPS)
        return jnp.maximum(y * g.reshape(1, -1, 1, 1) + b.reshape(1, -1, 1, 1), 0.0)

    y = lax.conv_general_dilated(x_nchw, w_dw_oihw, (stride, stride), ((1, 1), (1, 1)),
                                 dimension_numbers=("NCHW", "OIHW", "NCHW"),
                                 feature_group_count=cin)
    y = bn_relu(y, params["g1"], params["b1"])
    y = lax.conv_general_dilated(y, w_pw_oihw, (1, 1), ((0, 0), (0, 0)),
                                 dimension_numbers=("NCHW", "OIHW", "NCHW"))
    return bn_relu(y, params["g2"], params["b2"])


# ----------------------------------------------------------------------------
# Main
# ----------------------------------------------------------------------------
if __name__ == "__main__":
    key = jax.random.PRNGKey(0)
    k1, k2, k3, k4, k5, kx = jax.random.split(key, 6)

    batch, in_planes, out_planes, spatial, stride = 2, 32, 64, 16, 1
    params = {
        "w_dw": jax.random.normal(k1, (3, 3, in_planes), jnp.float32) * math.sqrt(2.0 / 9.0),
        "g1": 1.0 + 0.1 * jax.random.normal(k2, (in_planes,), jnp.float32),
        "b1": 0.1 * jax.random.normal(k3, (in_planes,), jnp.float32),
        "w_pw": jax.random.normal(k4, (out_planes, in_planes), jnp.float32)
                * math.sqrt(2.0 / in_planes),
        "g2": 1.0 + 0.1 * jax.random.normal(k5, (out_planes,), jnp.float32),
        "b2": jnp.zeros((out_planes,), jnp.float32),
    }
    x = jax.random.normal(kx, (batch, in_planes, spatial, spatial), jnp.float32)   # NCHW

    fwd = jax.jit(functools.partial(block_forward, stride=stride))
    out = jax.block_until_ready(fwd(params, x))
    assert out.shape == (batch, out_planes, spatial // stride, spatial // stride), out.shape
    assert bool(jnp.all(jnp.isfinite(out)))

    ref = jax.block_until_ready(
        jax.jit(functools.partial(block_reference, stride=stride))(params, x))
    max_err = float(jnp.max(jnp.abs(out - ref)))
    assert max_err < 1e-2, f"max abs error vs reference: {max_err}"

    print("KERNEL_OK")
</pallas_src>

<mosaic_0001>
module attributes {stable_mosaic.version = 11 : i64} {
  func.func @_block_kernel(%arg0: i32, %arg1: memref<2x32x256xf32, #tpu.memory_space<vmem>>, %arg2: memref<9x32x1xf32, #tpu.memory_space<vmem>>, %arg3: memref<9x1x256xf32, #tpu.memory_space<vmem>>, %arg4: memref<1x32x1xf32, #tpu.memory_space<vmem>>, %arg5: memref<1x32x1xf32, #tpu.memory_space<vmem>>, %arg6: memref<64x32xf32, #tpu.memory_space<vmem>>, %arg7: memref<64x1xf32, #tpu.memory_space<vmem>>, %arg8: memref<64x1xf32, #tpu.memory_space<vmem>>, %arg9: memref<64x512xf32, #tpu.memory_space<vmem>>) attributes {dimension_semantics = [#tpu.dimension_semantics<arbitrary>], iteration_bounds = array<i64: 1>, scalar_prefetch = 0 : i64, scratch_operands = 0 : i64, tpu.core_type = #tpu.core_type<tc>, window_params = [{pipeline_mode = #tpu.pipeline_mode<synchronous>, transform_indices = @transform_0, window_bounds = array<i64: 2, 32, 256>}, {pipeline_mode = #tpu.pipeline_mode<synchronous>, transform_indices = @transform_1, window_bounds = array<i64: 9, 32, 1>}, {pipeline_mode = #tpu.pipeline_mode<synchronous>, transform_indices = @transform_2, window_bounds = array<i64: 9, 1, 256>}, {pipeline_mode = #tpu.pipeline_mode<synchronous>, transform_indices = @transform_3, window_bounds = array<i64: 1, 32, 1>}, {pipeline_mode = #tpu.pipeline_mode<synchronous>, transform_indices = @transform_4, window_bounds = array<i64: 1, 32, 1>}, {pipeline_mode = #tpu.pipeline_mode<synchronous>, transform_indices = @transform_5, window_bounds = array<i64: 64, 32>}, {pipeline_mode = #tpu.pipeline_mode<synchronous>, transform_indices = @transform_6, window_bounds = array<i64: 64, 1>}, {pipeline_mode = #tpu.pipeline_mode<synchronous>, transform_indices = @transform_7, window_bounds = array<i64: 64, 1>}, {pipeline_mode = #tpu.pipeline_mode<synchronous>, transform_indices = @transform_8, window_bounds = array<i64: 64, 512>}]} {
    %c0 = arith.constant 0 : index
    %c0_0 = arith.constant 0 : index
    %c0_1 = arith.constant 0 : index
    %0 = vector.load %arg1[%c0, %c0_0, %c0_1] : memref<2x32x256xf32, #tpu.memory_space<vmem>>, vector<2x32x256xf32>
    %c0_2 = arith.constant 0 : index
    %c0_3 = arith.constant 0 : index
    %c0_4 = arith.constant 0 : index
    %1 = vector.load %arg2[%c0_2, %c0_3, %c0_4] : memref<9x32x1xf32, #tpu.memory_space<vmem>>, vector<9x32x1xf32>
    %c0_5 = arith.constant 0 : index
    %c0_6 = arith.constant 0 : index
    %c0_7 = arith.constant 0 : index
    %2 = vector.load %arg3[%c0_5, %c0_6, %c0_7] : memref<9x1x256xf32, #tpu.memory_space<vmem>>, vector<9x1x256xf32>
    %cst = arith.constant 0.000000e+00 : f32
    %3 = vector.broadcast %cst : f32 to vector<2x32x256xf32>
    %4 = vector.extract_strided_slice %0 {offsets = [0, 0, 239], sizes = [2, 32, 17], strides = [1, 1, 1]} : vector<2x32x256xf32> to vector<2x32x17xf32>
    %5 = vector.extract_strided_slice %0 {offsets = [0, 0, 0], sizes = [2, 32, 239], strides = [1, 1, 1]} : vector<2x32x256xf32> to vector<2x32x239xf32>
    %6 = tpu.concatenate %4, %5 in 2 : vector<2x32x17xf32>, vector<2x32x239xf32> -> vector<2x32x256xf32>
    %7 = vector.extract_strided_slice %2 {offsets = [0, 0, 0], sizes = [1, 1, 256], strides = [1, 1, 1]} : vector<9x1x256xf32> to vector<1x1x256xf32>
    %8 = vector.shape_cast %7 : vector<1x1x256xf32> to vector<1x256xf32>
    %9 = vector.shape_cast %8 : vector<1x256xf32> to vector<1x1x256xf32>
    %10 = vector.broadcast %9 : vector<1x1x256xf32> to vector<2x32x256xf32>
    %11 = arith.mulf %6, %10 : vector<2x32x256xf32>
    %12 = vector.extract_strided_slice %1 {offsets = [0, 0, 0], sizes = [1, 32, 1], strides = [1, 1, 1]} : vector<9x32x1xf32> to vector<1x32x1xf32>
    %13 = vector.shape_cast %12 : vector<1x32x1xf32> to vector<32x1xf32>
    %14 = vector.shape_cast %13 : vector<32x1xf32> to vector<1x32x1xf32>
    %15 = vector.broadcast %14 : vector<1x32x1xf32> to vector<2x32x256xf32>
    %16 = arith.mulf %11, %15 : vector<2x32x256xf32>
    %17 = arith.addf %3, %16 : vector<2x32x256xf32>
    %18 = vector.extract_strided_slice %0 {offsets = [0, 0, 240], sizes = [2, 32, 16], strides = [1, 1, 1]} : vector<2x32x256xf32> to vector<2x32x16xf32>
    %19 = vector.extract_strided_slice %0 {offsets = [0, 0, 0], sizes = [2, 32, 240], strides = [1, 1, 1]} : vector<2x32x256xf32> to vector<2x32x240xf32>
    %20 = tpu.concatenate %18, %19 in 2 : vector<2x32x16xf32>, vector<2x32x240xf32> -> vector<2x32x256xf32>
    %21 = vector.extract_strided_slice %2 {offsets = [1, 0, 0], sizes = [1, 1, 256], strides = [1, 1, 1]} : vector<9x1x256xf32> to vector<1x1x256xf32>
    %22 = vector.shape_cast %21 : vector<1x1x256xf32> to vector<1x256xf32>
    %23 = vector.shape_cast %22 : vector<1x256xf32> to vector<1x1x256xf32>
    %24 = vector.broadcast %23 : vector<1x1x256xf32> to vector<2x32x256xf32>
    %25 = arith.mulf %20, %24 : vector<2x32x256xf32>
    %26 = vector.extract_strided_slice %1 {offsets = [1, 0, 0], sizes = [1, 32, 1], strides = [1, 1, 1]} : vector<9x32x1xf32> to vector<1x32x1xf32>
    %27 = vector.shape_cast %26 : vector<1x32x1xf32> to vector<32x1xf32>
    %28 = vector.shape_cast %27 : vector<32x1xf32> to vector<1x32x1xf32>
    %29 = vector.broadcast %28 : vector<1x32x1xf32> to vector<2x32x256xf32>
    %30 = arith.mulf %25, %29 : vector<2x32x256xf32>
    %31 = arith.addf %17, %30 : vector<2x32x256xf32>
    %32 = vector.extract_strided_slice %0 {offsets = [0, 0, 241], sizes = [2, 32, 15], strides = [1, 1, 1]} : vector<2x32x256xf32> to vector<2x32x15xf32>
    %33 = vector.extract_strided_slice %0 {offsets = [0, 0, 0], sizes = [2, 32, 241], strides = [1, 1, 1]} : vector<2x32x256xf32> to vector<2x32x241xf32>
    %34 = tpu.concatenate %32, %33 in 2 : vector<2x32x15xf32>, vector<2x32x241xf32> -> vector<2x32x256xf32>
    %35 = vector.extract_strided_slice %2 {offsets = [2, 0, 0], sizes = [1, 1, 256], strides = [1, 1, 1]} : vector<9x1x256xf32> to vector<1x1x256xf32>
    %36 = vector.shape_cast %35 : vector<1x1x256xf32> to vector<1x256xf32>
    %37 = vector.shape_cast %36 : vector<1x256xf32> to vector<1x1x256xf32>
    %38 = vector.broadcast %37 : vector<1x1x256xf32> to vector<2x32x256xf32>
    %39 = arith.mulf %34, %38 : vector<2x32x256xf32>
    %40 = vector.extract_strided_slice %1 {offsets = [2, 0, 0], sizes = [1, 32, 1], strides = [1, 1, 1]} : vector<9x32x1xf32> to vector<1x32x1xf32>
    %41 = vector.shape_cast %40 : vector<1x32x1xf32> to vector<32x1xf32>
    %42 = vector.shape_cast %41 : vector<32x1xf32> to vector<1x32x1xf32>
    %43 = vector.broadcast %42 : vector<1x32x1xf32> to vector<2x32x256xf32>
    %44 = arith.mulf %39, %43 : vector<2x32x256xf32>
    %45 = arith.addf %31, %44 : vector<2x32x256xf32>
    %46 = vector.extract_strided_slice %0 {offsets = [0, 0, 255], sizes = [2, 32, 1], strides = [1, 1, 1]} : vector<2x32x256xf32> to vector<2x32x1xf32>
    %47 = vector.extract_strided_slice %0 {offsets = [0, 0, 0], sizes = [2, 32, 255], strides = [1, 1, 1]} : vector<2x32x256xf32> to vector<2x32x255xf32>
    %48 = tpu.concatenate %46, %47 in 2 : vector<2x32x1xf32>, vector<2x32x255xf32> -> vector<2x32x256xf32>
    %49 = vector.extract_strided_slice %2 {offsets = [3, 0, 0], sizes = [1, 1, 256], strides = [1, 1, 1]} : vector<9x1x256xf32> to vector<1x1x256xf32>
    %50 = vector.shape_cast %49 : vector<1x1x256xf32> to vector<1x256xf32>
    %51 = vector.shape_cast %50 : vector<1x256xf32> to vector<1x1x256xf32>
    %52 = vector.broadcast %51 : vector<1x1x256xf32> to vector<2x32x256xf32>
    %53 = arith.mulf %48, %52 : vector<2x32x256xf32>
    %54 = vector.extract_strided_slice %1 {offsets = [3, 0, 0], sizes = [1, 32, 1], strides = [1, 1, 1]} : vector<9x32x1xf32> to vector<1x32x1xf32>
    %55 = vector.shape_cast %54 : vector<1x32x1xf32> to vector<32x1xf32>
    %56 = vector.shape_cast %55 : vector<32x1xf32> to vector<1x32x1xf32>
    %57 = vector.broadcast %56 : vector<1x32x1xf32> to vector<2x32x256xf32>
    %58 = arith.mulf %53, %57 : vector<2x32x256xf32>
    %59 = arith.addf %45, %58 : vector<2x32x256xf32>
    %60 = vector.extract_strided_slice %2 {offsets = [4, 0, 0], sizes = [1, 1, 256], strides = [1, 1, 1]} : vector<9x1x256xf32> to vector<1x1x256xf32>
    %61 = vector.shape_cast %60 : vector<1x1x256xf32> to vector<1x256xf32>
    %62 = vector.shape_cast %61 : vector<1x256xf32> to vector<1x1x256xf32>
    %63 = vector.broadcast %62 : vector<1x1x256xf32> to vector<2x32x256xf32>
    %64 = arith.mulf %0, %63 : vector<2x32x256xf32>
    %65 = vector.extract_strided_slice %1 {offsets = [4, 0, 0], sizes = [1, 32, 1], strides = [1, 1, 1]} : vector<9x32x1xf32> to vector<1x32x1xf32>
    %66 = vector.shape_cast %65 : vector<1x32x1xf32> to vector<32x1xf32>
    %67 = vector.shape_cast %66 : vector<32x1xf32> to vector<1x32x1xf32>
    %68 = vector.broadcast %67 : vector<1x32x1xf32> to vector<2x32x256xf32>
    %69 = arith.mulf %64, %68 : vector<2x32x256xf32>
    %70 = arith.addf %59, %69 : vector<2x32x256xf32>
    %71 = vector.extract_strided_slice %0 {offsets = [0, 0, 1], sizes = [2, 32, 255], strides = [1, 1, 1]} : vector<2x32x256xf32> to vector<2x32x255xf32>
    %72 = vector.extract_strided_slice %0 {offsets = [0, 0, 0], sizes = [2, 32, 1], strides = [1, 1, 1]} : vector<2x32x256xf32> to vector<2x32x1xf32>
    %73 = tpu.concatenate %71, %72 in 2 : vector<2x32x255xf32>, vector<2x32x1xf32> -> vector<2x32x256xf32>
    %74 = vector.extract_strided_slice %2 {offsets = [5, 0, 0], sizes = [1, 1, 256], strides = [1, 1, 1]} : vector<9x1x256xf32> to vector<1x1x256xf32>
    %75 = vector.shape_cast %74 : vector<1x1x256xf32> to vector<1x256xf32>
    %76 = vector.shape_cast %75 : vector<1x256xf32> to vector<1x1x256xf32>
    %77 = vector.broadcast %76 : vector<1x1x256xf32> to vector<2x32x256xf32>
    %78 = arith.mulf %73, %77 : vector<2x32x256xf32>
    %79 = vector.extract_strided_slice %1 {offsets = [5, 0, 0], sizes = [1, 32, 1], strides = [1, 1, 1]} : vector<9x32x1xf32> to vector<1x32x1xf32>
    %80 = vector.shape_cast %79 : vector<1x32x1xf32> to vector<32x1xf32>
    %81 = vector.shape_cast %80 : vector<32x1xf32> to vector<1x32x1xf32>
    %82 = vector.broadcast %81 : vector<1x32x1xf32> to vector<2x32x256xf32>
    %83 = arith.mulf %78, %82 : vector<2x32x256xf32>
    %84 = arith.addf %70, %83 : vector<2x32x256xf32>
    %85 = vector.extract_strided_slice %0 {offsets = [0, 0, 15], sizes = [2, 32, 241], strides = [1, 1, 1]} : vector<2x32x256xf32> to vector<2x32x241xf32>
    %86 = vector.extract_strided_slice %0 {offsets = [0, 0, 0], sizes = [2, 32, 15], strides = [1, 1, 1]} : vector<2x32x256xf32> to vector<2x32x15xf32>
    %87 = tpu.concatenate %85, %86 in 2 : vector<2x32x241xf32>, vector<2x32x15xf32> -> vector<2x32x256xf32>
    %88 = vector.extract_strided_slice %2 {offsets = [6, 0, 0], sizes = [1, 1, 256], strides = [1, 1, 1]} : vector<9x1x256xf32> to vector<1x1x256xf32>
    %89 = vector.shape_cast %88 : vector<1x1x256xf32> to vector<1x256xf32>
    %90 = vector.shape_cast %89 : vector<1x256xf32> to vector<1x1x256xf32>
    %91 = vector.broadcast %90 : vector<1x1x256xf32> to vector<2x32x256xf32>
    %92 = arith.mulf %87, %91 : vector<2x32x256xf32>
    %93 = vector.extract_strided_slice %1 {offsets = [6, 0, 0], sizes = [1, 32, 1], strides = [1, 1, 1]} : vector<9x32x1xf32> to vector<1x32x1xf32>
    %94 = vector.shape_cast %93 : vector<1x32x1xf32> to vector<32x1xf32>
    %95 = vector.shape_cast %94 : vector<32x1xf32> to vector<1x32x1xf32>
    %96 = vector.broadcast %95 : vector<1x32x1xf32> to vector<2x32x256xf32>
    %97 = arith.mulf %92, %96 : vector<2x32x256xf32>
    %98 = arith.addf %84, %97 : vector<2x32x256xf32>
    %99 = vector.extract_strided_slice %0 {offsets = [0, 0, 16], sizes = [2, 32, 240], strides = [1, 1, 1]} : vector<2x32x256xf32> to vector<2x32x240xf32>
    %100 = vector.extract_strided_slice %0 {offsets = [0, 0, 0], sizes = [2, 32, 16], strides = [1, 1, 1]} : vector<2x32x256xf32> to vector<2x32x16xf32>
    %101 = tpu.concatenate %99, %100 in 2 : vector<2x32x240xf32>, vector<2x32x16xf32> -> vector<2x32x256xf32>
    %102 = vector.extract_strided_slice %2 {offsets = [7, 0, 0], sizes = [1, 1, 256], strides = [1, 1, 1]} : vector<9x1x256xf32> to vector<1x1x256xf32>
    %103 = vector.shape_cast %102 : vector<1x1x256xf32> to vector<1x256xf32>
    %104 = vector.shape_cast %103 : vector<1x256xf32> to vector<1x1x256xf32>
    %105 = vector.broadcast %104 : vector<1x1x256xf32> to vector<2x32x256xf32>
    %106 = arith.mulf %101, %105 : vector<2x32x256xf32>
    %107 = vector.extract_strided_slice %1 {offsets = [7, 0, 0], sizes = [1, 32, 1], strides = [1, 1, 1]} : vector<9x32x1xf32> to vector<1x32x1xf32>
    %108 = vector.shape_cast %107 : vector<1x32x1xf32> to vector<32x1xf32>
    %109 = vector.shape_cast %108 : vector<32x1xf32> to vector<1x32x1xf32>
    %110 = vector.broadcast %109 : vector<1x32x1xf32> to vector<2x32x256xf32>
    %111 = arith.mulf %106, %110 : vector<2x32x256xf32>
    %112 = arith.addf %98, %111 : vector<2x32x256xf32>
    %113 = vector.extract_strided_slice %0 {offsets = [0, 0, 17], sizes = [2, 32, 239], strides = [1, 1, 1]} : vector<2x32x256xf32> to vector<2x32x239xf32>
    %114 = vector.extract_strided_slice %0 {offsets = [0, 0, 0], sizes = [2, 32, 17], strides = [1, 1, 1]} : vector<2x32x256xf32> to vector<2x32x17xf32>
    %115 = tpu.concatenate %113, %114 in 2 : vector<2x32x239xf32>, vector<2x32x17xf32> -> vector<2x32x256xf32>
    %116 = vector.extract_strided_slice %2 {offsets = [8, 0, 0], sizes = [1, 1, 256], strides = [1, 1, 1]} : vector<9x1x256xf32> to vector<1x1x256xf32>
    %117 = vector.shape_cast %116 : vector<1x1x256xf32> to vector<1x256xf32>
    %118 = vector.shape_cast %117 : vector<1x256xf32> to vector<1x1x256xf32>
    %119 = vector.broadcast %118 : vector<1x1x256xf32> to vector<2x32x256xf32>
    %120 = arith.mulf %115, %119 : vector<2x32x256xf32>
    %121 = vector.extract_strided_slice %1 {offsets = [8, 0, 0], sizes = [1, 32, 1], strides = [1, 1, 1]} : vector<9x32x1xf32> to vector<1x32x1xf32>
    %122 = vector.shape_cast %121 : vector<1x32x1xf32> to vector<32x1xf32>
    %123 = vector.shape_cast %122 : vector<32x1xf32> to vector<1x32x1xf32>
    %124 = vector.broadcast %123 : vector<1x32x1xf32> to vector<2x32x256xf32>
    %125 = arith.mulf %120, %124 : vector<2x32x256xf32>
    %126 = arith.addf %112, %125 : vector<2x32x256xf32>
    %cst_8 = arith.constant dense<0.000000e+00> : vector<2x32xf32>
    %127 = vector.multi_reduction <add>, %126, %cst_8 [2] : vector<2x32x256xf32> to vector<2x32xf32>
    %128 = vector.shape_cast %127 : vector<2x32xf32> to vector<2x32x1xf32>
    %cst_9 = arith.constant dense<0.000000e+00> : vector<32x1xf32>
    %129 = vector.multi_reduction <add>, %128, %cst_9 [0] : vector<2x32x1xf32> to vector<32x1xf32>
    %130 = vector.shape_cast %129 : vector<32x1xf32> to vector<1x32x1xf32>
    %131 = arith.mulf %126, %126 : vector<2x32x256xf32>
    %cst_10 = arith.constant dense<0.000000e+00> : vector<2x32xf32>
    %132 = vector.multi_reduction <add>, %131, %cst_10 [2] : vector<2x32x256xf32> to vector<2x32xf32>
    %133 = vector.shape_cast %132 : vector<2x32xf32> to vector<2x32x1xf32>
    %cst_11 = arith.constant dense<0.000000e+00> : vector<32x1xf32>
    %134 = vector.multi_reduction <add>, %133, %cst_11 [0] : vector<2x32x1xf32> to vector<32x1xf32>
    %135 = vector.shape_cast %134 : vector<32x1xf32> to vector<1x32x1xf32>
    %cst_12 = arith.constant 0.001953125 : f32
    %136 = vector.broadcast %cst_12 : f32 to vector<1x32x1xf32>
    %137 = arith.mulf %130, %136 : vector<1x32x1xf32>
    %cst_13 = arith.constant 0.001953125 : f32
    %138 = vector.broadcast %cst_13 : f32 to vector<1x32x1xf32>
    %139 = arith.mulf %135, %138 : vector<1x32x1xf32>
    %140 = arith.mulf %137, %137 : vector<1x32x1xf32>
    %141 = arith.subf %139, %140 : vector<1x32x1xf32>
    %cst_14 = arith.constant 0.000000e+00 : f32
    %142 = vector.broadcast %cst_14 : f32 to vector<1x32x1xf32>
    %143 = arith.maximumf %141, %142 : vector<1x32x1xf32>
    %c0_15 = arith.constant 0 : index
    %c0_16 = arith.constant 0 : index
    %c0_17 = arith.constant 0 : index
    %144 = vector.load %arg4[%c0_15, %c0_16, %c0_17] : memref<1x32x1xf32, #tpu.memory_space<vmem>>, vector<1x32x1xf32>
    %cst_18 = arith.constant 9.99999974E-6 : f32
    %145 = vector.broadcast %cst_18 : f32 to vector<1x32x1xf32>
    %146 = arith.addf %143, %145 : vector<1x32x1xf32>
    %147 = math.rsqrt %146 : vector<1x32x1xf32>
    %148 = arith.mulf %144, %147 : vector<1x32x1xf32>
    %c0_19 = arith.constant 0 : index
    %c0_20 = arith.constant 0 : index
    %c0_21 = arith.constant 0 : index
    %149 = vector.load %arg5[%c0_19, %c0_20, %c0_21] : memref<1x32x1xf32, #tpu.memory_space<vmem>>, vector<1x32x1xf32>
    %150 = arith.mulf %137, %148 : vector<1x32x1xf32>
    %151 = arith.subf %149, %150 : vector<1x32x1xf32>
    %152 = vector.broadcast %148 : vector<1x32x1xf32> to vector<2x32x256xf32>
    %153 = arith.mulf %126, %152 : vector<2x32x256xf32>
    %154 = vector.broadcast %151 : vector<1x32x1xf32> to vector<2x32x256xf32>
    %155 = arith.addf %153, %154 : vector<2x32x256xf32>
    %cst_22 = arith.constant 0.000000e+00 : f32
    %156 = vector.broadcast %cst_22 : f32 to vector<2x32x256xf32>
    %157 = arith.maximumf %155, %156 : vector<2x32x256xf32>
    %158 = vector.extract_strided_slice %157 {offsets = [0, 0, 0], sizes = [1, 32, 256], strides = [1, 1, 1]} : vector<2x32x256xf32> to vector<1x32x256xf32>
    %159 = vector.shape_cast %158 : vector<1x32x256xf32> to vector<32x256xf32>
    %160 = vector.extract_strided_slice %157 {offsets = [1, 0, 0], sizes = [1, 32, 256], strides = [1, 1, 1]} : vector<2x32x256xf32> to vector<1x32x256xf32>
    %161 = vector.shape_cast %160 : vector<1x32x256xf32> to vector<32x256xf32>
    %162 = tpu.concatenate %159, %161 in 1 : vector<32x256xf32>, vector<32x256xf32> -> vector<32x512xf32>
    %c0_23 = arith.constant 0 : index
    %c0_24 = arith.constant 0 : index
    %163 = vector.load %arg6[%c0_23, %c0_24] : memref<64x32xf32, #tpu.memory_space<vmem>>, vector<64x32xf32>
    %cst_25 = arith.constant dense<0.000000e+00> : vector<64x512xf32>
    %164 = tpu.matmul %163, %162, %cst_25 {dimension_numbers = #tpu.dot_dimension_numbers<[1], [0], [0], [1], [0, 0, 1, 1], [], []>} : vector<64x32xf32>, vector<32x512xf32>, vector<64x512xf32> -> vector<64x512xf32>
    %cst_26 = arith.constant dense<0.000000e+00> : vector<64xf32>
    %165 = vector.multi_reduction <add>, %164, %cst_26 [1] : vector<64x512xf32> to vector<64xf32>
    %166 = vector.shape_cast %165 : vector<64xf32> to vector<64x1xf32>
    %167 = arith.mulf %164, %164 : vector<64x512xf32>
    %cst_27 = arith.constant dense<0.000000e+00> : vector<64xf32>
    %168 = vector.multi_reduction <add>, %167, %cst_27 [1] : vector<64x512xf32> to vector<64xf32>
    %169 = vector.shape_cast %168 : vector<64xf32> to vector<64x1xf32>
    %cst_28 = arith.constant 0.001953125 : f32
    %170 = vector.broadcast %cst_28 : f32 to vector<64x1xf32>
    %171 = arith.mulf %166, %170 : vector<64x1xf32>
    %cst_29 = arith.constant 0.001953125 : f32
    %172 = vector.broadcast %cst_29 : f32 to vector<64x1xf32>
    %173 = arith.mulf %169, %172 : vector<64x1xf32>
    %174 = arith.mulf %171, %171 : vector<64x1xf32>
    %175 = arith.subf %173, %174 : vector<64x1xf32>
    %cst_30 = arith.constant 0.000000e+00 : f32
    %176 = vector.broadcast %cst_30 : f32 to vector<64x1xf32>
    %177 = arith.maximumf %175, %176 : vector<64x1xf32>
    %c0_31 = arith.constant 0 : index
    %c0_32 = arith.constant 0 : index
    %178 = vector.load %arg7[%c0_31, %c0_32] : memref<64x1xf32, #tpu.memory_space<vmem>>, vector<64x1xf32>
    %cst_33 = arith.constant 9.99999974E-6 : f32
    %179 = vector.broadcast %cst_33 : f32 to vector<64x1xf32>
    %180 = arith.addf %177, %179 : vector<64x1xf32>
    %181 = math.rsqrt %180 : vector<64x1xf32>
    %182 = arith.mulf %178, %181 : vector<64x1xf32>
    %c0_34 = arith.constant 0 : index
    %c0_35 = arith.constant 0 : index
    %183 = vector.load %arg8[%c0_34, %c0_35] : memref<64x1xf32, #tpu.memory_space<vmem>>, vector<64x1xf32>
    %184 = arith.mulf %171, %182 : vector<64x1xf32>
    %185 = arith.subf %183, %184 : vector<64x1xf32>
    %186 = vector.broadcast %182 : vector<64x1xf32> to vector<64x512xf32>
    %187 = arith.mulf %164, %186 : vector<64x512xf32>
    %188 = vector.broadcast %185 : vector<64x1xf32> to vector<64x512xf32>
    %189 = arith.addf %187, %188 : vector<64x512xf32>
    %cst_36 = arith.constant 0.000000e+00 : f32
    %190 = vector.broadcast %cst_36 : f32 to vector<64x512xf32>
    %191 = arith.maximumf %189, %190 : vector<64x512xf32>
    %c0_37 = arith.constant 0 : index
    %c0_38 = arith.constant 0 : index
    %192 = vector.load %arg9[%c0_37, %c0_38] : memref<64x512xf32, #tpu.memory_space<vmem>>, vector<64x512xf32>
    tpu.vector_store %arg9[%c0_37, %c0_38], %191 {strides = array<i32>} : memref<64x512xf32, #tpu.memory_space<vmem>>, vector<64x512xf32>,
    return
  }
  func.func @transform_0(%arg0: i32) -> (i32, i32, i32) {
    %c0_i32 = arith.constant 0 : i32
    %c0_i32_0 = arith.constant 0 : i32
    %c0_i32_1 = arith.constant 0 : i32
    %c0_i32_2 = arith.constant 0 : i32
    return %c0_i32, %c0_i32_0, %c0_i32_1 : i32, i32, i32
  }
  func.func @transform_1(%arg0: i32) -> (i32, i32, i32) {
    %c0_i32 = arith.constant 0 : i32
    %c0_i32_0 = arith.constant 0 : i32
    %c0_i32_1 = arith.constant 0 : i32
    %c0_i32_2 = arith.constant 0 : i32
    return %c0_i32, %c0_i32_0, %c0_i32_1 : i32, i32, i32
  }
  func.func @transform_2(%arg0: i32) -> (i32, i32, i32) {
    %c0_i32 = arith.constant 0 : i32
    %c0_i32_0 = arith.constant 0 : i32
    %c0_i32_1 = arith.constant 0 : i32
    %c0_i32_2 = arith.constant 0 : i32
    return %c0_i32, %c0_i32_0, %c0_i32_1 : i32, i32, i32
  }
  func.func @transform_3(%arg0: i32) -> (i32, i32, i32) {
    %c0_i32 = arith.constant 0 : i32
    %c0_i32_0 = arith.constant 0 : i32
    %c0_i32_1 = arith.constant 0 : i32
    %c0_i32_2 = arith.constant 0 : i32
    return %c0_i32, %c0_i32_0, %c0_i32_1 : i32, i32, i32
  }
  func.func @transform_4(%arg0: i32) -> (i32, i32, i32) {
    %c0_i32 = arith.constant 0 : i32
    %c0_i32_0 = arith.constant 0 : i32
    %c0_i32_1 = arith.constant 0 : i32
    %c0_i32_2 = arith.constant 0 : i32
    return %c0_i32, %c0_i32_0, %c0_i32_1 : i32, i32, i32
  }
  func.func @transform_5(%arg0: i32) -> (i32, i32) {
    %c0_i32 = arith.constant 0 : i32
    %c0_i32_0 = arith.constant 0 : i32
    %c0_i32_1 = arith.constant 0 : i32
    return %c0_i32, %c0_i32_0 : i32, i32
  }
  func.func @transform_6(%arg0: i32) -> (i32, i32) {
    %c0_i32 = arith.constant 0 : i32
    %c0_i32_0 = arith.constant 0 : i32
    %c0_i32_1 = arith.constant 0 : i32
    return %c0_i32, %c0_i32_0 : i32, i32
  }
  func.func @transform_7(%arg0: i32) -> (i32, i32) {
    %c0_i32 = arith.constant 0 : i32
    %c0_i32_0 = arith.constant 0 : i32
    %c0_i32_1 = arith.constant 0 : i32
    return %c0_i32, %c0_i32_0 : i32, i32
  }
  func.func @transform_8(%arg0: i32) -> (i32, i32) {
    %c0_i32 = arith.constant 0 : i32
    %c0_i32_0 = arith.constant 0 : i32
    %c0_i32_1 = arith.constant 0 : i32
    return %c0_i32, %c0_i32_0 : i32, i32
  }
}

</mosaic_0001>

<bundles_post_ra>
// kernel: block_forward.1
= control target key start
LH: loop header
LB: loop body
LE: loop exit
PB: predicated region body
PF: predicated region fallthrough
CT: control target
= control target key end

     0   :  { %v2356_v0 = vmov 0   ;;  %s2357_s21 = smov 17   ;;  %s2358_s16 = smov 16   ;;  %vm146_vm0 = vcmask 138240   ;;  %vm298_vm1 = vcmask 130048   ;;  %vm450_vm2 = vcmask 121856   ;;  %s4618_s1 = inlined_call_operand.vmem [shape: f32[9,32,1], index: 1, kind: input, shape index: {}]   ;;  %s4619_s0 = inlined_call_operand.vmem [shape: f32[2,32,256], index: 0, kind: input, shape index: {}]   ;;  %s4620_s2 = inlined_call_operand.vmem [shape: f32[9,1,256], index: 2, kind: input, shape index: {}]   ;;  %s4621_s3 = inlined_call_operand.vmem [shape: f32[1,32,1], index: 3, kind: input, shape index: {}]   ;;  %s4622_s4 = inlined_call_operand.vmem [shape: f32[1,32,1], index: 4, kind: input, shape index: {}]   ;;  %s4623_s5 = inlined_call_operand.vmem [shape: f32[64,32], index: 5, kind: input, shape index: {}]   ;;  %s4624_s6 = inlined_call_operand.vmem [shape: f32[64,1], index: 6, kind: input, shape index: {}]   ;;  %s4625_s7 = inlined_call_operand.vmem [shape: f32[64,1], index: 7, kind: input, shape index: {}]   ;;  %s4626_s8 = inlined_call_operand.vmem [shape: f32[64,512], index: 8, kind: output, shape index: {}]  }
   0x1   :  { %2331 = vset.pattern.permute.xlu1 %v2356_v0  ;;  %2330 = vset.pattern.permute.xlu0 %v2356_v0  ;;  %v49_v1 = vld [vmem:[%s4618_s1 + $0x20] sm:$0xff]  ;;  %v50_v3 = vld [vmem:[%s4618_s1 + $0x28] sm:$0xff]  ;;  %v2432_v7 = vld [vmem:[%s4619_s0 + $0x18] sm:$0xff]  ;;  %s2359_s26 = smov 15   ;;  %s2361_s25 = smov 127   ;;  %vm602_vm3 = vcmask 7168  }
   0x2   :  { %v45_v2 = vld [vmem:[%s4618_s1] sm:$0xff]  ;;  %360 = vperm.xlu1 %2331, %v49_v1   ;;  %v46_v4 = vld [vmem:[%s4618_s1 + $0x8] sm:$0xff]  ;;  %v2446_v9 = vld [vmem:[%s4619_s0 + $0x58] sm:$0xff]  ;;  %s2362_s10 = smov 113   ;;  %s2363_s20 = smov 112   ;;  %vm825_vm4 = vcmask 1039360  }
   0x3   :  { %208 = vperm.xlu0 %2330, %v45_v2   ;;  %v54_v5 = vld [vmem:[%s4618_s1 + $0x48] sm:$0xff]  ;;  %v53_v6 = vld [vmem:[%s4618_s1 + $0x40] sm:$0xff]  ;;  %v2460_v11 = vld [vmem:[%s4619_s0 + $0x10] sm:$0xff]  ;;  %vm977_vm5 = vcmask 924672   ;;  %vm1129_vm6 = vcmask 916480   ;;  %vm1281_vm7 = vcmask 908288  }
   0x4   :  { %v2437_v8 = vld [vmem:[%s4619_s0 + $0x8] sm:$0xff]  ;;  %v2465_v12 = vld [vmem:[%s4619_s0] sm:$0xff]  ;;  %v2474_v13 = vld [vmem:[%s4619_s0 + $0x50] sm:$0xff]  ;;  %vm1617_vm8 = vcmask 261120  }
   0x5   :  { %v2451_v10 = vld [vmem:[%s4619_s0 + $0x48] sm:$0xff]  ;;  %v2479_v14 = vld [vmem:[%s4619_s0 + $0x40] sm:$0xff]  ;;  %v48_v15 = vld [vmem:[%s4618_s1 + $0x18] sm:$0xff] }
   0x6   :  { %365 = vperm.xlu1 %2331, %v50_v3   ;;  %v47_v16 = vld [vmem:[%s4618_s1 + $0x10] sm:$0xff]  ;;  %v52_v17 = vld [vmem:[%s4618_s1 + $0x38] sm:$0xff]  ;;  %v58_v19 = vld [vmem:[%s4618_s1 + $0x68] sm:$0xff] }
   0x7   :  { %213 = vperm.xlu0 %2330, %v46_v4   ;;  %v51_v18 = vld [vmem:[%s4618_s1 + $0x30] sm:$0xff]  ;;  %v57_v20 = vld [vmem:[%s4618_s1 + $0x60] sm:$0xff]  ;;  %v56_v21 = vld [vmem:[%s4618_s1 + $0x58] sm:$0xff] }
   0x8   :  { %v55_v22 = vld [vmem:[%s4618_s1 + $0x50] sm:$0xff]  ;;  %v62_v23 = vld [vmem:[%s4618_s1 + $0x88] sm:$0xff]  ;;  %v61_v24 = vld [vmem:[%s4618_s1 + $0x80] sm:$0xff] }
   0x9   :  { %v2550_v25 = vld [vmem:[%s4619_s0 + $0x38] sm:$0xff]  ;;  %v2555_v26 = vld [vmem:[%s4619_s0 + $0x28] sm:$0xff]  ;;  %v2578_v29 = vld [vmem:[%s4619_s0 + $0x30] sm:$0xff] }
   0xa   :  { %517 = vperm.xlu1 %2331, %v54_v5   ;;  %v2564_v27 = vld [vmem:[%s4619_s0 + $0x78] sm:$0xff]  ;;  %v2569_v28 = vld [vmem:[%s4619_s0 + $0x68] sm:$0xff]  ;;  %v2583_v30 = vld [vmem:[%s4619_s0 + $0x20] sm:$0xff] }
   0xb   :  { %512 = vperm.xlu0 %2330, %v53_v6   ;;  %v2592_v31 = vld [vmem:[%s4619_s0 + $0x70] sm:$0xff]  ;;  %v2597_v32 = vld [vmem:[%s4619_s0 + $0x60] sm:$0xff]  ;;  %s2360_s0 = smov 1   ;;  %v60_v33 = vld [vmem:[%s4618_s1 + $0x78] sm:$0xff] }
   0xc   :  { %v59_v34 = vld [vmem:[%s4618_s1 + $0x70] sm:$0xff]  ;;  %v66_v37 = vld [vmem:[%s4618_s1 + $0xa8] sm:$0xff]  ;;  %v65_v38 = vld [vmem:[%s4618_s1 + $0xa0] sm:$0xff] }
   0xd   :  { %v64_v49 = vld [vmem:[%s4618_s1 + $0x98] sm:$0xff]  ;;  %v63_v50 = vld [vmem:[%s4618_s1 + $0x90] sm:$0xff]  ;;  %v70_v53 = vld [vmem:[%s4618_s1 + $0xc8] sm:$0xff] }
   0xe   :  { %100 = vrot.lane.b32.xlu1 %v2432_v7, %s2357_s21  ;;  %v69_v54 = vld [vmem:[%s4618_s1 + $0xc0] sm:$0xff] }
   0xf   :  { %98 = vrot.lane.b32.xlu0 %v2437_v8, %s2357_s21 }
  0x12   :  { %108 = vrot.lane.b32.xlu1 %v2446_v9, %s2357_s21 }
  0x13   :  { %106 = vrot.lane.b32.xlu0 %v2451_v10, %s2357_s21 }
  0x16   :  { %132 = vrot.lane.b32.xlu1 %v2460_v11, %s2357_s21 }
  0x17   :  { %130 = vrot.lane.b32.xlu0 %v2465_v12, %s2357_s21 }
  0x1a   :  { %140 = vrot.lane.b32.xlu1 %v2474_v13, %s2357_s21 }
  0x1b   :  { %138 = vrot.lane.b32.xlu0 %v2479_v14, %s2357_s21 }
  0x1e   :  { %223 = vperm.xlu1 %2331, %v48_v15  }
  0x1f   :  { %218 = vperm.xlu0 %2330, %v47_v16  }
  0x22   :  { %260 = vrot.lane.b32.xlu1 %v2432_v7, %s2358_s16 }
  0x23   :  { %258 = vrot.lane.b32.xlu0 %v2437_v8, %s2358_s16 }
  0x26   :  { %268 = vrot.lane.b32.xlu1 %v2446_v9, %s2358_s16 }
  0x27   :  { %266 = vrot.lane.b32.xlu0 %v2451_v10, %s2358_s16 }
  0x2a   :  { %284 = vrot.lane.b32.xlu1 %v2460_v11, %s2358_s16 }
  0x2b   :  { %282 = vrot.lane.b32.xlu0 %v2465_v12, %s2358_s16 }
  0x2e   :  { %292 = vrot.lane.b32.xlu1 %v2474_v13, %s2358_s16 }
  0x2f   :  { %290 = vrot.lane.b32.xlu0 %v2479_v14, %s2358_s16 }
  0x32   :  { %375 = vperm.xlu1 %2331, %v52_v17   ;;  %v68_v17 = vld [vmem:[%s4618_s1 + $0xb8] sm:$0xff] }
  0x33   :  { %370 = vperm.xlu0 %2330, %v51_v18   ;;  %v67_v18 = vld [vmem:[%s4618_s1 + $0xb0] sm:$0xff] }
  0x36   :  { %669 = vperm.xlu1 %2331, %v58_v19  }
  0x37   :  { %664 = vperm.xlu0 %2330, %v57_v20  }
  0x3a   :  { %412 = vrot.lane.b32.xlu1 %v2432_v7, %s2359_s26 }
  0x3b   :  { %410 = vrot.lane.b32.xlu0 %v2437_v8, %s2359_s26 }
  0x3e   :  { %420 = vrot.lane.b32.xlu1 %v2446_v9, %s2359_s26 }
  0x3f   :  { %418 = vrot.lane.b32.xlu0 %v2451_v10, %s2359_s26 }
  0x42   :  { %436 = vrot.lane.b32.xlu1 %v2460_v11, %s2359_s26 }
  0x43   :  { %434 = vrot.lane.b32.xlu0 %v2465_v12, %s2359_s26 }
  0x46   :  { %444 = vrot.lane.b32.xlu1 %v2474_v13, %s2359_s26 }
  0x47   :  { %442 = vrot.lane.b32.xlu0 %v2479_v14, %s2359_s26 }
  0x4a   :  { %527 = vperm.xlu1 %2331, %v56_v21   ;;  %v74_v21 = vld [vmem:[%s4618_s1 + $0xe8] sm:$0xff] }
  0x4b   :  { %522 = vperm.xlu0 %2330, %v55_v22   ;;  %v73_v22 = vld [vmem:[%s4618_s1 + $0xe0] sm:$0xff] }
  0x4e   :  { %748 = vperm.xlu1 %2331, %v62_v23  }
  0x4f   :  { %743 = vperm.xlu0 %2330, %v61_v24  }
  0x52   :  { %104 = vrot.lane.b32.xlu1 %v2550_v25, %s2357_s21 }
  0x53   :  { %102 = vrot.lane.b32.xlu0 %v2555_v26, %s2357_s21 }
  0x56   :  { %112 = vrot.lane.b32.xlu1 %v2564_v27, %s2357_s21 }
  0x57   :  { %110 = vrot.lane.b32.xlu0 %v2569_v28, %s2357_s21 }
  0x5a   :  { %136 = vrot.lane.b32.xlu1 %v2578_v29, %s2357_s21 }
  0x5b   :  { %134 = vrot.lane.b32.xlu0 %v2583_v30, %s2357_s21 }
  0x5e   :  { %144 = vrot.lane.b32.xlu1 %v2592_v31, %s2357_s21 }
  0x5f   :  { %142 = vrot.lane.b32.xlu0 %v2597_v32, %s2357_s21 }
  0x62   :  { %264 = vrot.lane.b32.xlu1 %v2550_v25, %s2358_s16 }
  0x63   :  { %262 = vrot.lane.b32.xlu0 %v2555_v26, %s2358_s16 }
  0x66   :  { %272 = vrot.lane.b32.xlu1 %v2564_v27, %s2358_s16 }
  0x67   :  { %270 = vrot.lane.b32.xlu0 %v2569_v28, %s2358_s16 }
  0x6a   :  { %288 = vrot.lane.b32.xlu1 %v2578_v29, %s2358_s16 }
  0x6b   :  { %286 = vrot.lane.b32.xlu0 %v2583_v30, %s2358_s16 }
  0x6e   :  { %296 = vrot.lane.b32.xlu1 %v2592_v31, %s2358_s16 }
  0x6f   :  { %294 = vrot.lane.b32.xlu0 %v2597_v32, %s2358_s16 }
  0x72   :  { %564 = vrot.lane.b32.xlu1 %v2432_v7, %s2360_s0 }
  0x73   :  { %562 = vrot.lane.b32.xlu0 %v2437_v8, %s2360_s0 }
  0x76   :  { %572 = vrot.lane.b32.xlu1 %v2446_v9, %s2360_s0 }
  0x77   :  { %570 = vrot.lane.b32.xlu0 %v2451_v10, %s2360_s0 }
  0x7a   :  { %588 = vrot.lane.b32.xlu1 %v2460_v11, %s2360_s0 }
  0x7b   :  { %586 = vrot.lane.b32.xlu0 %v2465_v12, %s2360_s0 }
  0x7e   :  { %596 = vrot.lane.b32.xlu1 %v2474_v13, %s2360_s0 }
  0x7f   :  { %594 = vrot.lane.b32.xlu0 %v2479_v14, %s2360_s0 }
  0x81   :  { %v2641_v35 = vpop.permute.xlu1 %360 }
  0x82   :  { %v2643_v36 = vpop.permute.xlu0 %208  ;;  %679 = vperm.xlu1 %2331, %v60_v33  }
  0x83   :  { %674 = vperm.xlu0 %2330, %v59_v34  }
  0x85   :  { %v2651_v39 = vpop.permute.xlu1 %365 }
  0x86   :  { %v2653_v40 = vpop.permute.xlu0 %213  ;;  %900 = vperm.xlu1 %2331, %v66_v37  }
  0x87   :  { %895 = vperm.xlu0 %2330, %v65_v38  }
  0x89   :  { %v2655_v41 = vpop.permute.xlu1 %517 }
  0x8a   :  { %v2657_v42 = vpop.permute.xlu0 %512  ;;  %416 = vrot.lane.b32.xlu1 %v2550_v25, %s2359_s26 }
  0x8b   :  { %414 = vrot.lane.b32.xlu0 %v2555_v26, %s2359_s26 }
  0x8d   :  { %v2663_v43 = vpop.permute.xlu1 %100 }
  0x8e   :  { %v2665_v44 = vpop.permute.xlu0 %98  ;;  %424 = vrot.lane.b32.xlu1 %v2564_v27, %s2359_s26 }
  0x8f   :  { %422 = vrot.lane.b32.xlu0 %v2569_v28, %s2359_s26 }
  0x91   :  { %v2671_v45 = vpop.permute.xlu1 %108 }
  0x92   :  { %v2673_v46 = vpop.permute.xlu0 %106  ;;  %440 = vrot.lane.b32.xlu1 %v2578_v29, %s2359_s26 }
  0x93   :  { %438 = vrot.lane.b32.xlu0 %v2583_v30, %s2359_s26 }
  0x95   :  { %v2679_v47 = vpop.permute.xlu1 %132 }
  0x96   :  { %v2681_v48 = vpop.permute.xlu0 %130  ;;  %448 = vrot.lane.b32.xlu1 %v2592_v31, %s2359_s26 }
  0x97   :  { %446 = vrot.lane.b32.xlu0 %v2597_v32, %s2359_s26 }
  0x99   :  { %v2693_v51 = vpop.permute.xlu1 %140 }
  0x9a   :  { %v2695_v52 = vpop.permute.xlu0 %138  ;;  %758 = vperm.xlu1 %2331, %v64_v49  }
  0x9b   :  { %753 = vperm.xlu0 %2330, %v63_v50  }
  0x9d   :  { %v2703_v55 = vpop.permute.xlu1 %223 }
  0x9e   :  { %4720 = vst [vmem:[#allocation2_spill] sm:$0xff] %v2703_v55  ;;  %v2705_v56 = vpop.permute.xlu0 %218  ;;  %1052 = vperm.xlu1 %2331, %v70_v53  }
  0x9f   :  { %4721 = vst [vmem:[#allocation3_spill] sm:$0xff] %v2705_v56  ;;  %1047 = vperm.xlu0 %2330, %v69_v54  }
  0xa1   :  { %v2707_v57 = vpop.permute.xlu1 %260 }
  0xa2   :  { %v2709_v58 = vpop.permute.xlu0 %258  ;;  %568 = vrot.lane.b32.xlu1 %v2550_v25, %s2360_s0 }
  0xa3   :  { %566 = vrot.lane.b32.xlu0 %v2555_v26, %s2360_s0 }
  0xa5   :  { %v2715_v59 = vpop.permute.xlu1 %268 }
  0xa6   :  { %v2717_v60 = vpop.permute.xlu0 %266  ;;  %576 = vrot.lane.b32.xlu1 %v2564_v27, %s2360_s0 }
  0xa7   :  { %574 = vrot.lane.b32.xlu0 %v2569_v28, %s2360_s0 }
  0xa9   :  { %v2723_v61 = vpop.permute.xlu1 %284 }
  0xaa   :  { %v2725_v62 = vpop.permute.xlu0 %282  ;;  %592 = vrot.lane.b32.xlu1 %v2578_v29, %s2360_s0 }
  0xab   :  { %590 = vrot.lane.b32.xlu0 %v2583_v30, %s2360_s0 }
  0xad   :  { %v2731_v63 = vpop.permute.xlu1 %292 }
  0xae   :  { %v2733_v0 = vpop.permute.xlu0 %290  ;;  %600 = vrot.lane.b32.xlu1 %v2592_v31, %s2360_s0 }
  0xaf   :  { %598 = vrot.lane.b32.xlu0 %v2597_v32, %s2360_s0 }
  0xb1   :  { %v2739_v1 = vpop.permute.xlu1 %375 }
  0xb2   :  { %4722 = vst [vmem:[#allocation4_spill] sm:$0xff] %v2739_v1  ;;  %v2741_v2 = vpop.permute.xlu0 %370  ;;  %795 = vrot.lane.b32.xlu1 %v2437_v8, %s2361_s25 }
  0xb3   :  { %4723 = vst [vmem:[#allocation5_spill] sm:$0xff] %v2741_v2  ;;  %793 = vrot.lane.b32.xlu0 %v2465_v12, %s2361_s25 }
  0xb5   :  { %v2747_v3 = vpop.permute.xlu1 %669 }
  0xb6   :  { %4724 = vst [vmem:[#allocation6_spill] sm:$0xff] %v2747_v3  ;;  %v2749_v4 = vpop.permute.xlu0 %664  ;;  %799 = vrot.lane.b32.xlu1 %v2432_v7, %s2361_s25 }
  0xb7   :  { %4725 = vst [vmem:[#allocation7_spill] sm:$0xff] %v2749_v4  ;;  %797 = vrot.lane.b32.xlu0 %v2460_v11, %s2361_s25 }
  0xb9   :  { %v2755_v5 = vpop.permute.xlu1 %412 }
  0xba   :  { %v2757_v6 = vpop.permute.xlu0 %410  ;;  %811 = vrot.lane.b32.xlu1 %v2451_v10, %s2361_s25 }
  0xbb   :  { %809 = vrot.lane.b32.xlu0 %v2479_v14, %s2361_s25 }
  0xbd   :  { %v2763_v15 = vpop.permute.xlu1 %420 }
  0xbe   :  { %v2765_v16 = vpop.permute.xlu0 %418  ;;  %815 = vrot.lane.b32.xlu1 %v2446_v9, %s2361_s25 }
  0xbf   :  { %813 = vrot.lane.b32.xlu0 %v2474_v13, %s2361_s25 }
  0xc1   :  { %v2777_v19 = vpop.permute.xlu1 %436 }
  0xc2   :  { %v2779_v20 = vpop.permute.xlu0 %434  ;;  %910 = vperm.xlu1 %2331, %v68_v17   ;;  %v72_v17 = vld [vmem:[%s4618_s1 + $0xd8] sm:$0xff] }
  0xc3   :  { %905 = vperm.xlu0 %2330, %v67_v18   ;;  %v71_v18 = vld [vmem:[%s4618_s1 + $0xd0] sm:$0xff] }
  0xc5   :  { %v2787_v23 = vpop.permute.xlu1 %444 }
  0xc6   :  { %v2789_v24 = vpop.permute.xlu0 %442  ;;  %1204 = vperm.xlu1 %2331, %v74_v21  }
  0xc7   :  { %1199 = vperm.xlu0 %2330, %v73_v22  }
  0xc9   :  { %v2791_v33 = vpop.permute.xlu1 %527 }
  0xca   :  { %4726 = vst [vmem:[#allocation8_spill] sm:$0xff] %v2791_v33  ;;  %v2793_v34 = vpop.permute.xlu0 %522  ;;  %947 = vrot.lane.b32.xlu1 %v2437_v8, %s2362_s10  ;;  %v77_v33 = vld [vmem:[%s4618_s1 + $0x100] sm:$0xff] }
  0xcb   :  { %4727 = vst [vmem:[#allocation9_spill] sm:$0xff] %v2793_v34  ;;  %945 = vrot.lane.b32.xlu0 %v2465_v12, %s2362_s10  ;;  %v78_v34 = vld [vmem:[%s4618_s1 + $0x108] sm:$0xff] }
  0xcd   :  { %v2799_v37 = vpop.permute.xlu1 %748 }
  0xce   :  { %4728 = vst [vmem:[#allocation10_spill] sm:$0xff] %v2799_v37  ;;  %v2801_v38 = vpop.permute.xlu0 %743  ;;  %951 = vrot.lane.b32.xlu1 %v2432_v7, %s2362_s10 }
  0xcf   :  { %4729 = vst [vmem:[#allocation11_spill] sm:$0xff] %v2801_v38  ;;  %949 = vrot.lane.b32.xlu0 %v2460_v11, %s2362_s10  ;;  %v148_v38 = vsel %vm146_vm0, %v2679_v47, %v2663_v43 }
  0xd1   :  { %v2807_v49 = vpop.permute.xlu1 %104 }
  0xd2   :  { %v2809_v50 = vpop.permute.xlu0 %102  ;;  %963 = vrot.lane.b32.xlu1 %v2451_v10, %s2362_s10 }
  0xd3   :  { %4730 = vst [vmem:[#allocation12_spill] sm:$0xff] %v2809_v50  ;;  %961 = vrot.lane.b32.xlu0 %v2479_v14, %s2362_s10 }
  0xd5   :  { %v2815_v53 = vpop.permute.xlu1 %112 }
  0xd6   :  { %4731 = vst [vmem:[#allocation13_spill] sm:$0xff] %v2815_v53  ;;  %v2817_v54 = vpop.permute.xlu0 %110  ;;  %967 = vrot.lane.b32.xlu1 %v2446_v9, %s2362_s10 }
  0xd7   :  { %4732 = vst [vmem:[#allocation14_spill] sm:$0xff] %v2817_v54  ;;  %965 = vrot.lane.b32.xlu0 %v2474_v13, %s2362_s10 }
  0xd9   :  { %v2829_v21 = vpop.permute.xlu1 %136 }
  0xda   :  { %v2831_v22 = vpop.permute.xlu0 %134  ;;  %1062 = vperm.xlu1 %2331, %v72_v17  }
  0xdb   :  { %4733 = vst [vmem:[#allocation15_spill] sm:$0xff] %v2831_v22  ;;  %1057 = vperm.xlu0 %2330, %v71_v18  }
  0xdd   :  { %v2839_v3 = vpop.permute.xlu1 %144 }
  0xde   :  { %4734 = vst [vmem:[#allocation16_spill] sm:$0xff] %v2839_v3  ;;  %v2841_v4 = vpop.permute.xlu0 %142  ;;  %1356 = vperm.xlu1 %2331, %v78_v34   ;;  %v172_v3 = vsel %vm146_vm0, %v2663_v43, %v2679_v47  ;;  %v171_v43 = vsel %vm146_vm0, %v2665_v44, %v2681_v48 }
  0xdf   :  { %4735 = vst [vmem:[#allocation17_spill] sm:$0xff] %v2841_v4  ;;  %1351 = vperm.xlu0 %2330, %v77_v33  }
  0xe1   :  { %v2843_v2 = vpop.permute.xlu1 %264 }
  0xe2   :  { %4736 = vst [vmem:[#allocation18_spill] sm:$0xff] %v2843_v2  ;;  %v2845_v1 = vpop.permute.xlu0 %262  ;;  %803 = vrot.lane.b32.xlu1 %v2555_v26, %s2361_s25 }
  0xe3   :  { %4737 = vst [vmem:[#allocation19_spill] sm:$0xff] %v2845_v1  ;;  %801 = vrot.lane.b32.xlu0 %v2583_v30, %s2361_s25 }
  0xe5   :  { %v2851_v17 = vpop.permute.xlu1 %272 }
  0xe6   :  { %4738 = vst [vmem:[#allocation20_spill] sm:$0xff] %v2851_v17  ;;  %v2853_v18 = vpop.permute.xlu0 %270  ;;  %807 = vrot.lane.b32.xlu1 %v2550_v25, %s2361_s25 }
  0xe7   :  { %4739 = vst [vmem:[#allocation21_spill] sm:$0xff] %v2853_v18  ;;  %805 = vrot.lane.b32.xlu0 %v2578_v29, %s2361_s25 }
  0xe9   :  { %v2859_v33 = vpop.permute.xlu1 %288 }
  0xea   :  { %4740 = vst [vmem:[#allocation22_spill] sm:$0xff] %v2859_v33  ;;  %v2861_v34 = vpop.permute.xlu0 %286  ;;  %819 = vrot.lane.b32.xlu1 %v2569_v28, %s2361_s25 }
  0xeb   :  { %4741 = vst [vmem:[#allocation23_spill] sm:$0xff] %v2861_v34  ;;  %817 = vrot.lane.b32.xlu0 %v2597_v32, %s2361_s25 }
  0xed   :  { %v2867_v56 = vpop.permute.xlu1 %296 }
  0xee   :  { %4742 = vst [vmem:[#allocation24_spill] sm:$0xff] %v2867_v56  ;;  %v2869_v17 = vpop.permute.xlu0 %294  ;;  %823 = vrot.lane.b32.xlu1 %v2564_v27, %s2361_s25 }
  0xef   :  { %4743 = vst [vmem:[#allocation25_spill] sm:$0xff] %v2869_v17  ;;  %821 = vrot.lane.b32.xlu0 %v2592_v31, %s2361_s25  ;;  %s2364_s25 = smov 111  }
  0xf1   :  { %v2875_v18 = vpop.permute.xlu1 %564 }
  0xf2   :  { %4744 = vst [vmem:[#allocation26_spill] sm:$0xff] %v2875_v18  ;;  %v2877_v1 = vpop.permute.xlu0 %562  ;;  %1099 = vrot.lane.b32.xlu1 %v2437_v8, %s2363_s20 }
  0xf3   :  { %4745 = vst [vmem:[#allocation27_spill] sm:$0xff] %v2877_v1  ;;  %1097 = vrot.lane.b32.xlu0 %v2465_v12, %s2363_s20 }
  0xf5   :  { %v2883_v56 = vpop.permute.xlu1 %572 }
  0xf6   :  { %4746 = vst [vmem:[#allocation28_spill] sm:$0xff] %v2883_v56  ;;  %v2885_v17 = vpop.permute.xlu0 %570  ;;  %1103 = vrot.lane.b32.xlu1 %v2432_v7, %s2363_s20 }
  0xf7   :  { %4747 = vst [vmem:[#allocation29_spill] sm:$0xff] %v2885_v17  ;;  %1101 = vrot.lane.b32.xlu0 %v2460_v11, %s2363_s20  ;;  %v76_v17 = vld [vmem:[%s4618_s1 + $0xf8] sm:$0xff] }
  0xf9   :  { %v2891_v18 = vpop.permute.xlu1 %588 }
  0xfa   :  { %4748 = vst [vmem:[#allocation30_spill] sm:$0xff] %v2891_v18  ;;  %v2893_v1 = vpop.permute.xlu0 %586  ;;  %1115 = vrot.lane.b32.xlu1 %v2451_v10, %s2363_s20  ;;  %v75_v18 = vld [vmem:[%s4618_s1 + $0xf0] sm:$0xff] }
  0xfb   :  { %4749 = vst [vmem:[#allocation31_spill] sm:$0xff] %v2893_v1  ;;  %1113 = vrot.lane.b32.xlu0 %v2479_v14, %s2363_s20 }
  0xfd   :  { %v2899_v34 = vpop.permute.xlu1 %596 }
  0xfe   :  { %4750 = vst [vmem:[#allocation32_spill] sm:$0xff] %v2899_v34  ;;  %v2901_v56 = vpop.permute.xlu0 %594  ;;  %1119 = vrot.lane.b32.xlu1 %v2446_v9, %s2363_s20 }
  0xff   :  { %4751 = vst [vmem:[#allocation33_spill] sm:$0xff] %v2901_v56  ;;  %1117 = vrot.lane.b32.xlu0 %v2474_v13, %s2363_s20 }
 0x101   :  { %v2913_v1 = vpop.permute.xlu1 %679 }
 0x102   :  { %4752 = vst [vmem:[#allocation34_spill] sm:$0xff] %v2913_v1  ;;  %v2915_v55 = vpop.permute.xlu0 %674  ;;  %1214 = vperm.xlu1 %2331, %v76_v17  }
 0x103   :  { %4753 = vst [vmem:[#allocation35_spill] sm:$0xff] %v2915_v55  ;;  %1209 = vperm.xlu0 %2330, %v75_v18  }
 0x105   :  { %v2917_v34 = vpop.permute.xlu1 %900 }
 0x106   :  { %4754 = vst [vmem:[#allocation36_spill] sm:$0xff] %v2917_v34  ;;  %v2919_v56 = vpop.permute.xlu0 %895  ;;  %955 = vrot.lane.b32.xlu1 %v2555_v26, %s2362_s10 }
 0x107   :  { %4755 = vst [vmem:[#allocation37_spill] sm:$0xff] %v2919_v56  ;;  %953 = vrot.lane.b32.xlu0 %v2583_v30, %s2362_s10 }
 0x109   :  { %v2925_v33 = vpop.permute.xlu1 %416 }
 0x10a   :  { %4756 = vst [vmem:[#allocation38_spill] sm:$0xff] %v2925_v33  ;;  %v2927_v2 = vpop.permute.xlu0 %414  ;;  %959 = vrot.lane.b32.xlu1 %v2550_v25, %s2362_s10 }
 0x10b   :  { %4757 = vst [vmem:[#allocation39_spill] sm:$0xff] %v2927_v2  ;;  %957 = vrot.lane.b32.xlu0 %v2578_v29, %s2362_s10 }
 0x10d   :  { %v2933_v17 = vpop.permute.xlu1 %424 }
 0x10e   :  { %4758 = vst [vmem:[#allocation40_spill] sm:$0xff] %v2933_v17  ;;  %v2935_v18 = vpop.permute.xlu0 %422  ;;  %971 = vrot.lane.b32.xlu1 %v2569_v28, %s2362_s10 }
 0x10f   :  { %4759 = vst [vmem:[#allocation41_spill] sm:$0xff] %v2935_v18  ;;  %969 = vrot.lane.b32.xlu0 %v2597_v32, %s2362_s10 }
 0x111   :  { %v2941_v34 = vpop.permute.xlu1 %440 }
 0x112   :  { %4760 = vst [vmem:[#allocation42_spill] sm:$0xff] %v2941_v34  ;;  %v2943_v56 = vpop.permute.xlu0 %438  ;;  %975 = vrot.lane.b32.xlu1 %v2564_v27, %s2362_s10  ;;  %v180_v34 = vlaneseq }
 0x113   :  { %4761 = vst [vmem:[#allocation43_spill] sm:$0xff] %v2943_v56  ;;  %973 = vrot.lane.b32.xlu0 %v2592_v31, %s2362_s10 }
 0x115   :  { %v2949_v1 = vpop.permute.xlu1 %448 }
 0x116   :  { %4762 = vst [vmem:[#allocation44_spill] sm:$0xff] %v2949_v1  ;;  %v2951_v55 = vpop.permute.xlu0 %446  ;;  %1251 = vrot.lane.b32.xlu1 %v2437_v8, %s2364_s25 }
 0x117   :  { %4763 = vst [vmem:[#allocation45_spill] sm:$0xff] %v2951_v55  ;;  %1249 = vrot.lane.b32.xlu0 %v2465_v12, %s2364_s25 }
 0x119   :  { %v2957_v18 = vpop.permute.xlu1 %758 }
 0x11a   :  { %4764 = vst [vmem:[#allocation46_spill] sm:$0xff] %v2957_v18  ;;  %v2959_v17 = vpop.permute.xlu0 %753  ;;  %1255 = vrot.lane.b32.xlu1 %v2432_v7, %s2364_s25 }
 0x11b   :  { %4765 = vst [vmem:[#allocation47_spill] sm:$0xff] %v2959_v17  ;;  %1253 = vrot.lane.b32.xlu0 %v2460_v11, %s2364_s25 }
 0x11d   :  { %v2965_v1 = vpop.permute.xlu1 %1052 }
 0x11e   :  { %4766 = vst [vmem:[#allocation48_spill] sm:$0xff] %v2965_v1  ;;  %v2967_v55 = vpop.permute.xlu0 %1047  ;;  %1267 = vrot.lane.b32.xlu1 %v2451_v10, %s2364_s25  ;;  %v80_v1 = vld [vmem:[%s4618_s1 + $0x118] sm:$0xff] }
 0x11f   :  { %4767 = vst [vmem:[#allocation49_spill] sm:$0xff] %v2967_v55  ;;  %1265 = vrot.lane.b32.xlu0 %v2479_v14, %s2364_s25  ;;  %v79_v55 = vld [vmem:[%s4618_s1 + $0x110] sm:$0xff] }
 0x121   :  { %v2973_v56 = vpop.permute.xlu1 %568 }
 0x122   :  { %4768 = vst [vmem:[#allocation50_spill] sm:$0xff] %v2973_v56  ;;  %v2975_v18 = vpop.permute.xlu0 %566  ;;  %1271 = vrot.lane.b32.xlu1 %v2446_v9, %s2364_s25 }
 0x123   :  { %4769 = vst [vmem:[#allocation51_spill] sm:$0xff] %v2975_v18  ;;  %1269 = vrot.lane.b32.xlu0 %v2474_v13, %s2364_s25 }
 0x125   :  { %v2987_v17 = vpop.permute.xlu1 %576 }
 0x126   :  { %4770 = vst [vmem:[#allocation52_spill] sm:$0xff] %v2987_v17  ;;  %v2989_v2 = vpop.permute.xlu0 %574  ;;  %1366 = vperm.xlu1 %2331, %v80_v1  }
 0x127   :  { %4771 = vst [vmem:[#allocation53_spill] sm:$0xff] %v2989_v2  ;;  %1361 = vperm.xlu0 %2330, %v79_v55   ;;  %v181_v55 = vshrl.u32 %v180_v34, 7  ;;  %v85_v34 = vld [vmem:[%s4620_s2 + $0x8] sm:$0x3] }
 0x129   :  { %v2991_v56 = vpop.permute.xlu1 %592  ;;  %v3015_v17 = vsub.s32 0, %v181_v55 }
 0x12a   :  { %4772 = vst [vmem:[#allocation54_spill] sm:$0xff] %v2991_v56  ;;  %v2993_v18 = vpop.permute.xlu0 %590  ;;  %1107 = vrot.lane.b32.xlu1 %v2555_v26, %s2363_s20 }
 0x12b   :  { %4773 = vst [vmem:[#allocation55_spill] sm:$0xff] %v2993_v18  ;;  %1105 = vrot.lane.b32.xlu0 %v2583_v30, %s2363_s20 }
 0x12d   :  { %v2999_v33 = vpop.permute.xlu1 %600 }
 0x12e   :  { %4774 = vst [vmem:[#allocation56_spill] sm:$0xff] %v2999_v33  ;;  %v3001_v4 = vpop.permute.xlu0 %598  ;;  %1111 = vrot.lane.b32.xlu1 %v2550_v25, %s2363_s20  ;;  %v81_v33 = vld [vmem:[%s4620_s2] sm:$0x3] }
 0x12f   :  { %4775 = vst [vmem:[#allocation57_spill] sm:$0xff] %v3001_v4  ;;  %1109 = vrot.lane.b32.xlu0 %v2578_v29, %s2363_s20  ;;  %v3017_v4 = vsub.s32 1, %v181_v55  ;;  %v82_v55 = vld [vmem:[%s4620_s2 + $0x2] sm:$0x3]  ;;  %v3037_v56 = vrot.slane %v81_v33, %v3015_v17 }
 0x130   :  { %v3060_v53 = vrot.slane %v82_v55, %v3015_v17 }
 0x131   :  { %v3007_v1 = vpop.permute.xlu1 %795  ;;  %v3040_v18 = vrot.slane %v81_v33, %v3017_v4  ;;  %v3049_v54 = vrot.slane %v85_v34, %v3017_v4  ;;  %v3063_v22 = vrot.slane %v82_v55, %v3017_v4  ;;  %v192_v55 = vmul.f32 %v3037_v56, %v172_v3 }
 0x132   :  { %4776 = vst [vmem:[#allocation58_spill] sm:$0xff] %v3007_v1  ;;  %v3009_v2 = vpop.permute.xlu0 %793  ;;  %1123 = vrot.lane.b32.xlu1 %v2569_v28, %s2363_s20  ;;  %v151_v3 = vsel %vm146_vm0, %v2695_v52, %v2673_v46 }
 0x133   :  { %4777 = vst [vmem:[#allocation59_spill] sm:$0xff] %v3009_v2  ;;  %1121 = vrot.lane.b32.xlu0 %v2597_v32, %s2363_s20  ;;  %v3087_v37 = vmul.f32 %v3049_v54, %v2432_v7  ;;  %v175_v7 = vsel %vm146_vm0, %v2673_v46, %v2695_v52  ;;  %v3126_v52 = vmul.f32 %v3049_v54, %v2437_v8 }
 0x135   :  { %v3025_v1 = vpop.permute.xlu1 %799  ;;  %4782 = vst [vmem:[#allocation64_spill] sm:$0xff] %v3087_v37  ;;  %v3111_v37 = vmul.f32 %v3049_v54, %v2446_v9 }
 0x136   :  { %4778 = vst [vmem:[#allocation60_spill] sm:$0xff] %v3025_v1  ;;  %v3027_v2 = vpop.permute.xlu0 %797  ;;  %1127 = vrot.lane.b32.xlu1 %v2564_v27, %s2363_s20  ;;  %v3046_v1 = vrot.slane %v85_v34, %v3015_v17  ;;  %v147_v34 = vsel %vm146_vm0, %v2681_v48, %v2665_v44  ;;  %v152_v48 = vsel %vm146_vm0, %v2693_v51, %v2671_v45 }
 0x137   :  { %4779 = vst [vmem:[#allocation61_spill] sm:$0xff] %v3027_v2  ;;  %1125 = vrot.lane.b32.xlu0 %v2592_v31, %s2363_s20  ;;  %v83_v2 = vld [vmem:[%s4620_s2 + $0x4] sm:$0x3]  ;;  %v201_v8 = vmul.f32 %v3040_v18, %v152_v48 }
 0x138   :  { %v3076_v47 = vrot.slane %v83_v2, %v3015_v17  ;;  %v3091_v44 = vmul.f32 %v3046_v1, %v2474_v13  ;;  %v190_v13 = vmul.f32 %v3037_v56, %v171_v43  ;;  %v3130_v9 = vmul.f32 %v3046_v1, %v2479_v14 }
 0x139   :  { %v3057_v33 = vpop.permute.xlu1 %811  ;;  %v199_v14 = vmul.f32 %v3040_v18, %v151_v3 }
 0x13a   :  { %4780 = vst [vmem:[#allocation62_spill] sm:$0xff] %v3057_v33  ;;  %v3065_v50 = vpop.permute.xlu0 %809  ;;  %1259 = vrot.lane.b32.xlu1 %v2555_v26, %s2364_s25  ;;  %v3079_v33 = vrot.slane %v83_v2, %v3017_v4  ;;  %4783 = vst [vmem:[#allocation65_spill] sm:$0xff] %v3091_v44  ;;  %v176_v2 = vsel %vm146_vm0, %v2671_v45, %v2693_v51  ;;  %v191_v44 = vmul.f32 %v3040_v18, %v147_v34  ;;  %v84_v51 = vld [vmem:[%s4620_s2 + $0x6] sm:$0x3] }
 0x13b   :  { %4781 = vst [vmem:[#allocation63_spill] sm:$0xff] %v3065_v50  ;;  %1257 = vrot.lane.b32.xlu0 %v2583_v30, %s2364_s25  ;;  %v193_v50 = vmul.f32 %v3040_v18, %v148_v38  ;;  %v3115_v45 = vmul.f32 %v3046_v1, %v2460_v11  ;;  %4786 = vst [vmem:[#allocation68_spill] sm:$0xff] %v3130_v9  ;;  %v3134_v11 = vmul.f32 %v3049_v54, %v2451_v10 }
 0x13c   :  { %v3138_v34 = vmul.f32 %v3046_v1, %v2465_v12  ;;  %v200_v43 = vmul.f32 %v3037_v56, %v176_v2  ;;  %v3153_v12 = vrot.slane %v84_v51, %v3015_v17  ;;  %v3161_v48 = vmul.f32 %v2643_v36, %v190_v13 }
 0x13d   :  { %v3105_v38 = vpop.permute.xlu1 %815  ;;  %4787 = vst [vmem:[#allocation69_spill] sm:$0xff] %v3134_v11  ;;  %v3150_v10 = vmul.f32 %v2653_v40, %v193_v50  ;;  %v3156_v11 = vrot.slane %v84_v51, %v3017_v4  ;;  %v3164_v2 = vmul.f32 %v2643_v36, %v191_v44  ;;  %v3172_v50 = vmul.f32 %v3049_v54, %v2550_v25 }
 0x13e   :  { %4784 = vst [vmem:[#allocation66_spill] sm:$0xff] %v3105_v38  ;;  %v3120_v46 = vpop.permute.xlu0 %813  ;;  %1263 = vrot.lane.b32.xlu1 %v2550_v25, %s2364_s25  ;;  %v3147_v38 = vmul.f32 %v2653_v40, %v192_v55  ;;  %v3168_v55 = vmul.f32 %v3046_v1, %v2578_v29  ;;  %v324_v44 = vsel %vm298_vm1, %v2707_v57, %v2723_v61 }
 0x13f   :  { %4785 = vst [vmem:[#allocation67_spill] sm:$0xff] %v3120_v46  ;;  %1261 = vrot.lane.b32.xlu0 %v2578_v29, %s2364_s25  ;;  %v198_v46 = vmul.f32 %v3037_v56, %v175_v7  ;;  %v300_v7 = vsel %vm298_vm1, %v2723_v61, %v2707_v57  ;;  %v3186_v29 = vmul.f32 %v3046_v1, %v2592_v31 }
 0x140   :  { %v3190_v25 = vmul.f32 %v3049_v54, %v2564_v27  ;;  %v3195_v13 = vmul.f32 %v2653_v40, %v200_v43  ;;  %v3198_v51 = vmul.f32 %v2653_v40, %v201_v8  ;;  %v3204_v57 = vmul.f32 %v2643_v36, %v199_v14 }
 0x141   :  { %v3158_v9 = vpop.permute.xlu1 %910  ;;  %v299_v61 = vsel %vm298_vm1, %v2725_v62, %v2709_v58  ;;  %v304_v43 = vsel %vm298_vm1, %v2731_v63, %v2715_v59  ;;  %v328_v40 = vsel %vm298_vm1, %v2715_v59, %v2731_v63  ;;  %v345_v8 = vmul.f32 %v3063_v22, %v300_v7 }
 0x142   :  { %4788 = vst [vmem:[#allocation70_spill] sm:$0xff] %v3158_v9  ;;  %v3174_v3 = vpop.permute.xlu0 %905  ;;  %1275 = vrot.lane.b32.xlu1 %v2569_v28, %s2364_s25  ;;  %v3201_v9 = vmul.f32 %v2643_v36, %v198_v46  ;;  %v344_v36 = vmul.f32 %v3060_v53, %v324_v44  ;;  %v3224_v14 = vmul.f32 %v3046_v1, %v2583_v30 }
 0x143   :  { %4789 = vst [vmem:[#allocation71_spill] sm:$0xff] %v3174_v3  ;;  %1273 = vrot.lane.b32.xlu0 %v2597_v32, %s2364_s25  ;;  %v323_v3 = vsel %vm298_vm1, %v2709_v58, %v2725_v62  ;;  %v3228_v58 = vmul.f32 %v3049_v54, %v2555_v26  ;;  %v303_v59 = vsel %vm298_vm1, %v2733_v0, %v2717_v60 }
 0x144   :  { %v327_v63 = vsel %vm298_vm1, %v2717_v60, %v2733_v0  ;;  %v3242_v30 = vmul.f32 %v3046_v1, %v2597_v32  ;;  %v3246_v26 = vmul.f32 %v3049_v54, %v2569_v28  ;;  %v343_v7 = vmul.f32 %v3063_v22, %v299_v61 }
 0x145   :  { %v3218_v46 = vpop.permute.xlu1 %1204  ;;  %4791 = vst [vmem:[#allocation73_spill] sm:$0xff] %v3228_v58  ;;  %v352_v44 = vmul.f32 %v3060_v53, %v328_v40  ;;  %v452_v32 = vsel %vm450_vm2, %v2777_v19, %v2755_v5  ;;  %v476_v28 = vsel %vm450_vm2, %v2755_v5, %v2777_v19  ;;  %v475_v60 = vsel %vm450_vm2, %v2757_v6, %v2779_v20 }
 0x146   :  { %4790 = vst [vmem:[#allocation72_spill] sm:$0xff] %v3218_v46  ;;  %v3230_v62 = vpop.permute.xlu0 %1199  ;;  %1279 = vrot.lane.b32.xlu1 %v2564_v27, %s2364_s25  ;;  %4793 = vst [vmem:[#allocation75_spill] sm:$0xff] %v3242_v30  ;;  %v342_v27 = vmul.f32 %v3060_v53, %v323_v3  ;;  %v353_v46 = vmul.f32 %v3063_v22, %v304_v43  ;;  %v380_v54 = vmul.f32 %v2651_v39, %v344_v36  ;;  %v4842_v30 = vld [vmem:[#allocation33_spill] sm:$0xff] }
 0x147   :  { %4792 = vst [vmem:[#allocation74_spill] sm:$0xff] %v3230_v62  ;;  %4794 = vst [vmem:[#allocation76_spill] sm:$0xff] %v3246_v26  ;;  %1277 = vrot.lane.b32.xlu0 %v2592_v31, %s2364_s25  ;;  %v451_v31 = vsel %vm450_vm2, %v2779_v20, %v2757_v6  ;;  %v381_v1 = vmul.f32 %v2651_v39, %v345_v8  ;;  %v350_v3 = vmul.f32 %v3060_v53, %v327_v63 }
 0x148   :  { %v351_v61 = vmul.f32 %v3063_v22, %v303_v59  ;;  %v456_v5 = vsel %vm450_vm2, %v2787_v23, %v2763_v15  ;;  %v480_v6 = vsel %vm450_vm2, %v2763_v15, %v2787_v23  ;;  %v455_v19 = vsel %vm450_vm2, %v2789_v24, %v2765_v16 }
 0x149   :  { %v3266_v0 = vpop.permute.xlu1 %947  ;;  %v479_v20 = vsel %vm450_vm2, %v2765_v16, %v2789_v24  ;;  %v496_v40 = vmul.f32 %v3076_v47, %v476_v28  ;;  %v497_v36 = vmul.f32 %v3079_v33, %v452_v32  ;;  %v494_v8 = vmul.f32 %v3076_v47, %v475_v60 }
 0x14a   :  { %4795 = vst [vmem:[#allocation77_spill] sm:$0xff] %v3266_v0  ;;  %v3272_v43 = vpop.permute.xlu0 %945  ;;  %v495_v59 = vmul.f32 %v3079_v33, %v451_v31  ;;  %v378_v63 = vmul.f32 %v2641_v35, %v342_v27  ;;  %v379_v15 = vmul.f32 %v2641_v35, %v343_v7  ;;  %v388_v23 = vmul.f32 %v2651_v39, %v352_v44  ;;  %v4839_v0 = vld [vmem:[#allocation30_spill] sm:$0xff] }
 0x14b   :  { %4796 = vst [vmem:[#allocation78_spill] sm:$0xff] %v3272_v43  ;;  %v389_v62 = vmul.f32 %v2651_v39, %v353_v46  ;;  %v504_v16 = vmul.f32 %v3076_v47, %v480_v6  ;;  %v505_v24 = vmul.f32 %v3079_v33, %v456_v5  ;;  %v502_v32 = vmul.f32 %v3076_v47, %v479_v20 }
 0x14c   :  { %v503_v28 = vmul.f32 %v3079_v33, %v455_v19  ;;  %v396_v27 = vadd.f32 %v380_v54, %v3147_v38  ;;  %v397_v7 = vadd.f32 %v381_v1, %v3150_v10  ;;  %v386_v44 = vmul.f32 %v2641_v35, %v350_v3  ;;  %v86_v19 = vld [vmem:[%s4620_s2 + $0xa] sm:$0x3] }
 0x14d   :  { %v3294_v43 = vpop.permute.xlu1 %951  ;;  %v387_v39 = vmul.f32 %v2641_v35, %v351_v61  ;;  %v532_v46 = vmul.f32 %v2655_v41, %v496_v40  ;;  %v533_v31 = vmul.f32 %v2655_v41, %v497_v36  ;;  %v530_v5 = vmul.f32 %v2657_v42, %v494_v8 }
 0x14e   :  { %4797 = vst [vmem:[#allocation79_spill] sm:$0xff] %v3294_v43  ;;  %v3300_v60 = vpop.permute.xlu0 %949  ;;  %v531_v6 = vmul.f32 %v2657_v42, %v495_v59  ;;  %v394_v38 = vadd.f32 %v378_v63, %v3161_v48  ;;  %v395_v10 = vadd.f32 %v379_v15, %v3164_v2  ;;  %v404_v54 = vadd.f32 %v388_v23, %v3195_v13  ;;  %v87_v48 = vld [vmem:[%s4620_s2 + $0xc] sm:$0x3]  ;;  %v4836_v43 = vld [vmem:[#allocation4_spill] sm:$0xff] }
 0x14f   :  { %4798 = vst [vmem:[#allocation80_spill] sm:$0xff] %v3300_v60  ;;  %v405_v35 = vadd.f32 %v389_v62, %v3198_v51  ;;  %v540_v3 = vmul.f32 %v2655_v41, %v504_v16  ;;  %v541_v61 = vmul.f32 %v2655_v41, %v505_v24  ;;  %v538_v20 = vmul.f32 %v2657_v42, %v502_v32 }
 0x150   :  { %v539_v40 = vmul.f32 %v2657_v42, %v503_v28  ;;  %v402_v2 = vadd.f32 %v386_v44, %v3201_v9  ;;  %v403_v13 = vadd.f32 %v387_v39, %v3204_v57  ;;  %v3331_v51 = vrot.slane %v86_v19, %v3015_v17  ;;  %v4809_v39 = vld [vmem:[#allocation12_spill] sm:$0xff] }
 0x151   :  { %v3317_v1 = vpop.permute.xlu1 %963  ;;  %v3334_v62 = vrot.slane %v86_v19, %v3017_v4  ;;  %v3336_v41 = vadd.f32 %v532_v46, %v396_v27  ;;  %v3338_v8 = vadd.f32 %v533_v31, %v397_v7  ;;  %v3340_v42 = vadd.f32 %v530_v5, %v394_v38  ;;  %v4808_v7 = vld [vmem:[#allocation64_spill] sm:$0xff]  ;;  %v4810_v46 = vld [vmem:[#allocation15_spill] sm:$0xff]  ;;  %v4811_v38 = vld [vmem:[#allocation13_spill] sm:$0xff] }
 0x152   :  { %4799 = vst [vmem:[#allocation81_spill] sm:$0xff] %v3317_v1  ;;  %v3326_v36 = vpop.permute.xlu0 %961  ;;  %4801 = vst [vmem:[#allocation83_spill] sm:$0xff] %v3331_v51  ;;  %v3342_v59 = vadd.f32 %v531_v6, %v395_v10  ;;  %v150_v9 = vsel %vm146_vm0, %v2829_v21, %v2807_v49  ;;  %v174_v57 = vsel %vm146_vm0, %v2807_v49, %v2829_v21  ;;  %v4807_v49 = vld [vmem:[#allocation10_spill] sm:$0xff]  ;;  %v4812_v10 = vld [vmem:[#allocation16_spill] sm:$0xff] }
 0x153   :  { %4800 = vst [vmem:[#allocation82_spill] sm:$0xff] %v3326_v36  ;;  %4802 = vst [vmem:[#allocation84_spill] sm:$0xff] %v3334_v62  ;;  %v3351_v63 = vrot.slane %v87_v48, %v3015_v17  ;;  %v3354_v15 = vrot.slane %v87_v48, %v3017_v4  ;;  %v3358_v16 = vadd.f32 %v540_v3, %v404_v54  ;;  %v4831_v1 = vld [vmem:[#allocation27_spill] sm:$0xff]  ;;  %v4841_v51 = vld [vmem:[#allocation29_spill] sm:$0xff] }
 0x154   :  { %v3360_v24 = vadd.f32 %v541_v61, %v405_v35  ;;  %v3362_v32 = vadd.f32 %v538_v20, %v402_v2  ;;  %v3364_v28 = vadd.f32 %v539_v40, %v403_v13  ;;  %v3370_v21 = vmul.f32 %v4807_v49, %v3115_v45  ;;  %v4813_v35 = vld [vmem:[#allocation65_spill] sm:$0xff]  ;;  %v4814_v20 = vld [vmem:[#allocation11_spill] sm:$0xff] }
 0x155   :  { %4803 = vst [vmem:[#allocation85_spill] sm:$0xff] %v3351_v63  ;;  %4804 = vst [vmem:[#allocation86_spill] sm:$0xff] %v3354_v15  ;;  %v3356_v23 = vpop.permute.xlu1 %967  ;;  %v3374_v44 = vmul.f32 %v4807_v49, %v4808_v7  ;;  %v149_v31 = vsel %vm146_vm0, %v4810_v46, %v4809_v39  ;;  %v173_v5 = vsel %vm146_vm0, %v4809_v39, %v4810_v46  ;;  %v4817_v7 = vld [vmem:[#allocation17_spill] sm:$0xff]  ;;  %v4819_v46 = vld [vmem:[#allocation18_spill] sm:$0xff] }
 0x156   :  { %4805 = vst [vmem:[#allocation87_spill] sm:$0xff] %v3356_v23  ;;  %v3366_v27 = vpop.permute.xlu0 %965  ;;  %v196_v6 = vmul.f32 %v3037_v56, %v174_v57  ;;  %v197_v19 = vmul.f32 %v3040_v18, %v150_v9  ;;  %v154_v45 = vsel %vm146_vm0, %v4812_v10, %v4811_v38  ;;  %v178_v54 = vsel %vm146_vm0, %v4811_v38, %v4812_v10  ;;  %v4816_v57 = vld [vmem:[#allocation14_spill] sm:$0xff]  ;;  %v4821_v10 = vld [vmem:[#allocation68_spill] sm:$0xff]  ;;  %v4824_v23 = vld [vmem:[#allocation19_spill] sm:$0xff] }
 0x157   :  { %4806 = vst [vmem:[#allocation88_spill] sm:$0xff] %v3366_v27  ;;  %v3392_v3 = vmul.f32 %v4807_v49, %v4813_v35  ;;  %v3396_v61 = vmul.f32 %v4807_v49, %v3111_v37  ;;  %v3400_v40 = vmul.f32 %v4814_v20, %v3138_v34  ;;  %v3404_v48 = vmul.f32 %v4814_v20, %v3126_v52  ;;  %v4820_v38 = vld [vmem:[#allocation22_spill] sm:$0xff]  ;;  %v4825_v15 = vld [vmem:[#allocation23_spill] sm:$0xff] }
 0x158   :  { %v194_v13 = vmul.f32 %v3037_v56, %v173_v5  ;;  %v195_v9 = vmul.f32 %v3040_v18, %v149_v31  ;;  %v153_v39 = vsel %vm146_vm0, %v4817_v7, %v4816_v57  ;;  %v177_v37 = vsel %vm146_vm0, %v4816_v57, %v4817_v7  ;;  %v4823_v7 = vld [vmem:[#allocation2_spill] sm:$0xff]  ;;  %v4832_v63 = vld [vmem:[#allocation31_spill] sm:$0xff] }
 0x159   :  { %v3406_v2 = vpop.permute.xlu1 %1062  ;;  %v204_v49 = vmul.f32 %v3037_v56, %v178_v54  ;;  %v205_v52 = vmul.f32 %v3040_v18, %v154_v45  ;;  %v302_v5 = vsel %vm298_vm1, %v4820_v38, %v4819_v46  ;;  %v326_v31 = vsel %vm298_vm1, %v4819_v46, %v4820_v38 }
 0x15a   :  { %4815 = vst [vmem:[#allocation10_spill] sm:$0xff] %v3406_v2  ;;  %v3416_v34 = vpop.permute.xlu0 %1057  ;;  %v3428_v35 = vmul.f32 %v4814_v20, %v4821_v10  ;;  %v4822_v2 = vld [vmem:[#allocation69_spill] sm:$0xff]  ;;  %v232_v54 = vmul.f32 %v4823_v7, %v196_v6  ;;  %v233_v45 = vmul.f32 %v4823_v7, %v197_v19  ;;  %v203_v27 = vmul.f32 %v3040_v18, %v153_v39  ;;  %v4828_v19 = vld [vmem:[#allocation24_spill] sm:$0xff] }
 0x15b   :  { %4818 = vst [vmem:[#allocation64_spill] sm:$0xff] %v3416_v34  ;;  %v3432_v57 = vmul.f32 %v4814_v20, %v4822_v2  ;;  %v202_v34 = vmul.f32 %v3037_v56, %v177_v37  ;;  %v301_v46 = vsel %vm298_vm1, %v4825_v15, %v4824_v23  ;;  %v325_v38 = vsel %vm298_vm1, %v4824_v23, %v4825_v15  ;;  %v4827_v2 = vld [vmem:[#allocation20_spill] sm:$0xff]  ;;  %v4830_v37 = vld [vmem:[#allocation3_spill] sm:$0xff] }
 0x15c   :  { %v348_v20 = vmul.f32 %v3060_v53, %v326_v31  ;;  %v349_v6 = vmul.f32 %v3063_v22, %v302_v5  ;;  %v306_v56 = vsel %vm298_vm1, %v4828_v19, %v4827_v2  ;;  %v330_v18 = vsel %vm298_vm1, %v4827_v2, %v4828_v19  ;;  %v4833_v19 = vld [vmem:[#allocation21_spill] sm:$0xff] }
 0x15d   :  { %v3444_v10 = vpop.permute.xlu1 %1356  ;;  %v230_v36 = vmul.f32 %v4830_v37, %v194_v13  ;;  %v231_v15 = vmul.f32 %v4830_v37, %v195_v9  ;;  %v240_v23 = vmul.f32 %v4823_v7, %v204_v49  ;;  %v241_v31 = vmul.f32 %v4823_v7, %v205_v52  ;;  %v4834_v49 = vld [vmem:[#allocation25_spill] sm:$0xff] }
 0x15e   :  { %4826 = vst [vmem:[#allocation12_spill] sm:$0xff] %v3444_v10  ;;  %v3454_v39 = vpop.permute.xlu0 %1351  ;;  %v346_v5 = vmul.f32 %v3060_v53, %v325_v38  ;;  %v347_v10 = vmul.f32 %v3063_v22, %v301_v46  ;;  %v603_v60 = vsel %vm602_vm3, %v4832_v63, %v4831_v1  ;;  %v627_v2 = vsel %vm602_vm3, %v4831_v1, %v4832_v63 }
 0x15f   :  { %4829 = vst [vmem:[#allocation15_spill] sm:$0xff] %v3454_v39  ;;  %v356_v13 = vmul.f32 %v3060_v53, %v330_v18  ;;  %v357_v9 = vmul.f32 %v3063_v22, %v306_v56  ;;  %v305_v52 = vsel %vm298_vm1, %v4834_v49, %v4833_v19  ;;  %v329_v7 = vsel %vm298_vm1, %v4833_v19, %v4834_v49  ;;  %v4838_v56 = vld [vmem:[#allocation26_spill] sm:$0xff] }
 0x160   :  { %v238_v38 = vmul.f32 %v4830_v37, %v202_v34  ;;  %v239_v39 = vmul.f32 %v4830_v37, %v203_v27  ;;  %v384_v1 = vmul.f32 %v4836_v43, %v348_v20  ;;  %v385_v63 = vmul.f32 %v4836_v43, %v349_v6 }
 0x161   :  { %v3476_v46 = vpop.permute.xlu1 %803  ;;  %v604_v26 = vsel %vm602_vm3, %v4839_v0, %v4838_v56  ;;  %v628_v19 = vsel %vm602_vm3, %v4838_v56, %v4839_v0  ;;  %v646_v49 = vmul.f32 %v3153_v12, %v627_v2  ;;  %v647_v34 = vmul.f32 %v3156_v11, %v603_v60 }
 0x162   :  { %4835 = vst [vmem:[#allocation13_spill] sm:$0xff] %v3476_v46  ;;  %v3482_v18 = vpop.permute.xlu0 %801  ;;  %v4840_v46 = vld [vmem:[#allocation5_spill] sm:$0xff]  ;;  %v354_v6 = vmul.f32 %v3060_v53, %v329_v7  ;;  %v355_v37 = vmul.f32 %v3063_v22, %v305_v52  ;;  %v393_v62 = vmul.f32 %v4836_v43, %v357_v9  ;;  %v607_v0 = vsel %vm602_vm3, %v4842_v30, %v4841_v51  ;;  %v4845_v22 = vld [vmem:[#allocation32_spill] sm:$0xff] }
 0x163   :  { %4837 = vst [vmem:[#allocation16_spill] sm:$0xff] %v3482_v18  ;;  %v382_v27 = vmul.f32 %v4840_v46, %v346_v5  ;;  %v383_v20 = vmul.f32 %v4840_v46, %v347_v10  ;;  %v392_v18 = vmul.f32 %v4836_v43, %v356_v13  ;;  %v631_v60 = vsel %vm602_vm3, %v4841_v51, %v4842_v30  ;;  %v4844_v5 = vld [vmem:[#allocation28_spill] sm:$0xff]  ;;  %v4846_v30 = vld [vmem:[#allocation7_spill] sm:$0xff] }
 0x164   :  { %v648_v10 = vmul.f32 %v3153_v12, %v628_v19  ;;  %v649_v53 = vmul.f32 %v3156_v11, %v604_v26  ;;  %v608_v13 = vsel %vm602_vm3, %v4845_v22, %v4844_v5  ;;  %v632_v43 = vsel %vm602_vm3, %v4844_v5, %v4845_v22 }
 0x165   :  { %v3504_v2 = vpop.permute.xlu1 %807  ;;  %v3516_v52 = vadd.f32 %v384_v1, %v232_v54  ;;  %v3518_v7 = vadd.f32 %v385_v63, %v233_v45  ;;  %v682_v51 = vmul.f32 %v4846_v30, %v646_v49  ;;  %v683_v56 = vmul.f32 %v4846_v30, %v647_v34 }
 0x166   :  { %4843 = vst [vmem:[#allocation65_spill] sm:$0xff] %v3504_v2  ;;  %v3514_v9 = vpop.permute.xlu0 %805  ;;  %v3522_v19 = vadd.f32 %v382_v27, %v230_v36  ;;  %v3524_v26 = vadd.f32 %v383_v20, %v231_v15  ;;  %v654_v2 = vmul.f32 %v3153_v12, %v631_v60  ;;  %v655_v58 = vmul.f32 %v3156_v11, %v607_v0  ;;  %v4847_v15 = vld [vmem:[#allocation6_spill] sm:$0xff]  ;;  %v4851_v60 = vld [vmem:[#allocation39_spill] sm:$0xff] }
 0x167   :  { %v390_v5 = vmul.f32 %v4840_v46, %v354_v6  ;;  %v391_v22 = vmul.f32 %v4840_v46, %v355_v37  ;;  %v656_v54 = vmul.f32 %v3153_v12, %v632_v43  ;;  %v657_v45 = vmul.f32 %v3156_v11, %v608_v13  ;;  %v4849_v6 = vld [vmem:[#allocation38_spill] sm:$0xff] }
 0x168   :  { %v3534_v63 = vadd.f32 %v392_v18, %v240_v23  ;;  %v3536_v36 = vadd.f32 %v393_v62, %v241_v31  ;;  %v684_v49 = vmul.f32 %v4847_v15, %v648_v10  ;;  %v685_v34 = vmul.f32 %v4847_v15, %v649_v53  ;;  %v4850_v37 = vld [vmem:[#allocation42_spill] sm:$0xff]  ;;  %v88_v62 = vld [vmem:[%s4620_s2 + $0xe] sm:$0x3] }
 0x169   :  { %v3532_v1 = vpop.permute.xlu1 %819  ;;  %v698_v20 = vadd.f32 %v682_v51, %v3340_v42  ;;  %v699_v46 = vadd.f32 %v683_v56, %v3342_v59  ;;  %v454_v0 = vsel %vm450_vm2, %v4850_v37, %v4849_v6  ;;  %v478_v23 = vsel %vm450_vm2, %v4849_v6, %v4850_v37  ;;  %v4852_v42 = vld [vmem:[#allocation43_spill] sm:$0xff] }
 0x16a   :  { %v3540_v27 = vpop.permute.xlu0 %817  ;;  %v690_v31 = vmul.f32 %v4846_v30, %v654_v2  ;;  %v691_v18 = vmul.f32 %v4846_v30, %v655_v58  ;;  %v453_v59 = vsel %vm450_vm2, %v4852_v42, %v4851_v60  ;;  %v477_v10 = vsel %vm450_vm2, %v4851_v60, %v4852_v42 }
 0x16b   :  { %4848 = vst [vmem:[#allocation11_spill] sm:$0xff] %v3540_v27  ;;  %v3561_v53 = vadd.f32 %v390_v5, %v238_v38  ;;  %v3563_v13 = vadd.f32 %v391_v22, %v239_v39  ;;  %v692_v43 = vmul.f32 %v4847_v15, %v656_v54  ;;  %v693_v51 = vmul.f32 %v4847_v15, %v657_v45  ;;  %v4884_v27 = vld [vmem:[#allocation63_spill] sm:$0xff] }
 0x16c   :  { %v500_v58 = vmul.f32 %v3076_v47, %v478_v23  ;;  %v501_v2 = vmul.f32 %v3079_v33, %v454_v0  ;;  %v3574_v6 = vrot.slane %v88_v62, %v3015_v17  ;;  %v3577_v38 = vrot.slane %v88_v62, %v3017_v4 }
 0x16d   :  { %v3567_v56 = vpop.permute.xlu1 %823  ;;  %v700_v39 = vadd.f32 %v684_v49, %v3336_v41  ;;  %v701_v5 = vadd.f32 %v685_v34, %v3338_v8  ;;  %v498_v22 = vmul.f32 %v3076_v47, %v477_v10  ;;  %v499_v54 = vmul.f32 %v3079_v33, %v453_v59  ;;  %v4855_v49 = vld [vmem:[#allocation40_spill] sm:$0xff] }
 0x16e   :  { %4853 = vst [vmem:[#allocation14_spill] sm:$0xff] %v3567_v56  ;;  %v3571_v30 = vpop.permute.xlu0 %821  ;;  %v706_v45 = vadd.f32 %v690_v31, %v3362_v32  ;;  %v707_v15 = vadd.f32 %v691_v18, %v3364_v28  ;;  %v3586_v37 = vadd.f32 %v3404_v48, %v699_v46  ;;  %v3589_v0 = vadd.f32 %v3400_v40, %v698_v20  ;;  %v4856_v8 = vld [vmem:[#allocation44_spill] sm:$0xff]  ;;  %v4858_v40 = vld [vmem:[#allocation41_spill] sm:$0xff] }
 0x16f   :  { %4854 = vst [vmem:[#allocation17_spill] sm:$0xff] %v3571_v30  ;;  %v708_v23 = vadd.f32 %v692_v43, %v3358_v16  ;;  %v709_v41 = vadd.f32 %v693_v51, %v3360_v24  ;;  %v458_v34 = vsel %vm450_vm2, %v4856_v8, %v4855_v49  ;;  %v482_v32 = vsel %vm450_vm2, %v4855_v49, %v4856_v8  ;;  %v4857_v28 = vld [vmem:[#allocation8_spill] sm:$0xff]  ;;  %v4859_v20 = vld [vmem:[#allocation45_spill] sm:$0xff]  ;;  %v4861_v49 = vld [vmem:[#allocation51_spill] sm:$0xff] }
 0x170   :  { %v536_v48 = vmul.f32 %v4857_v28, %v500_v58  ;;  %v537_v46 = vmul.f32 %v4857_v28, %v501_v2  ;;  %v457_v16 = vsel %vm450_vm2, %v4859_v20, %v4858_v40  ;;  %v481_v24 = vsel %vm450_vm2, %v4858_v40, %v4859_v20  ;;  %v4860_v18 = vld [vmem:[#allocation9_spill] sm:$0xff]  ;;  %v4864_v40 = vld [vmem:[#allocation54_spill] sm:$0xff]  ;;  %v4876_v30 = vld [vmem:[#allocation75_spill] sm:$0xff] }
 0x171   :  { %v3599_v62 = vpop.permute.xlu1 %1099  ;;  %v534_v60 = vmul.f32 %v4860_v18, %v498_v22  ;;  %v535_v42 = vmul.f32 %v4860_v18, %v499_v54  ;;  %v3614_v59 = vadd.f32 %v3370_v21, %v700_v39  ;;  %v3617_v10 = vadd.f32 %v3374_v44, %v701_v5  ;;  %v4862_v21 = vld [vmem:[#allocation55_spill] sm:$0xff] }
 0x172   :  { %v3609_v31 = vpop.permute.xlu0 %1097  ;;  %v508_v43 = vmul.f32 %v3076_v47, %v482_v32  ;;  %v509_v51 = vmul.f32 %v3079_v33, %v458_v34  ;;  %v3622_v58 = vadd.f32 %v3428_v35, %v706_v45  ;;  %v3625_v2 = vadd.f32 %v3432_v57, %v707_v15  ;;  %v89_v35 = vld [vmem:[%s4620_s2 + $0x10] sm:$0x3]  ;;  %v4863_v32 = vld [vmem:[#allocation50_spill] sm:$0xff] }
 0x173   :  { %v506_v22 = vmul.f32 %v3076_v47, %v481_v24  ;;  %v507_v54 = vmul.f32 %v3079_v33, %v457_v16  ;;  %v605_v39 = vsel %vm602_vm3, %v4862_v21, %v4861_v49  ;;  %v629_v44 = vsel %vm602_vm3, %v4861_v49, %v4862_v21  ;;  %v4865_v16 = vld [vmem:[#allocation46_spill] sm:$0xff] }
 0x174   :  { %v552_v57 = vadd.f32 %v536_v48, %v3516_v52  ;;  %v553_v47 = vadd.f32 %v537_v46, %v3518_v7  ;;  %v3643_v33 = vadd.f32 %v3392_v3, %v708_v23  ;;  %v3646_v45 = vadd.f32 %v3396_v61, %v709_v41 }
 0x175   :  { %v3635_v5 = vpop.permute.xlu1 %1103  ;;  %v550_v8 = vadd.f32 %v534_v60, %v3522_v19  ;;  %v551_v34 = vadd.f32 %v535_v42, %v3524_v26  ;;  %v606_v20 = vsel %vm602_vm3, %v4864_v40, %v4863_v32  ;;  %v630_v52 = vsel %vm602_vm3, %v4863_v32, %v4864_v40  ;;  %v4866_v42 = vld [vmem:[#allocation56_spill] sm:$0xff] }
 0x176   :  { %v3648_v15 = vpop.permute.xlu0 %1101  ;;  %v650_v3 = vmul.f32 %v3153_v12, %v629_v44  ;;  %v651_v7 = vmul.f32 %v3156_v11, %v605_v39  ;;  %v3661_v61 = vrot.slane %v89_v35, %v3015_v17  ;;  %v3664_v23 = vrot.slane %v89_v35, %v3017_v4  ;;  %v4867_v4 = vld [vmem:[#allocation52_spill] sm:$0xff]  ;;  %v4869_v39 = vld [vmem:[#allocation53_spill] sm:$0xff] }
 0x177   :  { %v544_v19 = vmul.f32 %v4857_v28, %v508_v43  ;;  %v545_v26 = vmul.f32 %v4857_v28, %v509_v51  ;;  %v542_v41 = vmul.f32 %v4860_v18, %v506_v22  ;;  %v543_v48 = vmul.f32 %v4860_v18, %v507_v54  ;;  %v4868_v22 = vld [vmem:[#allocation35_spill] sm:$0xff]  ;;  %v4870_v44 = vld [vmem:[#allocation57_spill] sm:$0xff] }
 0x178   :  { %v767_v24 = vmul.f32 %v4865_v16, %v3168_v55  ;;  %v652_v60 = vmul.f32 %v3153_v12, %v630_v52  ;;  %v653_v17 = vmul.f32 %v3156_v11, %v606_v20  ;;  %v634_v49 = vsel %vm602_vm3, %v4867_v4, %v4866_v42  ;;  %v4871_v52 = vld [vmem:[#allocation34_spill] sm:$0xff] }
 0x179   :  { %v3670_v46 = vpop.permute.xlu1 %1115  ;;  %v768_v28 = vmul.f32 %v4865_v16, %v3172_v50  ;;  %v3685_v18 = vmul.f32 %v4865_v16, %v3186_v29  ;;  %v3689_v55 = vmul.f32 %v4865_v16, %v3190_v25  ;;  %v610_v51 = vsel %vm602_vm3, %v4866_v42, %v4867_v4  ;;  %v4872_v42 = vld [vmem:[#allocation58_spill] sm:$0xff]  ;;  %v4873_v4 = vld [vmem:[#allocation59_spill] sm:$0xff] }
 0x17a   :  { %v3679_v43 = vpop.permute.xlu0 %1113  ;;  %v686_v54 = vmul.f32 %v4868_v22, %v650_v3  ;;  %v687_v21 = vmul.f32 %v4868_v22, %v651_v7  ;;  %v609_v50 = vsel %vm602_vm3, %v4870_v44, %v4869_v39  ;;  %v633_v29 = vsel %vm602_vm3, %v4869_v39, %v4870_v44 }
 0x17b   :  { %v560_v35 = vadd.f32 %v544_v19, %v3534_v63  ;;  %v561_v25 = vadd.f32 %v545_v26, %v3536_v36  ;;  %v558_v32 = vadd.f32 %v542_v41, %v3561_v53  ;;  %v660_v40 = vmul.f32 %v3153_v12, %v634_v49  ;;  %v4874_v53 = vld [vmem:[#allocation47_spill] sm:$0xff] }
 0x17c   :  { %v688_v3 = vmul.f32 %v4871_v52, %v652_v60  ;;  %v689_v7 = vmul.f32 %v4871_v52, %v653_v17  ;;  %v661_v16 = vmul.f32 %v3156_v11, %v610_v51  ;;  %v826_v39 = vsel %vm825_vm4, %v4873_v4, %v4872_v42  ;;  %v4875_v60 = vld [vmem:[#allocation73_spill] sm:$0xff] }
 0x17d   :  { %v3706_v20 = vpop.permute.xlu1 %1119  ;;  %v559_v36 = vadd.f32 %v543_v48, %v3563_v13  ;;  %v765_v19 = vmul.f32 %v4874_v53, %v3224_v14  ;;  %v658_v26 = vmul.f32 %v3153_v12, %v633_v29  ;;  %v659_v41 = vmul.f32 %v3156_v11, %v609_v50  ;;  %v4877_v14 = vld [vmem:[#allocation83_spill] sm:$0xff]  ;;  %v4878_v12 = vld [vmem:[#allocation60_spill] sm:$0xff]  ;;  %v4879_v29 = vld [vmem:[#allocation61_spill] sm:$0xff] }
 0x17e   :  { %v3714_v63 = vpop.permute.xlu0 %1117  ;;  %v766_v17 = vmul.f32 %v4874_v53, %v4875_v60  ;;  %v702_v49 = vadd.f32 %v686_v54, %v550_v8  ;;  %v703_v51 = vadd.f32 %v687_v21, %v551_v34  ;;  %v858_v44 = vsel %vm825_vm4, %v4872_v42, %v4873_v4  ;;  %v4882_v4 = vld [vmem:[#allocation84_spill] sm:$0xff]  ;;  %v4883_v60 = vld [vmem:[#allocation62_spill] sm:$0xff] }
 0x17f   :  { %v3728_v56 = vmul.f32 %v4874_v53, %v4876_v30  ;;  %v696_v13 = vmul.f32 %v4871_v52, %v660_v40  ;;  %v877_v48 = vmul.f32 %v4877_v14, %v826_v39  ;;  %v827_v11 = vsel %vm825_vm4, %v4879_v29, %v4878_v12 }
 0x180   :  { %v704_v8 = vadd.f32 %v688_v3, %v552_v57  ;;  %v705_v34 = vadd.f32 %v689_v7, %v553_v47  ;;  %v697_v54 = vmul.f32 %v4871_v52, %v661_v16  ;;  %v859_v21 = vsel %vm825_vm4, %v4878_v12, %v4879_v29  ;;  %v4885_v47 = vld [vmem:[#allocation76_spill] sm:$0xff] }
 0x181   :  { %v3735_v50 = vpop.permute.xlu1 %1214  ;;  %v694_v40 = vmul.f32 %v4868_v22, %v658_v26  ;;  %v695_v42 = vmul.f32 %v4868_v22, %v659_v41  ;;  %v878_v39 = vmul.f32 %v4882_v4, %v858_v44  ;;  %v830_v57 = vsel %vm825_vm4, %v4884_v27, %v4883_v60  ;;  %v4886_v26 = vld [vmem:[#allocation37_spill] sm:$0xff] }
 0x182   :  { %4880 = vst [vmem:[#allocation18_spill] sm:$0xff] %v3735_v50  ;;  %v3741_v30 = vpop.permute.xlu0 %1209  ;;  %v3751_v52 = vmul.f32 %v4874_v53, %v4885_v47  ;;  %v879_v3 = vmul.f32 %v4877_v14, %v827_v11  ;;  %v3754_v7 = vadd.f32 %v765_v19, %v702_v49  ;;  %v3756_v16 = vadd.f32 %v766_v17, %v703_v51  ;;  %v4895_v47 = vld [vmem:[#allocation79_spill] sm:$0xff] }
 0x183   :  { %4881 = vst [vmem:[#allocation22_spill] sm:$0xff] %v3741_v30  ;;  %v712_v12 = vadd.f32 %v696_v13, %v560_v35  ;;  %v913_v29 = vmul.f32 %v4886_v26, %v877_v48  ;;  %v880_v22 = vmul.f32 %v4882_v4, %v859_v21  ;;  %v862_v41 = vsel %vm825_vm4, %v4883_v60, %v4884_v27  ;;  %v4889_v13 = vld [vmem:[#allocation66_spill] sm:$0xff]  ;;  %v4890_v27 = vld [vmem:[#allocation67_spill] sm:$0xff] }
 0x184   :  { %v3765_v50 = vadd.f32 %v697_v54, %v561_v25  ;;  %v885_v53 = vmul.f32 %v4877_v14, %v830_v57  ;;  %v3768_v11 = vadd.f32 %v767_v24, %v704_v8  ;;  %v3770_v19 = vadd.f32 %v768_v28, %v705_v34  ;;  %v4891_v25 = vld [vmem:[#allocation36_spill] sm:$0xff]  ;;  %v4892_v28 = vld [vmem:[#allocation77_spill] sm:$0xff]  ;;  %v4893_v8 = vld [vmem:[#allocation78_spill] sm:$0xff] }
 0x185   :  { %v3763_v44 = vpop.permute.xlu1 %955  ;;  %v3774_v35 = vadd.f32 %v694_v40, %v558_v32  ;;  %v3776_v49 = vadd.f32 %v695_v42, %v559_v36  ;;  %v914_v51 = vmul.f32 %v4886_v26, %v878_v39  ;;  %v831_v48 = vsel %vm825_vm4, %v4890_v27, %v4889_v13 }
 0x186   :  { %4887 = vst [vmem:[#allocation68_spill] sm:$0xff] %v3768_v11  ;;  %4888 = vst [vmem:[#allocation69_spill] sm:$0xff] %v3770_v19  ;;  %v3772_v17 = vpop.permute.xlu0 %953  ;;  %v915_v54 = vmul.f32 %v4891_v25, %v879_v3  ;;  %v886_v21 = vmul.f32 %v4882_v4, %v862_v41  ;;  %v863_v24 = vsel %vm825_vm4, %v4889_v13, %v4890_v27  ;;  %v4896_v3 = vld [vmem:[#allocation80_spill] sm:$0xff]  ;;  %v4898_v13 = vld [vmem:[#allocation81_spill] sm:$0xff] }
 0x187   :  { %v978_v32 = vsel %vm977_vm5, %v4893_v8, %v4892_v28  ;;  %v929_v36 = vadd.f32 %v913_v29, %v3589_v0  ;;  %v916_v34 = vmul.f32 %v4891_v25, %v880_v22  ;;  %v1010_v40 = vsel %vm977_vm5, %v4892_v28, %v4893_v8  ;;  %v4899_v27 = vld [vmem:[#allocation82_spill] sm:$0xff]  ;;  %v4902_v19 = vld [vmem:[#allocation88_spill] sm:$0xff] }
 0x188   :  { %v3796_v42 = vadd.f32 %v3685_v18, %v712_v12  ;;  %v921_v60 = vmul.f32 %v4886_v26, %v885_v53  ;;  %v887_v57 = vmul.f32 %v4877_v14, %v831_v48  ;;  %v979_v41 = vsel %vm977_vm5, %v4896_v3, %v4895_v47  ;;  %v4897_v18 = vld [vmem:[#allocation85_spill] sm:$0xff] }
 0x189   :  { %v3798_v39 = vpop.permute.xlu1 %959  ;;  %v1011_v0 = vsel %vm977_vm5, %v4895_v47, %v4896_v3  ;;  %v888_v22 = vmul.f32 %v4882_v4, %v863_v24  ;;  %v1029_v12 = vmul.f32 %v4897_v18, %v978_v32  ;;  %v982_v53 = vsel %vm977_vm5, %v4899_v27, %v4898_v13  ;;  %v4900_v3 = vld [vmem:[#allocation86_spill] sm:$0xff] }
 0x18a   :  { %4894 = vst [vmem:[#allocation2_spill] sm:$0xff] %v3796_v42  ;;  %v3808_v29 = vpop.permute.xlu0 %957  ;;  %v1014_v48 = vsel %vm977_vm5, %v4898_v13, %v4899_v27  ;;  %v930_v28 = vadd.f32 %v914_v51, %v3586_v37  ;;  %v931_v8 = vadd.f32 %v915_v54, %v3614_v59  ;;  %v922_v47 = vmul.f32 %v4886_v26, %v886_v21  ;;  %v4901_v42 = vld [vmem:[#allocation87_spill] sm:$0xff]  ;;  %v4904_v27 = vld [vmem:[#allocation49_spill] sm:$0xff] }
 0x18b   :  { %v1030_v30 = vmul.f32 %v4900_v3, %v1010_v40  ;;  %v1031_v24 = vmul.f32 %v4897_v18, %v979_v41  ;;  %v1032_v32 = vmul.f32 %v4900_v3, %v1011_v0  ;;  %v983_v11 = vsel %vm977_vm5, %v4902_v19, %v4901_v42 }
 0x18c   :  { %v1130_v13 = vsel %vm1129_vm6, %v3609_v31, %v3599_v62  ;;  %v932_v59 = vadd.f32 %v916_v34, %v3617_v10  ;;  %v1037_v26 = vmul.f32 %v4897_v18, %v982_v53  ;;  %v1038_v51 = vmul.f32 %v4900_v3, %v1014_v48  ;;  %v4905_v48 = vld [vmem:[#allocation48_spill] sm:$0xff] }
 0x18d   :  { %v3830_v37 = vpop.permute.xlu1 %971  ;;  %v1162_v54 = vsel %vm1129_vm6, %v3599_v62, %v3609_v31  ;;  %v937_v40 = vadd.f32 %v921_v60, %v3622_v58  ;;  %v923_v41 = vmul.f32 %v4891_v25, %v887_v57  ;;  %v924_v0 = vmul.f32 %v4891_v25, %v888_v22 }
 0x18e   :  { %4903 = vst [vmem:[#allocation19_spill] sm:$0xff] %v3830_v37  ;;  %v3838_v21 = vpop.permute.xlu0 %969  ;;  %v1065_v37 = vmul.f32 %v4904_v27, %v1029_v12  ;;  %v1066_v10 = vmul.f32 %v4904_v27, %v1030_v30  ;;  %v1015_v34 = vsel %vm977_vm5, %v4901_v42, %v4902_v19  ;;  %v1039_v53 = vmul.f32 %v4897_v18, %v983_v11 }
 0x18f   :  { %v1181_v62 = vmul.f32 %v3574_v6, %v1130_v13  ;;  %v938_v31 = vadd.f32 %v922_v47, %v3625_v2  ;;  %v1067_v58 = vmul.f32 %v4905_v48, %v1031_v24  ;;  %v1068_v60 = vmul.f32 %v4905_v48, %v1032_v32 }
 0x190   :  { %v1182_v25 = vmul.f32 %v3577_v38, %v1162_v54  ;;  %v1073_v30 = vmul.f32 %v4904_v27, %v1037_v26  ;;  %v1074_v22 = vmul.f32 %v4904_v27, %v1038_v51  ;;  %v1131_v11 = vsel %vm1129_vm6, %v3648_v15, %v3635_v5  ;;  %v4906_v26 = vld [vmem:[#allocation74_spill] sm:$0xff] }
 0x191   :  { %v3854_v57 = vpop.permute.xlu1 %975  ;;  %v1163_v2 = vsel %vm1129_vm6, %v3635_v5, %v3648_v15  ;;  %v939_v42 = vadd.f32 %v923_v41, %v3643_v33  ;;  %v3868_v12 = vadd.f32 %v924_v0, %v3646_v45  ;;  %v1081_v47 = vadd.f32 %v1065_v37, %v929_v36 }
 0x192   :  { %v3864_v19 = vpop.permute.xlu0 %973  ;;  %v1040_v24 = vmul.f32 %v4900_v3, %v1015_v34  ;;  %v1082_v32 = vadd.f32 %v1066_v10, %v930_v28  ;;  %v1075_v13 = vmul.f32 %v4905_v48, %v1039_v53  ;;  %v1217_v51 = vmul.f32 %v4906_v26, %v1181_v62 }
 0x193   :  { %v1134_v54 = vsel %vm1129_vm6, %v3679_v43, %v3670_v46  ;;  %v1083_v5 = vadd.f32 %v1067_v58, %v931_v8  ;;  %v1218_v15 = vmul.f32 %v4906_v26, %v1182_v25  ;;  %v1183_v33 = vmul.f32 %v3574_v6, %v1131_v11  ;;  %v4908_v11 = vld [vmem:[#allocation15_spill] sm:$0xff] }
 0x194   :  { %v1184_v45 = vmul.f32 %v3577_v38, %v1163_v2  ;;  %v1084_v36 = vadd.f32 %v1068_v60, %v932_v59  ;;  %v1089_v37 = vadd.f32 %v1073_v30, %v937_v40  ;;  %v1090_v0 = vadd.f32 %v1074_v22, %v938_v31  ;;  %v4907_v31 = vld [vmem:[#allocation72_spill] sm:$0xff] }
 0x195   :  { %v1252_v41 = vpop.permute.xlu1 %1251  ;;  %v1166_v28 = vsel %vm1129_vm6, %v3670_v46, %v3679_v43  ;;  %v1076_v10 = vmul.f32 %v4905_v48, %v1040_v24  ;;  %v1189_v34 = vmul.f32 %v3574_v6, %v1134_v54  ;;  %v1091_v62 = vadd.f32 %v1075_v13, %v939_v42  ;;  %v4909_v24 = vld [vmem:[#allocation13_spill] sm:$0xff] }
 0x196   :  { %v1250_v27 = vpop.permute.xlu0 %1249  ;;  %v1233_v58 = vadd.f32 %v1217_v51, %v1081_v47  ;;  %v1234_v40 = vadd.f32 %v1218_v15, %v1082_v32  ;;  %v1219_v60 = vmul.f32 %v4907_v31, %v1183_v33  ;;  %v1220_v46 = vmul.f32 %v4907_v31, %v1184_v45  ;;  %v4910_v32 = vld [vmem:[#allocation16_spill] sm:$0xff] }
 0x197   :  { %v1282_v8 = vsel %vm1281_vm7, %v1250_v27, %v1252_v41  ;;  %v1314_v53 = vsel %vm1281_vm7, %v1252_v41, %v1250_v27  ;;  %v1190_v43 = vmul.f32 %v3577_v38, %v1166_v28  ;;  %v1135_v30 = vsel %vm1129_vm6, %v3714_v63, %v3706_v20 }
 0x198   :  { %v1333_v25 = vmul.f32 %v3661_v61, %v1282_v8  ;;  %v1334_v59 = vmul.f32 %v3664_v23, %v1314_v53  ;;  %v1167_v22 = vsel %vm1129_vm6, %v3706_v20, %v3714_v63  ;;  %v828_v13 = vsel %vm825_vm4, %v4910_v32, %v4909_v24 }
 0x199   :  { %v1256_v48 = vpop.permute.xlu1 %1255  ;;  %v1225_v51 = vmul.f32 %v4906_v26, %v1189_v34  ;;  %v1235_v41 = vadd.f32 %v1219_v60, %v1083_v5  ;;  %v1236_v28 = vadd.f32 %v1220_v46, %v1084_v36  ;;  %v1191_v27 = vmul.f32 %v3574_v6, %v1135_v30 }
 0x19a   :  { %v1369_v2 = vmul.f32 %v4908_v11, %v1333_v25  ;;  %v1370_v42 = vmul.f32 %v4908_v11, %v1334_v59  ;;  %v1254_v47 = vpop.permute.xlu0 %1253  ;;  %v1192_v8 = vmul.f32 %v3577_v38, %v1167_v22  ;;  %v1226_v34 = vmul.f32 %v4906_v26, %v1190_v43  ;;  %v4911_v25 = vld [vmem:[#allocation12_spill] sm:$0xff] }
 0x19b   :  { %v1283_v54 = vsel %vm1281_vm7, %v1254_v47, %v1256_v48  ;;  %v1315_v15 = vsel %vm1281_vm7, %v1256_v48, %v1254_v47  ;;  %v860_v5 = vsel %vm825_vm4, %v4909_v24, %v4910_v32  ;;  %v1241_v36 = vadd.f32 %v1225_v51, %v1089_v37 }
 0x19c   :  { %v3905_v33 = vadd.f32 %v1369_v2, %v1233_v58  ;;  %v3907_v45 = vadd.f32 %v1370_v42, %v1234_v40  ;;  %v1335_v20 = vmul.f32 %v3661_v61, %v1283_v54  ;;  %v1336_v63 = vmul.f32 %v3664_v23, %v1315_v15 }
 0x19d   :  { %v1268_v53 = vpop.permute.xlu1 %1267  ;;  %v1227_v2 = vmul.f32 %v4907_v31, %v1191_v27  ;;  %v1228_v42 = vmul.f32 %v4907_v31, %v1192_v8  ;;  %v1242_v32 = vadd.f32 %v1226_v34, %v1090_v0  ;;  %v881_v31 = vmul.f32 %v4877_v14, %v828_v13 }
 0x19e   :  { %v1371_v59 = vmul.f32 %v4911_v25, %v1335_v20  ;;  %v1372_v58 = vmul.f32 %v4911_v25, %v1336_v63  ;;  %v1266_v48 = vpop.permute.xlu0 %1265  ;;  %v1401_v40 = vadd.f32 %v3907_v45, %v3905_v33  ;;  %v1429_v37 = vmul.f32 %v3905_v33, %v3905_v33 }
 0x19f   :  { %v1286_v60 = vsel %vm1281_vm7, %v1266_v48, %v1268_v53  ;;  %v1318_v46 = vsel %vm1281_vm7, %v1268_v53, %v1266_v48  ;;  %v1430_v24 = vmul.f32 %v3907_v45, %v3907_v45  ;;  %v1092_v63 = vadd.f32 %v1076_v10, %v3868_v12 }
 0x1a0   :  { %v3923_v30 = vadd.f32 %v1371_v59, %v1235_v41  ;;  %v3925_v26 = vadd.f32 %v1372_v58, %v1236_v28  ;;  %v1341_v43 = vmul.f32 %v3661_v61, %v1286_v60  ;;  %v1342_v22 = vmul.f32 %v3664_v23, %v1318_v46  ;;  %1402 = vadd.xlane.f32.xlu0 %v1401_v40  ;;  %v4912_v60 = vld [vmem:[#allocation71_spill] sm:$0xff] }
 0x1a1   :  { %v1272_v47 = vpop.permute.xlu1 %1271  ;;  %v882_v53 = vmul.f32 %v4882_v4, %v860_v5  ;;  %v1243_v34 = vadd.f32 %v1227_v2, %v1091_v62  ;;  %v1244_v59 = vadd.f32 %v1228_v42, %v1092_v63  ;;  %v1445_v10 = vadd.f32 %v1430_v24, %v1429_v37  ;;  %v4913_v5 = vld [vmem:[#allocation65_spill] sm:$0xff] }
 0x1a2   :  { %v1377_v51 = vmul.f32 %v4908_v11, %v1341_v43  ;;  %v1378_v54 = vmul.f32 %v4908_v11, %v1342_v22  ;;  %v1270_v15 = vpop.permute.xlu0 %1269  ;;  %v1404_v20 = vadd.f32 %v3925_v26, %v3923_v30  ;;  %v917_v46 = vmul.f32 %v4912_v60, %v881_v31 }
 0x1a3   :  { %v1287_v41 = vsel %vm1281_vm7, %v1270_v15, %v1272_v47  ;;  %v1319_v28 = vsel %vm1281_vm7, %v1272_v47, %v1270_v15  ;;  %v829_v62 = vsel %vm825_vm4, %v3514_v9, %v4913_v5  ;;  %v3966_v43 = vadd.f32 %v3689_v55, %v3765_v50  ;;  %v4914_v55 = vld [vmem:[#allocation11_spill] sm:$0xff] }
 0x1a4   :  { %v3943_v27 = vadd.f32 %v1377_v51, %v1241_v36  ;;  %v3945_v8 = vadd.f32 %v1378_v54, %v1242_v32  ;;  %v1343_v0 = vmul.f32 %v3661_v61, %v1287_v41  ;;  %v1344_v11 = vmul.f32 %v3664_v23, %v1319_v28  ;;  %1405 = vadd.xlane.f32.xlu1 %v1404_v20  ;;  %v4915_v41 = vld [vmem:[#allocation14_spill] sm:$0xff]  ;;  %v4916_v28 = vld [vmem:[#allocation17_spill] sm:$0xff] }
 0x1a5   :  { %v3950_v12 = vpop.permute.xlu1 %1366  ;;  %v861_v22 = vsel %vm825_vm4, %v4913_v5, %v3514_v9  ;;  %v918_v47 = vmul.f32 %v4912_v60, %v882_v53  ;;  %v789_v37 = vadd.f32 %v3728_v56, %v3774_v35  ;;  %v832_v50 = vsel %vm825_vm4, %v4914_v55, %v3532_v1 }
 0x1a6   :  { %v1379_v13 = vmul.f32 %v4911_v25, %v1343_v0  ;;  %v1380_v58 = vmul.f32 %v4911_v25, %v1344_v11  ;;  %v3954_v48 = vpop.permute.xlu0 %1361  ;;  %v1413_v40 = vadd.f32 %v3945_v8, %v3943_v27  ;;  %v1437_v36 = vmul.f32 %v3943_v27, %v3943_v27 }
 0x1a7   :  { %v1438_v25 = vmul.f32 %v3945_v8, %v3945_v8  ;;  %v864_v24 = vsel %vm825_vm4, %v3532_v1, %v4914_v55  ;;  %v1431_v15 = vmul.f32 %v3923_v30, %v3923_v30  ;;  %v1432_v56 = vmul.f32 %v3925_v26, %v3925_v26 }
 0x1a8   :  { %v3973_v2 = vadd.f32 %v1379_v13, %v1243_v34  ;;  %v3975_v42 = vadd.f32 %v1380_v58, %v1244_v59  ;;  %1446 = vadd.xlane.f32.xlu1 %v1445_v10  ;;  %1414 = vadd.xlane.f32.xlu0 %v1413_v40  ;;  %v933_v35 = vadd.f32 %v917_v46, %v3754_v7 }
 0x1a9   :  { %v1108_v9 = vpop.permute.xlu1 %1107  ;;  %v1457_v51 = vadd.f32 %v1438_v25, %v1437_v36  ;;  %v883_v20 = vmul.f32 %v4877_v14, %v829_v62  ;;  %v884_v63 = vmul.f32 %v4882_v4, %v861_v22  ;;  %v790_v1 = vadd.f32 %v3751_v52, %v3776_v49  ;;  %v4918_v25 = vld [vmem:[#allocation70_spill] sm:$0xff] }
 0x1aa   :  { %v1106_v32 = vpop.permute.xlu0 %1105  ;;  %v1416_v54 = vadd.f32 %v3975_v42, %v3973_v2  ;;  %v889_v31 = vmul.f32 %v4877_v14, %v832_v50  ;;  %v833_v0 = vsel %vm825_vm4, %v4916_v28, %v4915_v41  ;;  %v980_v11 = vsel %vm977_vm5, %v3772_v17, %v3763_v44 }
 0x1ab   :  { %v890_v7 = vmul.f32 %v4882_v4, %v864_v24  ;;  %v1012_v53 = vsel %vm977_vm5, %v3763_v44, %v3772_v17  ;;  %v981_v52 = vsel %vm977_vm5, %v3808_v29, %v3798_v39  ;;  %v1013_v49 = vsel %vm977_vm5, %v3798_v39, %v3808_v29  ;;  %v4917_v39 = vld [vmem:[#allocation19_spill] sm:$0xff] }
 0x1ac   :  { %1458 = vadd.xlane.f32.xlu1 %v1457_v51  ;;  %1417 = vadd.xlane.f32.xlu0 %v1416_v54  ;;  %v934_v59 = vadd.f32 %v918_v47, %v3756_v16  ;;  %v1448_v13 = vadd.f32 %v1432_v56, %v1431_v15  ;;  %v1439_v58 = vmul.f32 %v3973_v2, %v3973_v2 }
 0x1ad   :  { %v1112_v34 = vpop.permute.xlu1 %1111  ;;  %v1440_v40 = vmul.f32 %v3975_v42, %v3975_v42  ;;  %v865_v44 = vsel %vm825_vm4, %v4915_v41, %v4916_v28  ;;  %v891_v17 = vmul.f32 %v4877_v14, %v833_v0  ;;  %v1033_v36 = vmul.f32 %v4897_v18, %v980_v11  ;;  %v4919_v41 = vld [vmem:[#allocation64_spill] sm:$0xff] }
 0x1ae   :  { %v1110_v10 = vpop.permute.xlu0 %1109  ;;  %v984_v16 = vsel %vm977_vm5, %v3838_v21, %v4917_v39  ;;  %v1034_v29 = vmul.f32 %v4900_v3, %v1012_v53  ;;  %v1035_v46 = vmul.f32 %v4897_v18, %v981_v52  ;;  %v1036_v5 = vmul.f32 %v4900_v3, %v1013_v49  ;;  %v4922_v52 = vld [vmem:[#allocation69_spill] sm:$0xff] }
 0x1af   :  { %v1016_v62 = vsel %vm977_vm5, %v4917_v39, %v3838_v21  ;;  %v919_v22 = vmul.f32 %v4918_v25, %v883_v20  ;;  %v920_v14 = vmul.f32 %v4918_v25, %v884_v63  ;;  %v925_v47 = vmul.f32 %v4912_v60, %v889_v31 }
 0x1b0   :  { %1449 = vadd.xlane.f32.xlu0 %v1448_v13  ;;  %v926_v55 = vmul.f32 %v4912_v60, %v890_v7  ;;  %v892_v24 = vmul.f32 %v4882_v4, %v865_v44  ;;  %v1041_v51 = vmul.f32 %v4897_v18, %v984_v16  ;;  %v1132_v54 = vsel %vm1129_vm6, %v1106_v32, %v1108_v9  ;;  %v4920_v60 = vld [vmem:[#allocation10_spill] sm:$0xff]  ;;  %v4921_v7 = vld [vmem:[#allocation68_spill] sm:$0xff] }
 0x1b1   :  { %v1124_v50 = vpop.permute.xlu1 %1123  ;;  %v1460_v56 = vadd.f32 %v1440_v40, %v1439_v58  ;;  %v927_v21 = vmul.f32 %v4918_v25, %v891_v17  ;;  %v1069_v28 = vmul.f32 %v4919_v41, %v1033_v36  ;;  %v1042_v20 = vmul.f32 %v4900_v3, %v1016_v62  ;;  %v4923_v16 = vld [vmem:[#allocation2_spill] sm:$0xff] }
 0x1b2   :  { %v1122_v15 = vpop.permute.xlu0 %1121  ;;  %v1164_v63 = vsel %vm1129_vm6, %v1108_v9, %v1106_v32  ;;  %v1070_v31 = vmul.f32 %v4919_v41, %v1034_v29  ;;  %v1071_v0 = vmul.f32 %v4920_v60, %v1035_v46  ;;  %v1072_v4 = vmul.f32 %v4920_v60, %v1036_v5 }
 0x1b3   :  { %v1133_v11 = vsel %vm1129_vm6, %v1110_v10, %v1112_v34  ;;  %v935_v53 = vadd.f32 %v919_v22, %v4921_v7  ;;  %v936_v49 = vadd.f32 %v920_v14, %v4922_v52  ;;  %v941_v13 = vadd.f32 %v925_v47, %v789_v37 }
 0x1b4   :  { %1461 = vadd.xlane.f32.xlu0 %v1460_v56  ;;  %v1185_v58 = vmul.f32 %v3574_v6, %v1132_v54  ;;  %v942_v44 = vadd.f32 %v926_v55, %v790_v1  ;;  %v1077_v9 = vmul.f32 %v4919_v41, %v1041_v51  ;;  %v1186_v32 = vmul.f32 %v3577_v38, %v1164_v63 }
 0x1b5   :  { %v1128_v40 = vpop.permute.xlu1 %1127  ;;  %v1165_v17 = vsel %vm1129_vm6, %v1112_v34, %v1110_v10  ;;  %v4055_v39 = vmul.f32 %v4918_v25, %v892_v24  ;;  %v4058_v29 = vadd.f32 %v927_v21, %v4923_v16  ;;  %v1078_v46 = vmul.f32 %v4919_v41, %v1042_v20  ;;  %v4924_v10 = vld [vmem:[#allocation22_spill] sm:$0xff] }
 0x1b6   :  { %v1126_v36 = vpop.permute.xlu0 %1125  ;;  %v1187_v37 = vmul.f32 %v3574_v6, %v1133_v11  ;;  %v1085_v5 = vadd.f32 %v1069_v28, %v933_v35  ;;  %v1086_v62 = vadd.f32 %v1070_v31, %v934_v59  ;;  %v1087_v1 = vadd.f32 %v1071_v0, %v935_v53  ;;  %v4925_v21 = vld [vmem:[#allocation18_spill] sm:$0xff] }
 0x1b7   :  { %v1088_v22 = vadd.f32 %v1072_v4, %v936_v49  ;;  %v985_v14 = vsel %vm977_vm5, %v3864_v19, %v3854_v57  ;;  %v1017_v34 = vsel %vm977_vm5, %v3854_v57, %v3864_v19  ;;  %v1221_v25 = vmul.f32 %v4924_v10, %v1185_v58 }
 0x1b8   :  { %v1188_v47 = vmul.f32 %v3577_v38, %v1165_v17  ;;  %v1093_v24 = vadd.f32 %v1077_v9, %v941_v13  ;;  %v1222_v51 = vmul.f32 %v4924_v10, %v1186_v32  ;;  %v1136_v35 = vsel %vm1129_vm6, %v1122_v15, %v1124_v50 }
 0x1b9   :  { %v1260_v55 = vpop.permute.xlu1 %1259  ;;  %v1168_v59 = vsel %vm1129_vm6, %v1124_v50, %v1122_v15  ;;  %v1094_v56 = vadd.f32 %v1078_v46, %v942_v44  ;;  %v1223_v41 = vmul.f32 %v4925_v21, %v1187_v37  ;;  %v1043_v19 = vmul.f32 %v4897_v18, %v985_v14 }
 0x1ba   :  { %v1258_v54 = vpop.permute.xlu0 %1257  ;;  %v1044_v20 = vmul.f32 %v4900_v3, %v1017_v34  ;;  %v1237_v0 = vadd.f32 %v1221_v25, %v1085_v5  ;;  %v1224_v4 = vmul.f32 %v4925_v21, %v1188_v47  ;;  %v1193_v50 = vmul.f32 %v3574_v6, %v1136_v35 }
 0x1bb   :  { %v1284_v28 = vsel %vm1281_vm7, %v1258_v54, %v1260_v55  ;;  %v1316_v57 = vsel %vm1281_vm7, %v1260_v55, %v1258_v54  ;;  %v1194_v15 = vmul.f32 %v3577_v38, %v1168_v59  ;;  %v1238_v7 = vadd.f32 %v1222_v51, %v1086_v62 }
 0x1bc   :  { %v1337_v63 = vmul.f32 %v3661_v61, %v1284_v28  ;;  %v1338_v31 = vmul.f32 %v3664_v23, %v1316_v57  ;;  %v1137_v53 = vsel %vm1129_vm6, %v1126_v36, %v1128_v40  ;;  %v1239_v49 = vadd.f32 %v1223_v41, %v1087_v1 }
 0x1bd   :  { %v1264_v11 = vpop.permute.xlu1 %1263  ;;  %v1169_v13 = vsel %vm1129_vm6, %v1128_v40, %v1126_v36  ;;  %v1240_v46 = vadd.f32 %v1224_v4, %v1088_v22  ;;  %v1229_v37 = vmul.f32 %v4924_v10, %v1193_v50  ;;  %v1230_v5 = vmul.f32 %v4924_v10, %v1194_v15 }
 0x1be   :  { %v1373_v52 = vmul.f32 %v3954_v48, %v1337_v63  ;;  %v1374_v18 = vmul.f32 %v3954_v48, %v1338_v31  ;;  %v1262_v3 = vpop.permute.xlu0 %1261  ;;  %v1195_v62 = vmul.f32 %v3574_v6, %v1137_v53  ;;  %v1196_v36 = vmul.f32 %v3577_v38, %v1169_v13 }
 0x1bf   :  { %v1285_v58 = vsel %vm1281_vm7, %v1262_v3, %v1264_v11  ;;  %v1317_v44 = vsel %vm1281_vm7, %v1264_v11, %v1262_v3  ;;  %v1079_v47 = vmul.f32 %v4920_v60, %v1043_v19  ;;  %v1080_v22 = vmul.f32 %v4920_v60, %v1044_v20 }
 0x1c0   :  { %v4089_v9 = vadd.f32 %v1373_v52, %v1237_v0  ;;  %v4091_v32 = vadd.f32 %v1374_v18, %v1238_v7  ;;  %v1339_v17 = vmul.f32 %v3661_v61, %v1285_v58  ;;  %v1340_v16 = vmul.f32 %v3664_v23, %v1317_v44 }
 0x1c1   :  { %v1276_v40 = vpop.permute.xlu1 %1275  ;;  %v944_v59 = vadd.f32 %v4055_v39, %v3966_v43  ;;  %v1245_v54 = vadd.f32 %v1229_v37, %v1093_v24  ;;  %v1246_v41 = vadd.f32 %v1230_v5, %v1094_v56  ;;  %v1231_v60 = vmul.f32 %v4925_v21, %v1195_v62 }
 0x1c2   :  { %v1375_v1 = vmul.f32 %v3950_v12, %v1339_v17  ;;  %v1376_v14 = vmul.f32 %v3950_v12, %v1340_v16  ;;  %v1274_v34 = vpop.permute.xlu0 %1273  ;;  %v1407_v25 = vadd.f32 %v4091_v32, %v4089_v9  ;;  %v1232_v57 = vmul.f32 %v4925_v21, %v1196_v36 }
 0x1c3   :  { %v1288_v55 = vsel %vm1281_vm7, %v1274_v34, %v1276_v40  ;;  %v1320_v10 = vsel %vm1281_vm7, %v1276_v40, %v1274_v34  ;;  %v1095_v0 = vadd.f32 %v1079_v47, %v4058_v29  ;;  %v1096_v4 = vadd.f32 %v1080_v22, %v944_v59 }
 0x1c4   :  { %v4107_v6 = vadd.f32 %v1375_v1, %v1239_v49  ;;  %v4109_v51 = vadd.f32 %v1376_v14, %v1240_v46  ;;  %v1345_v38 = vmul.f32 %v3661_v61, %v1288_v55  ;;  %v1346_v35 = vmul.f32 %v3664_v23, %v1320_v10  ;;  %1408 = vadd.xlane.f32.xlu1 %v1407_v25 }
 0x1c5   :  { %v1280_v28 = vpop.permute.xlu1 %1279  ;;  %v1433_v15 = vmul.f32 %v4089_v9, %v4089_v9  ;;  %v1434_v29 = vmul.f32 %v4091_v32, %v4091_v32  ;;  %v1248_v11 = vadd.f32 %v1232_v57, %v1096_v4 }
 0x1c6   :  { %v1381_v19 = vmul.f32 %v3954_v48, %v1345_v38  ;;  %v1382_v20 = vmul.f32 %v3954_v48, %v1346_v35  ;;  %v1278_v63 = vpop.permute.xlu0 %1277  ;;  %v1410_v31 = vadd.f32 %v4109_v51, %v4107_v6  ;;  %v1247_v48 = vadd.f32 %v1231_v60, %v1095_v0  ;;  %v1493_v0 = vld [vmem:[%s4621_s3] sm:$0xff] }
 0x1c7   :  { %v1289_v43 = vsel %vm1281_vm7, %v1278_v63, %v1280_v28  ;;  %v1321_v39 = vsel %vm1281_vm7, %v1280_v28, %v1278_v63  ;;  %v1435_v3 = vmul.f32 %v4107_v6, %v4107_v6  ;;  %v1436_v58 = vmul.f32 %v4109_v51, %v4109_v51 }
 0x1c8   :  { %v4124_v24 = vadd.f32 %v1381_v19, %v1245_v54  ;;  %v4126_v56 = vadd.f32 %v1382_v20, %v1246_v41  ;;  %v1347_v21 = vmul.f32 %v3661_v61, %v1289_v43  ;;  %v1348_v50 = vmul.f32 %v3664_v23, %v1321_v39  ;;  %1411 = vadd.xlane.f32.xlu0 %v1410_v31  ;;  %v1509_v39 = vld [vmem:[%s4622_s4] sm:$0xff] }
 0x1c9   :  { %v1451_v23 = vadd.f32 %v1434_v29, %v1433_v15  ;;  %v1454_v17 = vadd.f32 %v1436_v58, %v1435_v3 }
 0x1ca   :  { %v1383_v7 = vmul.f32 %v3950_v12, %v1347_v21  ;;  %v1384_v53 = vmul.f32 %v3950_v12, %v1348_v50  ;;  %v1419_v52 = vadd.f32 %v4126_v56, %v4124_v24  ;;  %v1441_v13 = vmul.f32 %v4124_v24, %v4124_v24 }
 0x1cb   :  { %v1442_v12 = vmul.f32 %v4126_v56, %v4126_v56 }
 0x1cc   :  { %v4138_v18 = vadd.f32 %v1383_v7, %v1247_v48  ;;  %v4140_v61 = vadd.f32 %v1384_v53, %v1248_v11  ;;  %1420 = vadd.xlane.f32.xlu1 %v1419_v52  ;;  %v1494_v48 = vld [vmem:[%s4621_s3 + $0x8] sm:$0xff] }
 0x1cd   :  { %v1463_v44 = vadd.f32 %v1442_v12, %v1441_v13  ;;  %v1510_v7 = vld [vmem:[%s4622_s4 + $0x8] sm:$0xff] }
 0x1ce   :  { %v1422_v49 = vadd.f32 %v4140_v61, %v4138_v18  ;;  %v1443_v16 = vmul.f32 %v4138_v18, %v4138_v18  ;;  %v1444_v46 = vmul.f32 %v4140_v61, %v4140_v61 }
 0x1d0   :  { %1452 = vadd.xlane.f32.xlu1 %v1451_v23  ;;  %1423 = vadd.xlane.f32.xlu0 %v1422_v49  ;;  %v1466_v37 = vadd.f32 %v1444_v46, %v1443_v16 }
 0x1d4   :  { %1464 = vadd.xlane.f32.xlu1 %v1463_v44  ;;  %1455 = vadd.xlane.f32.xlu0 %v1454_v17 }
 0x1d8   :  { %1467 = vadd.xlane.f32.xlu0 %v1466_v37 }
 0x22d   :  { %v1403_v5 = vpop.xlane.xlu0 %1402 }
 0x231   :  { %v1406_v62 = vpop.xlane.xlu1 %1405 }
 0x235   :  { %v1447_v40 = vpop.xlane.xlu1 %1446  ;;  %v1415_v36 = vpop.xlane.xlu0 %1414 }
 0x236   :  { %v1425_v1 = vadd.f32 %v1415_v36, %v1403_v5 }
 0x238   :  { %v1473_v14 = vmul.f32 0.001953125, %v1425_v1 }
 0x239   :  { %v1459_v34 = vpop.xlane.xlu1 %1458  ;;  %v1418_v25 = vpop.xlane.xlu0 %1417 }
 0x23a   :  { %v1469_v47 = vadd.f32 %v1459_v34, %v1447_v40  ;;  %v1481_v22 = vmul.f32 %v1473_v14, %v1473_v14  ;;  %v1426_v10 = vadd.f32 %v1418_v25, %v1406_v62 }
 0x23c   :  { %v1477_v55 = vmul.f32 0.001953125, %v1469_v47  ;;  %v1474_v54 = vmul.f32 0.001953125, %v1426_v10 }
 0x23d   :  { %v1450_v38 = vpop.xlane.xlu0 %1449 }
 0x23e   :  { %v1485_v35 = vsub.f32 %v1477_v55, %v1481_v22  ;;  %v1482_v57 = vmul.f32 %v1474_v54, %v1474_v54 }
 0x240   :  { %v1489_v59 = vmax.f32 %v1485_v35, 0.0 }
 0x241   :  { %v1462_v41 = vpop.xlane.xlu0 %1461 }
 0x242   :  { %v1497_v60 = vadd.f32 1e-05, %v1489_v59  ;;  %v1470_v28 = vadd.f32 %v1462_v41, %v1450_v38  ;;  %v1495_v38 = vld [vmem:[%s4621_s3 + $0x10] sm:$0xff]  ;;  %v1496_v41 = vld [vmem:[%s4621_s3 + $0x18] sm:$0xff] }
 0x244   :  { %2332 = vrsqrt.f32 %v1497_v60  ;;  %v1478_v19 = vmul.f32 0.001953125, %v1470_v28 }
 0x246   :  { %v1486_v20 = vsub.f32 %v1478_v19, %v1482_v57 }
 0x248   :  { %v1490_v63 = vmax.f32 %v1486_v20, 0.0  ;;  %v1512_v20 = vld [vmem:[%s4622_s4 + $0x18] sm:$0xff] }
 0x24a   :  { %v1498_v31 = vadd.f32 1e-05, %v1490_v63 }
 0x24c   :  { %2334 = vrsqrt.f32 %v1498_v31 }
 0x24e   :  { %v2333_v4 = vpop.eup %2332 }
 0x24f   :  { %v1505_v43 = vmul.f32 %v2333_v4, %v1493_v0  ;;  %v2365_v0 = vmov 0.0  }
 0x250   :  { %1706 = vmatprep.mubr.f32.mxu0 %v2365_v0  ;;  %1819 = vmatprep.mubr.f32.mxu1 %v2365_v0 }
 0x251   :  { %1523 = vperm.xlu1 %2331, %v1505_v43   ;;  %v1513_v21 = vmul.f32 %v1505_v43, %v1473_v14  ;;  %v1409_v15 = vpop.xlane.xlu1 %1408 }
 0x253   :  { %v1517_v50 = vsub.f32 %v1509_v39, %v1513_v21 }
 0x255   :  { %1559 = vperm.xlu1 %2331, %v1517_v50   ;;  %v1412_v53 = vpop.xlane.xlu0 %1411 }
 0x256   :  { %v2335_v29 = vpop.eup %2334 }
 0x257   :  { %v1506_v11 = vmul.f32 %v2335_v29, %v1494_v48 }
 0x259   :  { %v1421_v52 = vpop.xlane.xlu1 %1420  ;;  %1528 = vperm.xlu0 %2330, %v1506_v11   ;;  %v1514_v23 = vmul.f32 %v1506_v11, %v1474_v54  ;;  %v1511_v54 = vld [vmem:[%s4622_s4 + $0x10] sm:$0xff] }
 0x25a   :  { %v1427_v49 = vadd.f32 %v1421_v52, %v1409_v15 }
 0x25b   :  { %v1518_v3 = vsub.f32 %v1510_v7, %v1514_v23 }
 0x25c   :  { %v1475_v58 = vmul.f32 0.001953125, %v1427_v49 }
 0x25d   :  { %v1453_v13 = vpop.xlane.xlu1 %1452  ;;  %1564 = vperm.xlu1 %2331, %v1518_v3   ;;  %v1424_v12 = vpop.xlane.xlu0 %1423 }
 0x25e   :  { %v1428_v44 = vadd.f32 %v1424_v12, %v1412_v53  ;;  %v1483_v37 = vmul.f32 %v1475_v58, %v1475_v58 }
 0x260   :  { %v1476_v5 = vmul.f32 0.001953125, %v1428_v44 }
 0x261   :  { %v1465_v17 = vpop.xlane.xlu1 %1464  ;;  %v1456_v16 = vpop.xlane.xlu0 %1455 }
 0x262   :  { %v1471_v46 = vadd.f32 %v1465_v17, %v1453_v13  ;;  %v1484_v14 = vmul.f32 %v1476_v5, %v1476_v5 }
 0x264   :  { %v1479_v62 = vmul.f32 0.001953125, %v1471_v46 }
 0x265   :  { %v1468_v40 = vpop.xlane.xlu0 %1467 }
 0x266   :  { %v1487_v36 = vsub.f32 %v1479_v62, %v1483_v37  ;;  %v1472_v1 = vadd.f32 %v1468_v40, %v1456_v16 }
 0x268   :  { %v1491_v34 = vmax.f32 %v1487_v36, 0.0  ;;  %v1480_v25 = vmul.f32 0.001953125, %v1472_v1 }
 0x26a   :  { %v1499_v47 = vadd.f32 1e-05, %v1491_v34  ;;  %v1488_v22 = vsub.f32 %v1480_v25, %v1484_v14 }
 0x26c   :  { %2336 = vrsqrt.f32 %v1499_v47  ;;  %v1492_v55 = vmax.f32 %v1488_v22, 0.0 }
 0x26e   :  { %v1500_v10 = vadd.f32 1e-05, %v1492_v55 }
 0x270   :  { %2338 = vrsqrt.f32 %v1500_v10 }
 0x276   :  { %v2337_v35 = vpop.eup %2336 }
 0x277   :  { %v1507_v59 = vmul.f32 %v2337_v35, %v1495_v38 }
 0x279   :  { %1533 = vperm.xlu0 %2330, %v1507_v59   ;;  %v1515_v60 = vmul.f32 %v1507_v59, %v1475_v58 }
 0x27a   :  { %v2339_v28 = vpop.eup %2338 }
 0x27b   :  { %v1519_v57 = vsub.f32 %v1511_v54, %v1515_v60  ;;  %v1508_v19 = vmul.f32 %v2339_v28, %v1496_v41 }
 0x27d   :  { %1569 = vperm.xlu0 %2330, %v1519_v57   ;;  %1538 = vperm.xlu1 %2331, %v1508_v19   ;;  %v1516_v63 = vmul.f32 %v1508_v19, %v1476_v5 }
 0x27f   :  { %v1520_v31 = vsub.f32 %v1512_v20, %v1516_v63 }
 0x281   :  { %1574 = vperm.xlu1 %2331, %v1520_v31  }
 0x2d0   :  { %v1524_v4 = vpop.permute.xlu1 %1523 }
 0x2d1   :  { %v1541_v39 = vmul.f32 %v1524_v4, %v3905_v33  ;;  %v1549_v21 = vmul.f32 %v1524_v4, %v3943_v27  ;;  %v1542_v48 = vmul.f32 %v1524_v4, %v3907_v45  ;;  %v1550_v15 = vmul.f32 %v1524_v4, %v3945_v8 }
 0x2d4   :  { %v1560_v43 = vpop.permute.xlu1 %1559 }
 0x2d5   :  { %v1578_v29 = vadd.f32 %v1560_v43, %v1542_v48  ;;  %v1586_v11 = vadd.f32 %v1560_v43, %v1550_v15  ;;  %v1577_v7 = vadd.f32 %v1560_v43, %v1541_v39  ;;  %v1585_v53 = vadd.f32 %v1560_v43, %v1549_v21  ;;  %v1611_v21 = vld [vmem:[%s4623_s5 + $0x10] sm:$0xff]  ;;  %v1613_v48 = vld [vmem:[%s4623_s5 + $0x20] sm:$0xff]  ;;  %v1614_v15 = vld [vmem:[%s4623_s5 + $0x28] sm:$0xff] }
 0x2d7   :  { %v1594_v45 = vmax.f32 %v1578_v29, 0.0  ;;  %v1602_v44 = vmax.f32 %v1586_v11, 0.0  ;;  %v1593_v8 = vmax.f32 %v1577_v7, 0.0  ;;  %v1601_v17 = vmax.f32 %v1585_v53, 0.0  ;;  %v1615_v29 = vld [vmem:[%s4623_s5 + $0x30] sm:$0xff]  ;;  %v1616_v11 = vld [vmem:[%s4623_s5 + $0x38] sm:$0xff] }
 0x2d8   :  { %v1529_v50 = vpop.permute.xlu0 %1528 }
 0x2d9   :  { %v1543_v52 = vmul.f32 %v1529_v50, %v3923_v30  ;;  %v1551_v23 = vmul.f32 %v1529_v50, %v3973_v2  ;;  %v1544_v3 = vmul.f32 %v1529_v50, %v3925_v26  ;;  %v1552_v49 = vmul.f32 %v1529_v50, %v3975_v42  ;;  %v1612_v50 = vld [vmem:[%s4623_s5 + $0x18] sm:$0xff] }
 0x2dc   :  { %v1565_v33 = vpop.permute.xlu1 %1564 }
 0x2dd   :  { %v1580_v13 = vadd.f32 %v1565_v33, %v1544_v3  ;;  %v1588_v27 = vadd.f32 %v1565_v33, %v1552_v49  ;;  %v1579_v12 = vadd.f32 %v1565_v33, %v1543_v52  ;;  %v1587_v58 = vadd.f32 %v1565_v33, %v1551_v23 }
 0x2df   :  { %v1596_v16 = vmax.f32 %v1580_v13, 0.0  ;;  %v1604_v46 = vmax.f32 %v1588_v27, 0.0  ;;  %v1595_v37 = vmax.f32 %v1579_v12, 0.0  ;;  %v1603_v5 = vmax.f32 %v1587_v58, 0.0 }
 0x2e1   :  { %v2304_v30 = vpack.c.bf16 %v1596_v16, %v1594_v45  ;;  %v2312_v62 = vpack.c.bf16 %v1604_v46, %v1602_v44  ;;  %v2306_v2 = vpack.c.bf16 %v1595_v37, %v1593_v8  ;;  %v2314_v40 = vpack.c.bf16 %v1603_v5, %v1601_v17 }
 0x2e3   :  { %2305 = vmatprep.subr.bf16.mxu0 %v2304_v30  ;;  %2313 = vmatprep.subr.bf16.mxu1 %v2312_v62 }
 0x2e4   :  { %2307 = vmatpush1.bf16.msra.mxu0 %v2306_v2  ;;  %2315 = vmatpush1.bf16.msra.mxu1 %v2314_v40 }
 0x2f8   :  { %v1534_v26 = vpop.permute.xlu0 %1533 }
 0x2f9   :  { %v1545_v42 = vmul.f32 %v1534_v26, %v4089_v9  ;;  %v1546_v36 = vmul.f32 %v1534_v26, %v4091_v32  ;;  %v1553_v1 = vmul.f32 %v1534_v26, %v4124_v24  ;;  %v1554_v14 = vmul.f32 %v1534_v26, %v4126_v56 }
 0x2fc   :  { %v1539_v34 = vpop.permute.xlu1 %1538  ;;  %v1570_v25 = vpop.permute.xlu0 %1569 }
 0x2fd   :  { %v1581_v47 = vadd.f32 %v1570_v25, %v1545_v42  ;;  %v1582_v22 = vadd.f32 %v1570_v25, %v1546_v36  ;;  %v1589_v55 = vadd.f32 %v1570_v25, %v1553_v1  ;;  %v1590_v10 = vadd.f32 %v1570_v25, %v1554_v14 }
 0x2fe   :  { %v1547_v38 = vmul.f32 %v1539_v34, %v4107_v6  ;;  %v1548_v35 = vmul.f32 %v1539_v34, %v4109_v51  ;;  %v1555_v59 = vmul.f32 %v1539_v34, %v4138_v18  ;;  %v1556_v9 = vmul.f32 %v1539_v34, %v4140_v61  ;;  %v1609_v18 = vld [vmem:[%s4623_s5] sm:$0xff]  ;;  %v1610_v61 = vld [vmem:[%s4623_s5 + $0x8] sm:$0xff] }
 0x2ff   :  { %v1598_v56 = vmax.f32 %v1582_v22, 0.0  ;;  %v1606_v28 = vmax.f32 %v1590_v10, 0.0  ;;  %v1597_v57 = vmax.f32 %v1581_v47, 0.0  ;;  %v1605_v19 = vmax.f32 %v1589_v55, 0.0 }
 0x300   :  { %v1575_v54 = vpop.permute.xlu1 %1574 }
 0x301   :  { %v1583_v32 = vadd.f32 %v1575_v54, %v1547_v38  ;;  %v1584_v41 = vadd.f32 %v1575_v54, %v1548_v35  ;;  %v1591_v24 = vadd.f32 %v1575_v54, %v1555_v59  ;;  %v1592_v60 = vadd.f32 %v1575_v54, %v1556_v9 }
 0x303   :  { %v1600_v20 = vmax.f32 %v1584_v41, 0.0  ;;  %v1608_v63 = vmax.f32 %v1592_v60, 0.0  ;;  %v1599_v31 = vmax.f32 %v1583_v32, 0.0  ;;  %v1607_v4 = vmax.f32 %v1591_v24, 0.0 }
 0x305   :  { %v2308_v6 = vpack.c.bf16 %v1600_v20, %v1598_v56  ;;  %v2316_v43 = vpack.c.bf16 %v1608_v63, %v1606_v28  ;;  %v2310_v51 = vpack.c.bf16 %v1599_v31, %v1597_v57  ;;  %v2318_v39 = vpack.c.bf16 %v1607_v4, %v1605_v19 }
 0x307   :  { %2309 = vmatprep.subr.bf16.mxu0 %v2308_v6  ;;  %2317 = vmatprep.subr.bf16.mxu1 %v2316_v43 }
 0x308   :  { %2311 = vmatpush1.bf16.msra.mxu0 %v2310_v51  ;;  %2319 = vmatpush1.bf16.msra.mxu1 %v2318_v39 }
 0x30b   :  { %2288 = vmatmul.mubr.msk.f32.vlgmr.msra.gmra.mrb[0].mxu0 %vm1617_vm8, %v1609_v18  ;;  %2296 = vmatmul.mubr.msk.f32.vlgmr.msra.gmra.mrb[0].mxu1 %vm1617_vm8, %v1609_v18 }
 0x30c   :  { %1712 = vmatprep.mubr.f32.mxu0 %v2365_v0  ;;  %1825 = vmatprep.mubr.f32.mxu1 %v2365_v0 }
 0x30f   :  { %2289 = vmatmul.mubr.msk.f32.gmra.mrb[2].mxu0 %vm1617_vm8, %v1610_v61  ;;  %2297 = vmatmul.mubr.msk.f32.gmra.mrb[2].mxu1 %vm1617_vm8, %v1610_v61 }
 0x310   :  { %1718 = vmatprep.mubr.f32.mxu0 %v2365_v0  ;;  %1831 = vmatprep.mubr.f32.mxu1 %v2365_v0 }
 0x313   :  { %2290 = vmatmul.mubr.msk.f32.gmra.mrb[4].mxu0 %vm1617_vm8, %v1611_v21  ;;  %2298 = vmatmul.mubr.msk.f32.gmra.mrb[4].mxu1 %vm1617_vm8, %v1611_v21 }
 0x314   :  { %1724 = vmatprep.mubr.f32.mxu0 %v2365_v0  ;;  %1837 = vmatprep.mubr.f32.mxu1 %v2365_v0 }
 0x317   :  { %2291 = vmatmul.mubr.msk.f32.gmra.mrb[6].mxu0 %vm1617_vm8, %v1612_v50  ;;  %2299 = vmatmul.mubr.msk.f32.gmra.mrb[6].mxu1 %vm1617_vm8, %v1612_v50 }
 0x318   :  { %1730 = vmatprep.mubr.f32.mxu0 %v2365_v0  ;;  %1843 = vmatprep.mubr.f32.mxu1 %v2365_v0 }
 0x31b   :  { %2292 = vmatmul.mubr.msk.f32.gmra.mrb[8].mxu0 %vm1617_vm8, %v1613_v48  ;;  %2300 = vmatmul.mubr.msk.f32.gmra.mrb[8].mxu1 %vm1617_vm8, %v1613_v48 }
 0x31c   :  { %1736 = vmatprep.mubr.f32.mxu0 %v2365_v0  ;;  %1849 = vmatprep.mubr.f32.mxu1 %v2365_v0 }
 0x31f   :  { %2293 = vmatmul.mubr.msk.f32.gmra.mrb[10].mxu0 %vm1617_vm8, %v1614_v15  ;;  %2301 = vmatmul.mubr.msk.f32.gmra.mrb[10].mxu1 %vm1617_vm8, %v1614_v15 }
 0x320   :  { %1742 = vmatprep.mubr.f32.mxu0 %v2365_v0  ;;  %1855 = vmatprep.mubr.f32.mxu1 %v2365_v0 }
 0x323   :  { %2294 = vmatmul.mubr.msk.f32.gmra.mrb[12].mxu0 %vm1617_vm8, %v1615_v29  ;;  %2302 = vmatmul.mubr.msk.f32.gmra.mrb[12].mxu1 %vm1617_vm8, %v1615_v29 }
 0x324   :  { %1748 = vmatprep.mubr.f32.mxu0 %v2365_v0  ;;  %1861 = vmatprep.mubr.f32.mxu1 %v2365_v0 }
 0x327   :  { %2295 = vmatmul.mubr.msk.f32.gmra.mrb[14].mxu0 %vm1617_vm8, %v1616_v11  ;;  %2303 = vmatmul.mubr.msk.f32.gmra.mrb[14].mxu1 %vm1617_vm8, %v1616_v11 }
 0x3de   :  { %v4252_v7 = vpop.f32.mrb[0].mxu0  ;;  %v4254_v53 = vpop.f32.mrb[0].mxu1 }
 0x3df   :  { %v1908_v52 = vmul.f32 %v4252_v7, %v4252_v7  ;;  %v4258_v23 = vpop.f32.mrb[1].mxu0  ;;  %v4260_v3 = vpop.f32.mrb[1].mxu1  ;;  %v1910_v33 = vmul.f32 %v4254_v53, %v4254_v53 }
 0x3e0   :  { %v1868_v49 = vadd.f32 %v4258_v23, %v4252_v7  ;;  %v1909_v0 = vmul.f32 %v4258_v23, %v4258_v23  ;;  %v1911_v45 = vmul.f32 %v4260_v3, %v4260_v3 }
 0x3e2   :  { %v1940_v13 = vadd.f32 %v1909_v0, %v1908_v52  ;;  %v1869_v27 = vadd.f32 %v1868_v49, %v4254_v53  ;;  %v4269_v12 = vpop.f32.mrb[2].mxu0  ;;  %v4271_v58 = vpop.f32.mrb[2].mxu1 }
 0x3e3   :  { %v1912_v44 = vmul.f32 %v4269_v12, %v4269_v12  ;;  %v4277_v8 = vpop.f32.mrb[3].mxu0  ;;  %v1914_v17 = vmul.f32 %v4271_v58, %v4271_v58  ;;  %v4281_v16 = vpop.f32.mrb[3].mxu1 }
 0x3e4   :  { %v1941_v46 = vadd.f32 %v1940_v13, %v1910_v33  ;;  %v1870_v37 = vadd.f32 %v1869_v27, %v4260_v3  ;;  %v1873_v5 = vadd.f32 %v4277_v8, %v4269_v12  ;;  %v1913_v30 = vmul.f32 %v4277_v8, %v4277_v8 }
 0x3e5   :  { %v1915_v36 = vmul.f32 %v4281_v16, %v4281_v16 }
 0x3e6   :  { %v1945_v62 = vadd.f32 %v1913_v30, %v1912_v44  ;;  %v1874_v2 = vadd.f32 %v1873_v5, %v4271_v58  ;;  %1871 = vadd.xlane.f32.xlu0 %v1870_v37  ;;  %v4289_v40 = vpop.f32.mrb[4].mxu0  ;;  %v1942_v26 = vadd.f32 %v1941_v46, %v1911_v45  ;;  %v4291_v42 = vpop.f32.mrb[4].mxu1 }
 0x3e7   :  { %v1916_v1 = vmul.f32 %v4289_v40, %v4289_v40  ;;  %v4297_v14 = vpop.f32.mrb[5].mxu0  ;;  %v1918_v34 = vmul.f32 %v4291_v42, %v4291_v42  ;;  %v4301_v25 = vpop.f32.mrb[5].mxu1 }
 0x3e8   :  { %v1946_v47 = vadd.f32 %v1945_v62, %v1914_v17  ;;  %v1875_v22 = vadd.f32 %v1874_v2, %v4281_v16  ;;  %v1878_v55 = vadd.f32 %v4297_v14, %v4289_v40  ;;  %v1917_v10 = vmul.f32 %v4297_v14, %v4297_v14  ;;  %1943 = vadd.xlane.f32.xlu1 %v1942_v26 }
 0x3e9   :  { %v1919_v59 = vmul.f32 %v4301_v25, %v4301_v25 }
 0x3ea   :  { %v1950_v38 = vadd.f32 %v1917_v10, %v1916_v1  ;;  %v1879_v35 = vadd.f32 %v1878_v55, %v4291_v42  ;;  %v1947_v9 = vadd.f32 %v1946_v47, %v1915_v36  ;;  %v4311_v54 = vpop.f32.mrb[6].mxu0  ;;  %v4313_v32 = vpop.f32.mrb[6].mxu1 }
 0x3eb   :  { %v1920_v41 = vmul.f32 %v4311_v54, %v4311_v54  ;;  %v4317_v24 = vpop.f32.mrb[7].mxu0  ;;  %v4319_v60 = vpop.f32.mrb[7].mxu1  ;;  %v1922_v20 = vmul.f32 %v4313_v32, %v4313_v32 }
 0x3ec   :  { %v1951_v56 = vadd.f32 %v1950_v38, %v1918_v34  ;;  %v1880_v28 = vadd.f32 %v1879_v35, %v4301_v25  ;;  %1948 = vadd.xlane.f32.xlu0 %v1947_v9  ;;  %1876 = vadd.xlane.f32.xlu1 %v1875_v22  ;;  %v1883_v57 = vadd.f32 %v4317_v24, %v4311_v54 }
 0x3ed   :  { %v1921_v19 = vmul.f32 %v4317_v24, %v4317_v24  ;;  %v1923_v18 = vmul.f32 %v4319_v60, %v4319_v60 }
 0x3ee   :  { %v4328_v63 = vpop.f32.mrb[8].mxu0  ;;  %v1884_v31 = vadd.f32 %v1883_v57, %v4313_v32  ;;  %v1952_v4 = vadd.f32 %v1951_v56, %v1919_v59  ;;  %v4331_v6 = vpop.f32.mrb[8].mxu1 }
 0x3ef   :  { %v1955_v43 = vadd.f32 %v1921_v19, %v1920_v41  ;;  %v1924_v51 = vmul.f32 %v4328_v63, %v4328_v63  ;;  %v4335_v39 = vpop.f32.mrb[9].mxu0  ;;  %v1926_v61 = vmul.f32 %v4331_v6, %v4331_v6  ;;  %v4341_v21 = vpop.f32.mrb[9].mxu1 }
 0x3f0   :  { %v1888_v50 = vadd.f32 %v4335_v39, %v4328_v63  ;;  %v1925_v48 = vmul.f32 %v4335_v39, %v4335_v39  ;;  %v1885_v15 = vadd.f32 %v1884_v31, %v4319_v60  ;;  %1953 = vadd.xlane.f32.xlu1 %v1952_v4  ;;  %1881 = vadd.xlane.f32.xlu0 %v1880_v28 }
 0x3f1   :  { %v1956_v29 = vadd.f32 %v1955_v43, %v1922_v20  ;;  %v1927_v49 = vmul.f32 %v4341_v21, %v4341_v21 }
 0x3f2   :  { %v1960_v11 = vadd.f32 %v1925_v48, %v1924_v51  ;;  %v1889_v52 = vadd.f32 %v1888_v50, %v4331_v6  ;;  %v4351_v0 = vpop.f32.mrb[10].mxu0  ;;  %v4353_v33 = vpop.f32.mrb[10].mxu1 }
 0x3f3   :  { %v1928_v13 = vmul.f32 %v4351_v0, %v4351_v0  ;;  %v4357_v27 = vpop.f32.mrb[11].mxu0  ;;  %v1930_v45 = vmul.f32 %v4353_v33, %v4353_v33  ;;  %v4361_v44 = vpop.f32.mrb[11].mxu1  ;;  %v1957_v17 = vadd.f32 %v1956_v29, %v1923_v18 }
 0x3f4   :  { %v1961_v46 = vadd.f32 %v1960_v11, %v1926_v61  ;;  %v1890_v37 = vadd.f32 %v1889_v52, %v4341_v21  ;;  %1886 = vadd.xlane.f32.xlu0 %v1885_v15  ;;  %v1893_v5 = vadd.f32 %v4357_v27, %v4351_v0  ;;  %v1929_v30 = vmul.f32 %v4357_v27, %v4357_v27 }
 0x3f5   :  { %v1931_v36 = vmul.f32 %v4361_v44, %v4361_v44 }
 0x3f6   :  { %v1965_v62 = vadd.f32 %v1929_v30, %v1928_v13  ;;  %1891 = vadd.xlane.f32.xlu1 %v1890_v37  ;;  %v4368_v2 = vpop.f32.mrb[12].mxu0  ;;  %v1894_v26 = vadd.f32 %v1893_v5, %v4353_v33  ;;  %v4373_v1 = vpop.f32.mrb[12].mxu1  ;;  %v1962_v34 = vadd.f32 %v1961_v46, %v1927_v49 }
 0x3f7   :  { %v1932_v47 = vmul.f32 %v4368_v2, %v4368_v2  ;;  %v4377_v22 = vpop.f32.mrb[13].mxu0  ;;  %v1934_v55 = vmul.f32 %v4373_v1, %v4373_v1  ;;  %v4381_v10 = vpop.f32.mrb[13].mxu1 }
 0x3f8   :  { %v1898_v38 = vadd.f32 %v4377_v22, %v4368_v2  ;;  %v1933_v35 = vmul.f32 %v4377_v22, %v4377_v22  ;;  %v1966_v59 = vadd.f32 %v1965_v62, %v1930_v45  ;;  %v1895_v9 = vadd.f32 %v1894_v26, %v4361_v44  ;;  %1958 = vadd.xlane.f32.xlu0 %v1957_v17 }
 0x3f9   :  { %v1935_v28 = vmul.f32 %v4381_v10, %v4381_v10 }
 0x3fa   :  { %v1970_v41 = vadd.f32 %v1933_v35, %v1932_v47  ;;  %v1899_v56 = vadd.f32 %v1898_v38, %v4373_v1  ;;  %1963 = vadd.xlane.f32.xlu1 %v1962_v34  ;;  %v4391_v57 = vpop.f32.mrb[14].mxu0  ;;  %v4393_v19 = vpop.f32.mrb[14].mxu1  ;;  %v1967_v20 = vadd.f32 %v1966_v59, %v1931_v36 }
 0x3fb   :  { %v1936_v31 = vmul.f32 %v4391_v57, %v4391_v57  ;;  %v4397_v4 = vpop.f32.mrb[15].mxu0  ;;  %v1938_v43 = vmul.f32 %v4393_v19, %v4393_v19  ;;  %v4401_v51 = vpop.f32.mrb[15].mxu1 }
 0x3fc   :  { %v1971_v18 = vadd.f32 %v1970_v41, %v1934_v55  ;;  %v1900_v61 = vadd.f32 %v1899_v56, %v4381_v10  ;;  %1896 = vadd.xlane.f32.xlu0 %v1895_v9  ;;  %v1903_v50 = vadd.f32 %v4397_v4, %v4391_v57  ;;  %v1937_v48 = vmul.f32 %v4397_v4, %v4397_v4 }
 0x3fd   :  { %v1939_v11 = vmul.f32 %v4401_v51, %v4401_v51 }
 0x3fe   :  { %v1975_v15 = vadd.f32 %v1937_v48, %v1936_v31  ;;  %1901 = vadd.xlane.f32.xlu1 %v1900_v61  ;;  %v1904_v29 = vadd.f32 %v1903_v50, %v4393_v19  ;;  %v1972_v52 = vadd.f32 %v1971_v18, %v1935_v28 }
 0x400   :  { %v1976_v49 = vadd.f32 %v1975_v15, %v1938_v43  ;;  %1968 = vadd.xlane.f32.xlu0 %v1967_v20  ;;  %v1905_v13 = vadd.f32 %v1904_v29, %v4401_v51 }
 0x402   :  { %v1977_v45 = vadd.f32 %v1976_v49, %v1939_v11  ;;  %1973 = vadd.xlane.f32.xlu1 %v1972_v52 }
 0x404   :  { %1906 = vadd.xlane.f32.xlu0 %v1905_v13 }
 0x408   :  { %1978 = vadd.xlane.f32.xlu0 %v1977_v45 }
 0x473   :  { %v1872_v17 = vpop.xlane.xlu0 %1871 }
 0x474   :  { %v1980_v46 = vmul.f32 0.001953125, %v1872_v17  ;;  %v2020_v17 = vld [vmem:[%s4624_s6] sm:$0xff] }
 0x475   :  { %v1944_v37 = vpop.xlane.xlu1 %1943 }
 0x476   :  { %v1996_v5 = vmul.f32 %v1980_v46, %v1980_v46  ;;  %v1988_v30 = vmul.f32 0.001953125, %v1944_v37 }
 0x478   :  { %v2004_v62 = vsub.f32 %v1988_v30, %v1996_v5 }
 0x479   :  { %v1949_v26 = vpop.xlane.xlu0 %1948  ;;  %v1877_v36 = vpop.xlane.xlu1 %1876 }
 0x47a   :  { %v2012_v34 = vmax.f32 %v2004_v62, 0.0  ;;  %v4412_v47 = vmul.f32 0.001953125, %v1877_v36  ;;  %v1989_v38 = vmul.f32 0.001953125, %v1949_v26 }
 0x47c   :  { %v2028_v55 = vadd.f32 1e-05, %v2012_v34  ;;  %v1997_v35 = vmul.f32 %v4412_v47, %v4412_v47 }
 0x47d   :  { %v1954_v59 = vpop.xlane.xlu1 %1953  ;;  %v1882_v9 = vpop.xlane.xlu0 %1881 }
 0x47e   :  { %2340 = vrsqrt.f32 %v2028_v55  ;;  %v2005_v41 = vsub.f32 %v1989_v38, %v1997_v35  ;;  %v4416_v56 = vmul.f32 0.001953125, %v1882_v9  ;;  %v1990_v20 = vmul.f32 0.001953125, %v1954_v59  ;;  %v2021_v59 = vld [vmem:[%s4624_s6 + $0x8] sm:$0xff] }
 0x480   :  { %v2013_v28 = vmax.f32 %v2005_v41, 0.0  ;;  %v1998_v31 = vmul.f32 %v4416_v56, %v4416_v56 }
 0x481   :  { %v1887_v43 = vpop.xlane.xlu0 %1886 }
 0x482   :  { %v2029_v18 = vadd.f32 1e-05, %v2013_v28  ;;  %v2006_v61 = vsub.f32 %v1990_v20, %v1998_v31  ;;  %v4420_v50 = vmul.f32 0.001953125, %v1887_v43 }
 0x483   :  { %v1892_v48 = vpop.xlane.xlu1 %1891 }
 0x484   :  { %2342 = vrsqrt.f32 %v2029_v18  ;;  %v2014_v15 = vmax.f32 %v2006_v61, 0.0  ;;  %v4422_v29 = vmul.f32 0.001953125, %v1892_v48  ;;  %v1999_v49 = vmul.f32 %v4420_v50, %v4420_v50 }
 0x485   :  { %v1959_v11 = vpop.xlane.xlu0 %1958 }
 0x486   :  { %v2030_v52 = vadd.f32 1e-05, %v2014_v15  ;;  %v2000_v13 = vmul.f32 %v4422_v29, %v4422_v29  ;;  %v1991_v45 = vmul.f32 0.001953125, %v1959_v11 }
 0x487   :  { %v1964_v37 = vpop.xlane.xlu1 %1963 }
 0x488   :  { %v2341_v5 = vpop.eup %2340  ;;  %2344 = vrsqrt.f32 %v2030_v52  ;;  %v2007_v30 = vsub.f32 %v1991_v45, %v1999_v49  ;;  %v1992_v62 = vmul.f32 0.001953125, %v1964_v37  ;;  %v2022_v49 = vld [vmem:[%s4624_s6 + $0x10] sm:$0xff] }
 0x489   :  { %v1897_v26 = vpop.xlane.xlu0 %1896  ;;  %v2044_v36 = vmul.f32 %v2341_v5, %v2020_v17  ;;  %v2052_v17 = vld [vmem:[%s4625_s7] sm:$0xff] }
 0x48a   :  { %v2015_v34 = vmax.f32 %v2007_v30, 0.0  ;;  %v2008_v55 = vsub.f32 %v1992_v62, %v2000_v13  ;;  %v4431_v38 = vmul.f32 0.001953125, %v1897_v26 }
 0x48b   :  { %2078 = vperm.xlu1 %2331, %v2044_v36   ;;  %v1902_v35 = vpop.xlane.xlu1 %1901  ;;  %v2060_v52 = vmul.f32 %v2044_v36, %v1980_v46 }
 0x48c   :  { %v2031_v9 = vadd.f32 1e-05, %v2015_v34  ;;  %v2016_v41 = vmax.f32 %v2008_v55, 0.0  ;;  %v4436_v28 = vmul.f32 0.001953125, %v1902_v35  ;;  %v2001_v20 = vmul.f32 %v4431_v38, %v4431_v38  ;;  %v2053_v55 = vld [vmem:[%s4625_s7 + $0x8] sm:$0xff]  ;;  %v2054_v35 = vld [vmem:[%s4625_s7 + $0x10] sm:$0xff] }
 0x48d   :  { %v1969_v31 = vpop.xlane.xlu0 %1968  ;;  %v2068_v36 = vsub.f32 %v2052_v17, %v2060_v52 }
 0x48e   :  { %v2343_v43 = vpop.eup %2342  ;;  %2346 = vrsqrt.f32 %v2031_v9  ;;  %v2032_v18 = vadd.f32 1e-05, %v2016_v41  ;;  %v2002_v61 = vmul.f32 %v4436_v28, %v4436_v28  ;;  %v1993_v48 = vmul.f32 0.001953125, %v1969_v31 }
 0x48f   :  { %v2045_v15 = vmul.f32 %v2343_v43, %v2021_v59  ;;  %v1974_v11 = vpop.xlane.xlu1 %1973 }
 0x490   :  { %2348 = vrsqrt.f32 %v2032_v18  ;;  %v2009_v13 = vsub.f32 %v1993_v48, %v2001_v20  ;;  %v1994_v45 = vmul.f32 0.001953125, %v1974_v11  ;;  %v2023_v18 = vld [vmem:[%s4624_s6 + $0x18] sm:$0xff] }
 0x491   :  { %2083 = vperm.xlu0 %2330, %v2045_v15   ;;  %v1907_v37 = vpop.xlane.xlu0 %1906  ;;  %v2061_v34 = vmul.f32 %v2045_v15, %v4412_v47 }
 0x492   :  { %v2345_v5 = vpop.eup %2344  ;;  %v2017_v30 = vmax.f32 %v2009_v13, 0.0  ;;  %v2010_v62 = vsub.f32 %v1994_v45, %v2002_v61  ;;  %v1987_v26 = vmul.f32 0.001953125, %v1907_v37 }
 0x493   :  { %v2046_v46 = vmul.f32 %v2345_v5, %v2022_v49  ;;  %v2069_v61 = vsub.f32 %v2053_v55, %v2061_v34  ;;  %v2055_v5 = vld [vmem:[%s4625_s7 + $0x18] sm:$0xff]  ;;  %v2025_v34 = vld [vmem:[%s4624_s6 + $0x28] sm:$0xff]  ;;  %v2026_v55 = vld [vmem:[%s4624_s6 + $0x30] sm:$0xff] }
 0x494   :  { %v2033_v59 = vadd.f32 1e-05, %v2017_v30  ;;  %v2018_v9 = vmax.f32 %v2010_v62, 0.0  ;;  %v2003_v47 = vmul.f32 %v1987_v26, %v1987_v26  ;;  %v2056_v30 = vld [vmem:[%s4625_s7 + $0x20] sm:$0xff] }
 0x495   :  { %v2062_v41 = vmul.f32 %v2046_v46, %v4416_v56  ;;  %2088 = vperm.xlu1 %2331, %v2046_v46   ;;  %2150 = vperm.xlu0 %2330, %v2068_v36   ;;  %v1979_v20 = vpop.xlane.xlu0 %1978  ;;  %v2024_v56 = vld [vmem:[%s4624_s6 + $0x20] sm:$0xff] }
 0x496   :  { %2350 = vrsqrt.f32 %v2033_v59  ;;  %v2034_v31 = vadd.f32 1e-05, %v2018_v9  ;;  %v1995_v43 = vmul.f32 0.001953125, %v1979_v20  ;;  %v2058_v20 = vld [vmem:[%s4625_s7 + $0x30] sm:$0xff] }
 0x497   :  { %v2070_v48 = vsub.f32 %v2054_v35, %v2062_v41 }
 0x498   :  { %v2347_v15 = vpop.eup %2346  ;;  %2352 = vrsqrt.f32 %v2034_v31  ;;  %v2011_v11 = vsub.f32 %v1995_v43, %v2003_v47  ;;  %v2027_v47 = vld [vmem:[%s4624_s6 + $0x38] sm:$0xff] }
 0x499   :  { %2155 = vperm.xlu1 %2331, %v2069_v61   ;;  %2160 = vperm.xlu0 %2330, %v2070_v48   ;;  %v2047_v52 = vmul.f32 %v2347_v15, %v2023_v18  ;;  %v2059_v15 = vld [vmem:[%s4625_s7 + $0x38] sm:$0xff] }
 0x49a   :  { %v2349_v49 = vpop.eup %2348  ;;  %v2019_v13 = vmax.f32 %v2011_v11, 0.0 }
 0x49b   :  { %v2048_v45 = vmul.f32 %v2349_v49, %v2024_v56  ;;  %v2063_v17 = vmul.f32 %v2047_v52, %v4420_v50 }
 0x49c   :  { %v2035_v37 = vadd.f32 1e-05, %v2019_v13 }
 0x49d   :  { %2093 = vperm.xlu1 %2331, %v2047_v52   ;;  %2098 = vperm.xlu0 %2330, %v2048_v45   ;;  %v2064_v62 = vmul.f32 %v2048_v45, %v4422_v29  ;;  %v2071_v46 = vsub.f32 %v2055_v5, %v2063_v17  ;;  %v2057_v29 = vld [vmem:[%s4625_s7 + $0x28] sm:$0xff] }
 0x49e   :  { %2354 = vrsqrt.f32 %v2035_v37 }
 0x49f   :  { %v2072_v50 = vsub.f32 %v2056_v30, %v2064_v62 }
 0x4a0   :  { %v2351_v36 = vpop.eup %2350 }
 0x4a1   :  { %2165 = vperm.xlu1 %2331, %v2071_v46   ;;  %2170 = vperm.xlu0 %2330, %v2072_v50   ;;  %v2049_v35 = vmul.f32 %v2351_v36, %v2025_v34 }
 0x4a2   :  { %v2353_v59 = vpop.eup %2352 }
 0x4a3   :  { %v2050_v9 = vmul.f32 %v2353_v59, %v2026_v55  ;;  %v2065_v41 = vmul.f32 %v2049_v35, %v4431_v38 }
 0x4a5   :  { %2103 = vperm.xlu1 %2331, %v2049_v35   ;;  %2108 = vperm.xlu0 %2330, %v2050_v9   ;;  %v2066_v31 = vmul.f32 %v2050_v9, %v4436_v28  ;;  %v2073_v43 = vsub.f32 %v2057_v29, %v2065_v41 }
 0x4a7   :  { %v2074_v18 = vsub.f32 %v2058_v20, %v2066_v31 }
 0x4a8   :  { %v2355_v61 = vpop.eup %2354 }
 0x4a9   :  { %2175 = vperm.xlu1 %2331, %v2073_v43   ;;  %2180 = vperm.xlu0 %2330, %v2074_v18   ;;  %v2051_v38 = vmul.f32 %v2355_v61, %v2027_v47 }
 0x4ab   :  { %v2067_v48 = vmul.f32 %v2051_v38, %v1987_v26 }
 0x4ad   :  { %2113 = vperm.xlu1 %2331, %v2051_v38   ;;  %v2075_v11 = vsub.f32 %v2059_v15, %v2067_v48 }
 0x4b1   :  { %2185 = vperm.xlu1 %2331, %v2075_v11  }
 0x50a   :  { %v2079_v56 = vpop.permute.xlu1 %2078 }
 0x50b   :  { %v2116_v52 = vmul.f32 %v2079_v56, %v4252_v7  ;;  %v2117_v49 = vmul.f32 %v2079_v56, %v4258_v23  ;;  %v2118_v13 = vmul.f32 %v2079_v56, %v4254_v53  ;;  %v2119_v45 = vmul.f32 %v2079_v56, %v4260_v3 }
 0x510   :  { %v2084_v28 = vpop.permute.xlu0 %2083 }
 0x511   :  { %v2120_v26 = vmul.f32 %v2084_v28, %v4269_v12  ;;  %v2121_v5 = vmul.f32 %v2084_v28, %v4277_v8  ;;  %v2122_v30 = vmul.f32 %v2084_v28, %v4271_v58  ;;  %v2123_v62 = vmul.f32 %v2084_v28, %v4281_v16 }
 0x514   :  { %v2089_v17 = vpop.permute.xlu1 %2088  ;;  %v2151_v37 = vpop.permute.xlu0 %2150 }
 0x515   :  { %v2188_v34 = vadd.f32 %v2151_v37, %v2116_v52  ;;  %v2189_v46 = vadd.f32 %v2151_v37, %v2117_v49  ;;  %v2190_v50 = vadd.f32 %v2151_v37, %v2118_v13  ;;  %v2191_v7 = vadd.f32 %v2151_v37, %v2119_v45 }
 0x516   :  { %v2124_v23 = vmul.f32 %v2089_v17, %v4289_v40  ;;  %v2125_v53 = vmul.f32 %v2089_v17, %v4297_v14  ;;  %v2126_v3 = vmul.f32 %v2089_v17, %v4291_v42  ;;  %v2127_v36 = vmul.f32 %v2089_v17, %v4301_v25 }
 0x517   :  { %v2220_v55 = vmax.f32 %v2188_v34, 0.0  ;;  %v2221_v12 = vmax.f32 %v2189_v46, 0.0  ;;  %v2222_v35 = vmax.f32 %v2190_v50, 0.0  ;;  %v2223_v8 = vmax.f32 %v2191_v7, 0.0 }
 0x518   :  { %v2156_v59 = vpop.permute.xlu1 %2155  ;;  %v2161_v58 = vpop.permute.xlu0 %2160 }
 0x519   :  { %v2192_v9 = vadd.f32 %v2156_v59, %v2120_v26  ;;  %v2193_v16 = vadd.f32 %v2156_v59, %v2121_v5  ;;  %v2194_v41 = vadd.f32 %v2156_v59, %v2122_v30  ;;  %v2195_v29 = vadd.f32 %v2156_v59, %v2123_v62  ;;  %2252 = vst [vmem:[%s4626_s8] sm:$0xff] %v2220_v55 }
 0x51a   :  { %2253 = vst [vmem:[%s4626_s8 + $0x8] sm:$0xff] %v2221_v12  ;;  %2254 = vst [vmem:[%s4626_s8 + $0x10] sm:$0xff] %v2222_v35  ;;  %v2196_v40 = vadd.f32 %v2161_v58, %v2124_v23  ;;  %v2197_v42 = vadd.f32 %v2161_v58, %v2125_v53  ;;  %v2198_v14 = vadd.f32 %v2161_v58, %v2126_v3 }
 0x51b   :  { %2255 = vst [vmem:[%s4626_s8 + $0x18] sm:$0xff] %v2223_v8  ;;  %v2199_v25 = vadd.f32 %v2161_v58, %v2127_v36  ;;  %v2224_v20 = vmax.f32 %v2192_v9, 0.0  ;;  %v2225_v31 = vmax.f32 %v2193_v16, 0.0  ;;  %v2226_v47 = vmax.f32 %v2194_v41, 0.0 }
 0x51c   :  { %v2227_v43 = vmax.f32 %v2195_v29, 0.0  ;;  %v2228_v18 = vmax.f32 %v2196_v40, 0.0  ;;  %v2229_v61 = vmax.f32 %v2197_v42, 0.0  ;;  %v2230_v38 = vmax.f32 %v2198_v14, 0.0  ;;  %v2094_v15 = vpop.permute.xlu1 %2093  ;;  %v2099_v11 = vpop.permute.xlu0 %2098 }
 0x51d   :  { %v2231_v48 = vmax.f32 %v2199_v25, 0.0  ;;  %2256 = vst [vmem:[%s4626_s8 + $0x20] sm:$0xff] %v2224_v20  ;;  %2257 = vst [vmem:[%s4626_s8 + $0x28] sm:$0xff] %v2225_v31  ;;  %v2128_v56 = vmul.f32 %v2094_v15, %v4311_v54  ;;  %v2129_v28 = vmul.f32 %v2094_v15, %v4317_v24  ;;  %v2130_v52 = vmul.f32 %v2094_v15, %v4313_v32 }
 0x51e   :  { %2258 = vst [vmem:[%s4626_s8 + $0x30] sm:$0xff] %v2226_v47  ;;  %2259 = vst [vmem:[%s4626_s8 + $0x38] sm:$0xff] %v2227_v43  ;;  %v2131_v49 = vmul.f32 %v2094_v15, %v4319_v60  ;;  %v2132_v13 = vmul.f32 %v2099_v11, %v4328_v63  ;;  %v2133_v45 = vmul.f32 %v2099_v11, %v4335_v39 }
 0x51f   :  { %2260 = vst [vmem:[%s4626_s8 + $0x40] sm:$0xff] %v2228_v18  ;;  %2261 = vst [vmem:[%s4626_s8 + $0x48] sm:$0xff] %v2229_v61  ;;  %v2134_v17 = vmul.f32 %v2099_v11, %v4331_v6  ;;  %v2135_v37 = vmul.f32 %v2099_v11, %v4341_v21 }
 0x520   :  { %2262 = vst [vmem:[%s4626_s8 + $0x50] sm:$0xff] %v2230_v38  ;;  %2263 = vst [vmem:[%s4626_s8 + $0x58] sm:$0xff] %v2231_v48  ;;  %v2166_v26 = vpop.permute.xlu1 %2165  ;;  %v2171_v5 = vpop.permute.xlu0 %2170 }
 0x521   :  { %v2200_v30 = vadd.f32 %v2166_v26, %v2128_v56  ;;  %v2201_v62 = vadd.f32 %v2166_v26, %v2129_v28  ;;  %v2202_v34 = vadd.f32 %v2166_v26, %v2130_v52  ;;  %v2203_v54 = vadd.f32 %v2166_v26, %v2131_v49 }
 0x522   :  { %v2204_v46 = vadd.f32 %v2171_v5, %v2132_v13  ;;  %v2205_v24 = vadd.f32 %v2171_v5, %v2133_v45  ;;  %v2206_v50 = vadd.f32 %v2171_v5, %v2134_v17  ;;  %v2207_v32 = vadd.f32 %v2171_v5, %v2135_v37 }
 0x523   :  { %v2232_v7 = vmax.f32 %v2200_v30, 0.0  ;;  %v2233_v60 = vmax.f32 %v2201_v62, 0.0  ;;  %v2234_v23 = vmax.f32 %v2202_v34, 0.0  ;;  %v2235_v63 = vmax.f32 %v2203_v54, 0.0 }
 0x524   :  { %v2236_v53 = vmax.f32 %v2204_v46, 0.0  ;;  %v2237_v39 = vmax.f32 %v2205_v24, 0.0  ;;  %v2238_v3 = vmax.f32 %v2206_v50, 0.0  ;;  %v2239_v6 = vmax.f32 %v2207_v32, 0.0  ;;  %v2104_v36 = vpop.permute.xlu1 %2103  ;;  %v2109_v21 = vpop.permute.xlu0 %2108 }
 0x525   :  { %2264 = vst [vmem:[%s4626_s8 + $0x60] sm:$0xff] %v2232_v7  ;;  %2265 = vst [vmem:[%s4626_s8 + $0x68] sm:$0xff] %v2233_v60  ;;  %v2136_v55 = vmul.f32 %v2104_v36, %v4351_v0  ;;  %v2137_v12 = vmul.f32 %v2104_v36, %v4357_v27  ;;  %v2138_v35 = vmul.f32 %v2104_v36, %v4353_v33 }
 0x526   :  { %2266 = vst [vmem:[%s4626_s8 + $0x70] sm:$0xff] %v2234_v23  ;;  %2267 = vst [vmem:[%s4626_s8 + $0x78] sm:$0xff] %v2235_v63  ;;  %v2139_v8 = vmul.f32 %v2104_v36, %v4361_v44  ;;  %v2140_v58 = vmul.f32 %v2109_v21, %v4368_v2  ;;  %v2141_v9 = vmul.f32 %v2109_v21, %v4377_v22 }
 0x527   :  { %2268 = vst [vmem:[%s4626_s8 + $0x80] sm:$0xff] %v2236_v53  ;;  %2269 = vst [vmem:[%s4626_s8 + $0x88] sm:$0xff] %v2237_v39  ;;  %v2142_v16 = vmul.f32 %v2109_v21, %v4373_v1  ;;  %v2143_v41 = vmul.f32 %v2109_v21, %v4381_v10 }
 0x528   :  { %2270 = vst [vmem:[%s4626_s8 + $0x90] sm:$0xff] %v2238_v3  ;;  %2271 = vst [vmem:[%s4626_s8 + $0x98] sm:$0xff] %v2239_v6  ;;  %v2176_v59 = vpop.permute.xlu1 %2175  ;;  %v2181_v29 = vpop.permute.xlu0 %2180 }
 0x529   :  { %v2208_v40 = vadd.f32 %v2176_v59, %v2136_v55  ;;  %v2209_v42 = vadd.f32 %v2176_v59, %v2137_v12  ;;  %v2210_v14 = vadd.f32 %v2176_v59, %v2138_v35  ;;  %v2211_v0 = vadd.f32 %v2176_v59, %v2139_v8 }
 0x52a   :  { %v2212_v25 = vadd.f32 %v2181_v29, %v2140_v58  ;;  %v2213_v27 = vadd.f32 %v2181_v29, %v2141_v9  ;;  %v2214_v20 = vadd.f32 %v2181_v29, %v2142_v16  ;;  %v2215_v33 = vadd.f32 %v2181_v29, %v2143_v41 }
 0x52b   :  { %v2240_v31 = vmax.f32 %v2208_v40, 0.0  ;;  %v2241_v44 = vmax.f32 %v2209_v42, 0.0  ;;  %v2242_v47 = vmax.f32 %v2210_v14, 0.0  ;;  %v2243_v43 = vmax.f32 %v2211_v0, 0.0 }
 0x52c   :  { %v2244_v2 = vmax.f32 %v2212_v25, 0.0  ;;  %v2245_v18 = vmax.f32 %v2213_v27, 0.0  ;;  %v2246_v22 = vmax.f32 %v2214_v20, 0.0  ;;  %v2247_v61 = vmax.f32 %v2215_v33, 0.0  ;;  %v2114_v1 = vpop.permute.xlu1 %2113 }
 0x52d   :  { %2272 = vst [vmem:[%s4626_s8 + $0xa0] sm:$0xff] %v2240_v31  ;;  %2273 = vst [vmem:[%s4626_s8 + $0xa8] sm:$0xff] %v2241_v44  ;;  %v2144_v10 = vmul.f32 %v2114_v1, %v4391_v57  ;;  %v2145_v38 = vmul.f32 %v2114_v1, %v4397_v4  ;;  %v2146_v48 = vmul.f32 %v2114_v1, %v4393_v19 }
 0x52e   :  { %2274 = vst [vmem:[%s4626_s8 + $0xb0] sm:$0xff] %v2242_v47  ;;  %2275 = vst [vmem:[%s4626_s8 + $0xb8] sm:$0xff] %v2243_v43  ;;  %v2147_v15 = vmul.f32 %v2114_v1, %v4401_v51 }
 0x52f   :  { %2276 = vst [vmem:[%s4626_s8 + $0xc0] sm:$0xff] %v2244_v2  ;;  %2277 = vst [vmem:[%s4626_s8 + $0xc8] sm:$0xff] %v2245_v18 }
 0x530   :  { %2278 = vst [vmem:[%s4626_s8 + $0xd0] sm:$0xff] %v2246_v22  ;;  %2279 = vst [vmem:[%s4626_s8 + $0xd8] sm:$0xff] %v2247_v61  ;;  %v2186_v11 = vpop.permute.xlu1 %2185 }
 0x531   :  { %v2216_v56 = vadd.f32 %v2186_v11, %v2144_v10  ;;  %v2217_v28 = vadd.f32 %v2186_v11, %v2145_v38  ;;  %v2218_v52 = vadd.f32 %v2186_v11, %v2146_v48  ;;  %v2219_v49 = vadd.f32 %v2186_v11, %v2147_v15 }
 0x533   :  { %v2248_v13 = vmax.f32 %v2216_v56, 0.0  ;;  %v2249_v45 = vmax.f32 %v2217_v28, 0.0  ;;  %v2250_v17 = vmax.f32 %v2218_v52, 0.0  ;;  %v2251_v37 = vmax.f32 %v2219_v49, 0.0 }
 0x535   :  { %2280 = vst [vmem:[%s4626_s8 + $0xe0] sm:$0xff] %v2248_v13  ;;  %2281 = vst [vmem:[%s4626_s8 + $0xe8] sm:$0xff] %v2249_v45 }
 0x536   :  { %2282 = vst [vmem:[%s4626_s8 + $0xf0] sm:$0xff] %v2250_v17  ;;  %2283 = vst [vmem:[%s4626_s8 + $0xf8] sm:$0xff] %v2251_v37 }

</bundles_post_ra>
